<compile_context>
chip_gen: v5e
topology: v5e:2x2
jax: 0.10.0
libtpu: 0.0.40
codegen_flags: <defaults>
</compile_context>

<pallas_src>
import jax
import jax.numpy as jnp
from jax.experimental import pallas as pl
from jax.experimental.pallas import tpu as pltpu


# ----------------------------------------------------------------------------
# Model definition (synthetic, deterministic parameters)
#   conv_block: filter=[8, 16], kernel=[3, 3], bn=[False, True], stride=[2, 2]
#   fc_block:   dims=[32], dropFrac=0.5   (dropout = identity in eval mode)
# ----------------------------------------------------------------------------
NUM_INP_CHAN = 4
NUM_HR_BINS = 16
CONV_FILTERS = [8, 16]
FC_DIMS = [32]
RELU_SLOPE = 0.2
BN_EPS = 1e-5


def _leaky(v):
    return jnp.where(v >= 0.0, v, RELU_SLOPE * v)


# ----------------------------------------------------------------------------
# The fused Pallas kernel.
#
# Inputs (all f32, whole-array VMEM blocks):
#   xs    (4, N, 9, 9, 4)  : padded 16x16 input, parity-split over both spatial
#                            dims: xs[pr*2+pc, n, a, b, c] = xpad[n, 2a+pr, 2b+pc, c]
#   w1    (3, 3, 4, 8)     : conv1 weight, w1[kh, kw, cin, cout]
#   b1    (1, 8)           : conv1 bias
#   w2    (72, 16)         : conv2 weight (rows ordered (kh, kw, cin)), BN scale folded in
#   sh2   (1, 16)          : folded BN shift (beta - mean * scale)
#   wfc1  (16, 16, 32)     : FC1 weight, chunked per spatial position (ii*4+jj, cin, dout)
#   bfc1  (1, 32), wfc2 (32, 1), bfc2 (1, 1)
# Output: (N, 1) sigmoid scores.
# Scratch: conv1 activation, its column-parity-split zero-padded copy, the
#          conv2 im2col patch matrix, and the conv2 activation.
# ----------------------------------------------------------------------------
def _disc_kernel(xs_ref, w1_ref, b1_ref, w2_ref, sh2_ref, wfc1_ref, bfc1_ref,
                 wfc2_ref, bfc2_ref, out_ref,
                 act1_ref, a2_ref, p2_ref, y2_ref):
    n = out_ref.shape[0]
    m1 = n * 8 * 8                      # conv1 output pixels (n, 8, 8)

    # ---- conv1: 3x3 / stride 2 / pad 1, bias, LeakyReLU -----------------
    # im2col in VMEM: 9 shifted taps, each a static contiguous slice of the
    # parity-split padded input; accumulate 9 small MXU matmuls.
    acc1 = jnp.zeros((m1, 8), jnp.float32)
    for kh in range(3):
        for kw in range(3):
            q = (kh % 2) * 2 + (kw % 2)
            a0, b0 = kh // 2, kw // 2
            tap = xs_ref[q, :, a0:a0 + 8, b0:b0 + 8, :]          # (n, 8, 8, 4)
            acc1 = acc1 + jnp.dot(tap.reshape(m1, 4), w1_ref[kh, kw],
                                  preferred_element_type=jnp.float32)
    y1 = _leaky(acc1 + b1_ref[...])                              # (m1, 8)
    act1_ref[...] = y1.reshape(n, 8, 8, 8)                       # [n, h, w, c]

    # ---- repack conv1 activation: zero-padded + column-parity-split -----
    # a2[ps, n, r, b, c] = padded_act1[n, r, 2*b + ps, c]   (pad = 1 ring of 0)
    a2_ref[...] = jnp.zeros_like(a2_ref)
    for ps in range(2):
        for b in range(5):
            s = 2 * b + ps                                        # padded column
            if 1 <= s <= 8:
                a2_ref[ps, :, 1:9, b, :] = act1_ref[:, :, s - 1, :]

    # ---- conv2 im2col: gather the 9 taps into the patch matrix ----------
    # p2[n, ii, jj, (kh*3+kw)*8 + c] = padded_act1[n, 2ii+kh, 2jj+kw, c]
    # (jj dimension padded from 4 to 8 so the later flatten stays sublane-aligned)
    p2_ref[...] = jnp.zeros_like(p2_ref)
    for kh in range(3):
        for kw in range(3):
            k = kh * 3 + kw
            ps, b0 = kw % 2, kw // 2
            for ii in range(4):
                p2_ref[:, ii, 0:4, k * 8:(k + 1) * 8] = (
                    a2_ref[ps, :, 2 * ii + kh, b0:b0 + 4, :])

    # ---- conv2 matmul (+ folded BatchNorm) + LeakyReLU -------------------
    p2 = p2_ref[...].reshape(n * 32, 72)
    y2 = _leaky(jnp.dot(p2, w2_ref[...], preferred_element_type=jnp.float32)
                + sh2_ref[...])                                   # (n*32, 16)
    y2_ref[...] = y2.reshape(n, 32, 16)   # rows = ii*8 + jj; jj >= 4 is padding

    # ---- FC1 (dropout = identity in eval) over the NCHW flatten ----------
    # The torch.flatten(x, 1) permutation is folded into wfc1 (glue), so FC1 is
    # a sum of per-spatial-position chunk matmuls that read only valid rows.
    h = jnp.zeros((n, FC_DIMS[0]), jnp.float32)
    for ii in range(4):
        for jj in range(4):
            h = h + jnp.dot(y2_ref[:, ii * 8 + jj, :], wfc1_ref[ii * 4 + jj],
                            preferred_element_type=jnp.float32)
    h = _leaky(h + bfc1_ref[...])                                 # (n, 32)

    # ---- FC2 + Sigmoid ----------------------------------------------------
    logits = (jnp.dot(h, wfc2_ref[...], preferred_element_type=jnp.float32)
              + bfc2_ref[...])                                    # (n, 1)
    out_ref[...] = jax.nn.sigmoid(logits)


# ----------------------------------------------------------------------------
# Glue: parameter re-layout (init time) and the forward wrapper.
# ----------------------------------------------------------------------------
def init_params(key):
    params = {}
    keys = jax.random.split(key, 16)
    ki = iter(range(16))

    # conv1: Conv2d(4 -> 8, k=3, stride=2, pad=1, bias=True)   (bn=False)
    params["w1"] = 0.1 * jax.random.normal(keys[next(ki)], (CONV_FILTERS[0], NUM_INP_CHAN, 3, 3), jnp.float32)
    params["b1"] = 0.1 * jax.random.normal(keys[next(ki)], (CONV_FILTERS[0],), jnp.float32)

    # conv2: Conv2d(8 -> 16, k=3, stride=2, pad=1, bias=False) + BatchNorm2d(16)
    params["w2"] = 0.1 * jax.random.normal(keys[next(ki)], (CONV_FILTERS[1], CONV_FILTERS[0], 3, 3), jnp.float32)
    params["bn_gamma"] = 1.0 + 0.05 * jax.random.normal(keys[next(ki)], (CONV_FILTERS[1],), jnp.float32)
    params["bn_beta"] = 0.05 * jax.random.normal(keys[next(ki)], (CONV_FILTERS[1],), jnp.float32)
    params["bn_mean"] = 0.05 * jax.random.normal(keys[next(ki)], (CONV_FILTERS[1],), jnp.float32)
    params["bn_var"] = jax.random.uniform(keys[next(ki)], (CONV_FILTERS[1],), jnp.float32, 0.5, 1.5)

    flat_dim = CONV_FILTERS[-1] * 4 * 4   # 16x16 -> 8x8 -> 4x4 with 16 channels = 256

    # fc1: Linear(256 -> 32)  (stored as (in, out));  fc_out: Linear(32 -> 1)
    params["wfc1"] = 0.05 * jax.random.normal(keys[next(ki)], (flat_dim, FC_DIMS[0]), jnp.float32)
    params["bfc1"] = 0.05 * jax.random.normal(keys[next(ki)], (FC_DIMS[0],), jnp.float32)
    params["wfc2"] = 0.05 * jax.random.normal(keys[next(ki)], (FC_DIMS[0], 1), jnp.float32)
    params["bfc2"] = 0.05 * jax.random.normal(keys[next(ki)], (1,), jnp.float32)
    return params


def prepare_params(params):
    """Init-time re-layout: fold BN scale into conv2 weight, fold the NCHW
    flatten permutation into the FC1 weight, reshape biases to 2-D rows."""
    scale = params["bn_gamma"] / jnp.sqrt(params["bn_var"] + BN_EPS)
    shift = params["bn_beta"] - params["bn_mean"] * scale
    w1r = jnp.transpose(params["w1"], (2, 3, 1, 0)).astype(jnp.float32)            # (3,3,4,8)
    w2m = (jnp.transpose(params["w2"], (2, 3, 1, 0)).reshape(72, CONV_FILTERS[1])
           * scale[None, :]).astype(jnp.float32)                                   # (72,16)
    # wfc1 rows are torch-flatten features (c, ii, jj) -> chunk per (ii, jj).
    wfc1r = jnp.transpose(params["wfc1"].reshape(CONV_FILTERS[1], 4, 4, FC_DIMS[0]),
                          (1, 2, 0, 3)).reshape(16, CONV_FILTERS[1], FC_DIMS[0])
    return {
        "w1r": w1r,
        "b1": params["b1"].reshape(1, CONV_FILTERS[0]).astype(jnp.float32),
        "w2m": w2m,
        "sh2": shift.reshape(1, CONV_FILTERS[1]).astype(jnp.float32),
        "wfc1r": wfc1r.astype(jnp.float32),
        "bfc1": params["bfc1"].reshape(1, FC_DIMS[0]).astype(jnp.float32),
        "wfc2": params["wfc2"].astype(jnp.float32),
        "bfc2": params["bfc2"].reshape(1, 1).astype(jnp.float32),
    }


@jax.jit
def discriminator_forward(x_nchw, prep):
    """Forward pass identical (eval mode) to the PyTorch Discriminator."""
    N, C, H, W = x_nchw.shape
    assert C == NUM_INP_CHAN and H == NUM_HR_BINS and W == NUM_HR_BINS

    # NCHW -> NHWC, pad=1, then parity-split both spatial dims so the in-kernel
    # stride-2 im2col taps are contiguous static slices.
    x = jnp.transpose(x_nchw, (0, 2, 3, 1)).astype(jnp.float32)
    xpad = jnp.pad(x, ((0, 0), (1, 1), (1, 1), (0, 0)))                 # (N,18,18,4)
    xs = (xpad.reshape(N, 9, 2, 9, 2, C)
              .transpose(2, 4, 0, 1, 3, 5)
              .reshape(4, N, 9, 9, C))                                  # [pr*2+pc, n, a, b, c]

    operands = (xs, prep["w1r"], prep["b1"], prep["w2m"], prep["sh2"],
                prep["wfc1r"], prep["bfc1"], prep["wfc2"], prep["bfc2"])

    flops = 2 * (N * 64 * 36 * 8 + N * 32 * 72 * 16 + N * 256 * 32 + N * 32)
    bytes_accessed = sum(int(a.size) * 4 for a in operands) + N * 4

    return pl.pallas_call(
        _disc_kernel,
        out_shape=jax.ShapeDtypeStruct((N, 1), jnp.float32),
        in_specs=[pl.BlockSpec(memory_space=pltpu.MemorySpace.VMEM)] * len(operands),
        out_specs=pl.BlockSpec(memory_space=pltpu.MemorySpace.VMEM),
        scratch_shapes=[
            pltpu.VMEM((N, 8, 8, 8), jnp.float32),       # conv1 activation [n,h,w,c]
            pltpu.VMEM((2, N, 10, 5, 8), jnp.float32),   # padded, column-parity-split act1
            pltpu.VMEM((N, 4, 8, 72), jnp.float32),      # conv2 im2col patches
            pltpu.VMEM((N, 32, 16), jnp.float32),        # conv2 activation
        ],
        cost_estimate=pl.CostEstimate(flops=flops, transcendentals=N,
                                      bytes_accessed=bytes_accessed),
    )(*operands)


# ----------------------------------------------------------------------------
# Pure-JAX reference (same math as the PyTorch module, eval mode) for checking.
# ----------------------------------------------------------------------------
def _im2col_nhwc(x, k, stride, pad):
    N, H, W, C = x.shape
    xp = jnp.pad(x, ((0, 0), (pad, pad), (pad, pad), (0, 0)))
    Ho = (H + 2 * pad - k) // stride + 1
    Wo = (W + 2 * pad - k) // stride + 1
    cols = []
    for kh in range(k):
        for kw in range(k):
            cols.append(xp[:, kh:kh + stride * Ho:stride, kw:kw + stride * Wo:stride, :])
    return jnp.concatenate(cols, axis=-1).reshape(N * Ho * Wo, k * k * C), Ho, Wo


def _reference_forward(x_nchw, params):
    hi = jax.lax.Precision.HIGHEST
    x = jnp.transpose(x_nchw, (0, 2, 3, 1)).astype(jnp.float32)
    N = x.shape[0]
    p, Ho, Wo = _im2col_nhwc(x, 3, 2, 1)
    w1m = jnp.transpose(params["w1"], (2, 3, 1, 0)).reshape(-1, CONV_FILTERS[0])
    y = jnp.dot(p, w1m, precision=hi) + params["b1"][None, :]
    y = jnp.where(y >= 0, y, RELU_SLOPE * y).reshape(N, Ho, Wo, CONV_FILTERS[0])
    p, Ho, Wo = _im2col_nhwc(y, 3, 2, 1)
    w2m = jnp.transpose(params["w2"], (2, 3, 1, 0)).reshape(-1, CONV_FILTERS[1])
    scale = params["bn_gamma"] / jnp.sqrt(params["bn_var"] + BN_EPS)
    shift = params["bn_beta"] - params["bn_mean"] * scale
    y = jnp.dot(p, w2m, precision=hi) * scale[None, :] + shift[None, :]
    y = jnp.where(y >= 0, y, RELU_SLOPE * y).reshape(N, Ho, Wo, CONV_FILTERS[1])
    xf = jnp.transpose(y, (0, 3, 1, 2)).reshape(N, -1)     # torch.flatten on NCHW
    h = jnp.dot(xf, params["wfc1"], precision=hi) + params["bfc1"][None, :]
    h = jnp.where(h >= 0, h, RELU_SLOPE * h)
    o = jnp.dot(h, params["wfc2"], precision=hi) + params["bfc2"][None, :]
    return jax.nn.sigmoid(o)


if __name__ == "__main__":
    key = jax.random.PRNGKey(0)
    k_param, k_x = jax.random.split(key)
    params = init_params(k_param)
    prep = prepare_params(params)
    x = jax.random.normal(k_x, (2, NUM_INP_CHAN, NUM_HR_BINS, NUM_HR_BINS), jnp.float32)

    y = discriminator_forward(x, prep)
    y = jax.block_until_ready(y)

    assert y.shape == (2, 1), y.shape
    y_ref = _reference_forward(x, params)
    assert bool(jnp.allclose(y, y_ref, atol=5e-3)), (y, y_ref)
    assert bool(jnp.all((y >= 0.0) & (y <= 1.0))), "sigmoid output out of range"
    print("KERNEL_OK")
</pallas_src>

<mosaic_0001>
module attributes {stable_mosaic.version = 11 : i64} {
  func.func @_disc_kernel(%arg0: memref<4x2x9x9x4xf32, #tpu.memory_space<vmem>>, %arg1: memref<3x3x4x8xf32, #tpu.memory_space<vmem>>, %arg2: memref<1x8xf32, #tpu.memory_space<vmem>>, %arg3: memref<72x16xf32, #tpu.memory_space<vmem>>, %arg4: memref<1x16xf32, #tpu.memory_space<vmem>>, %arg5: memref<16x16x32xf32, #tpu.memory_space<vmem>>, %arg6: memref<1x32xf32, #tpu.memory_space<vmem>>, %arg7: memref<32x1xf32, #tpu.memory_space<vmem>>, %arg8: memref<1x1xf32, #tpu.memory_space<vmem>>, %arg9: memref<2x1xf32, #tpu.memory_space<vmem>>, %arg10: memref<2x8x8x8xf32, #tpu.memory_space<vmem>>, %arg11: memref<2x2x10x5x8xf32, #tpu.memory_space<vmem>>, %arg12: memref<2x4x8x72xf32, #tpu.memory_space<vmem>>, %arg13: memref<2x32x16xf32, #tpu.memory_space<vmem>>) attributes {dimension_semantics = [], scalar_prefetch = 0 : i64, scratch_operands = 4 : i64, tpu.core_type = #tpu.core_type<tc>} {
    %cst = arith.constant 0.000000e+00 : f32
    %0 = vector.broadcast %cst : f32 to vector<128x8xf32>
    %c0 = arith.constant 0 : index
    %c0_0 = arith.constant 0 : index
    %c0_1 = arith.constant 0 : index
    %c0_2 = arith.constant 0 : index
    %c0_3 = arith.constant 0 : index
    %1 = vector.load %arg0[%c0, %c0_0, %c0_1, %c0_2, %c0_3] : memref<4x2x9x9x4xf32, #tpu.memory_space<vmem>>, vector<1x2x8x8x4xf32>
    %2 = vector.shape_cast %1 : vector<1x2x8x8x4xf32> to vector<2x8x8x4xf32>
    %3 = vector.shape_cast %2 : vector<2x8x8x4xf32> to vector<128x4xf32>
    %c0_4 = arith.constant 0 : index
    %c0_5 = arith.constant 0 : index
    %c0_6 = arith.constant 0 : index
    %c0_7 = arith.constant 0 : index
    %4 = vector.load %arg1[%c0_4, %c0_5, %c0_6, %c0_7] : memref<3x3x4x8xf32, #tpu.memory_space<vmem>>, vector<1x1x4x8xf32>
    %5 = vector.shape_cast %4 : vector<1x1x4x8xf32> to vector<4x8xf32>
    %cst_8 = arith.constant dense<0.000000e+00> : vector<128x8xf32>
    %6 = tpu.matmul %3, %5, %cst_8 {dimension_numbers = #tpu.dot_dimension_numbers<[1], [0], [0], [1], [0, 0, 1, 1], [], []>} : vector<128x4xf32>, vector<4x8xf32>, vector<128x8xf32> -> vector<128x8xf32>
    %7 = arith.addf %0, %6 : vector<128x8xf32>
    %c1 = arith.constant 1 : index
    %c0_9 = arith.constant 0 : index
    %c0_10 = arith.constant 0 : index
    %c0_11 = arith.constant 0 : index
    %c0_12 = arith.constant 0 : index
    %8 = vector.load %arg0[%c1, %c0_9, %c0_10, %c0_11, %c0_12] : memref<4x2x9x9x4xf32, #tpu.memory_space<vmem>>, vector<1x2x8x8x4xf32>
    %9 = vector.shape_cast %8 : vector<1x2x8x8x4xf32> to vector<2x8x8x4xf32>
    %10 = vector.shape_cast %9 : vector<2x8x8x4xf32> to vector<128x4xf32>
    %c0_13 = arith.constant 0 : index
    %c1_14 = arith.constant 1 : index
    %c0_15 = arith.constant 0 : index
    %c0_16 = arith.constant 0 : index
    %11 = vector.load %arg1[%c0_13, %c1_14, %c0_15, %c0_16] : memref<3x3x4x8xf32, #tpu.memory_space<vmem>>, vector<1x1x4x8xf32>
    %12 = vector.shape_cast %11 : vector<1x1x4x8xf32> to vector<4x8xf32>
    %cst_17 = arith.constant dense<0.000000e+00> : vector<128x8xf32>
    %13 = tpu.matmul %10, %12, %cst_17 {dimension_numbers = #tpu.dot_dimension_numbers<[1], [0], [0], [1], [0, 0, 1, 1], [], []>} : vector<128x4xf32>, vector<4x8xf32>, vector<128x8xf32> -> vector<128x8xf32>
    %14 = arith.addf %7, %13 : vector<128x8xf32>
    %c0_18 = arith.constant 0 : index
    %c0_19 = arith.constant 0 : index
    %c0_20 = arith.constant 0 : index
    %c1_21 = arith.constant 1 : index
    %c0_22 = arith.constant 0 : index
    %15 = vector.load %arg0[%c0_18, %c0_19, %c0_20, %c1_21, %c0_22] : memref<4x2x9x9x4xf32, #tpu.memory_space<vmem>>, vector<1x2x8x8x4xf32>
    %16 = vector.shape_cast %15 : vector<1x2x8x8x4xf32> to vector<2x8x8x4xf32>
    %17 = vector.shape_cast %16 : vector<2x8x8x4xf32> to vector<128x4xf32>
    %c0_23 = arith.constant 0 : index
    %c2 = arith.constant 2 : index
    %c0_24 = arith.constant 0 : index
    %c0_25 = arith.constant 0 : index
    %18 = vector.load %arg1[%c0_23, %c2, %c0_24, %c0_25] : memref<3x3x4x8xf32, #tpu.memory_space<vmem>>, vector<1x1x4x8xf32>
    %19 = vector.shape_cast %18 : vector<1x1x4x8xf32> to vector<4x8xf32>
    %cst_26 = arith.constant dense<0.000000e+00> : vector<128x8xf32>
    %20 = tpu.matmul %17, %19, %cst_26 {dimension_numbers = #tpu.dot_dimension_numbers<[1], [0], [0], [1], [0, 0, 1, 1], [], []>} : vector<128x4xf32>, vector<4x8xf32>, vector<128x8xf32> -> vector<128x8xf32>
    %21 = arith.addf %14, %20 : vector<128x8xf32>
    %c2_27 = arith.constant 2 : index
    %c0_28 = arith.constant 0 : index
    %c0_29 = arith.constant 0 : index
    %c0_30 = arith.constant 0 : index
    %c0_31 = arith.constant 0 : index
    %22 = vector.load %arg0[%c2_27, %c0_28, %c0_29, %c0_30, %c0_31] : memref<4x2x9x9x4xf32, #tpu.memory_space<vmem>>, vector<1x2x8x8x4xf32>
    %23 = vector.shape_cast %22 : vector<1x2x8x8x4xf32> to vector<2x8x8x4xf32>
    %24 = vector.shape_cast %23 : vector<2x8x8x4xf32> to vector<128x4xf32>
    %c1_32 = arith.constant 1 : index
    %c0_33 = arith.constant 0 : index
    %c0_34 = arith.constant 0 : index
    %c0_35 = arith.constant 0 : index
    %25 = vector.load %arg1[%c1_32, %c0_33, %c0_34, %c0_35] : memref<3x3x4x8xf32, #tpu.memory_space<vmem>>, vector<1x1x4x8xf32>
    %26 = vector.shape_cast %25 : vector<1x1x4x8xf32> to vector<4x8xf32>
    %cst_36 = arith.constant dense<0.000000e+00> : vector<128x8xf32>
    %27 = tpu.matmul %24, %26, %cst_36 {dimension_numbers = #tpu.dot_dimension_numbers<[1], [0], [0], [1], [0, 0, 1, 1], [], []>} : vector<128x4xf32>, vector<4x8xf32>, vector<128x8xf32> -> vector<128x8xf32>
    %28 = arith.addf %21, %27 : vector<128x8xf32>
    %c3 = arith.constant 3 : index
    %c0_37 = arith.constant 0 : index
    %c0_38 = arith.constant 0 : index
    %c0_39 = arith.constant 0 : index
    %c0_40 = arith.constant 0 : index
    %29 = vector.load %arg0[%c3, %c0_37, %c0_38, %c0_39, %c0_40] : memref<4x2x9x9x4xf32, #tpu.memory_space<vmem>>, vector<1x2x8x8x4xf32>
    %30 = vector.shape_cast %29 : vector<1x2x8x8x4xf32> to vector<2x8x8x4xf32>
    %31 = vector.shape_cast %30 : vector<2x8x8x4xf32> to vector<128x4xf32>
    %c1_41 = arith.constant 1 : index
    %c1_42 = arith.constant 1 : index
    %c0_43 = arith.constant 0 : index
    %c0_44 = arith.constant 0 : index
    %32 = vector.load %arg1[%c1_41, %c1_42, %c0_43, %c0_44] : memref<3x3x4x8xf32, #tpu.memory_space<vmem>>, vector<1x1x4x8xf32>
    %33 = vector.shape_cast %32 : vector<1x1x4x8xf32> to vector<4x8xf32>
    %cst_45 = arith.constant dense<0.000000e+00> : vector<128x8xf32>
    %34 = tpu.matmul %31, %33, %cst_45 {dimension_numbers = #tpu.dot_dimension_numbers<[1], [0], [0], [1], [0, 0, 1, 1], [], []>} : vector<128x4xf32>, vector<4x8xf32>, vector<128x8xf32> -> vector<128x8xf32>
    %35 = arith.addf %28, %34 : vector<128x8xf32>
    %c2_46 = arith.constant 2 : index
    %c0_47 = arith.constant 0 : index
    %c0_48 = arith.constant 0 : index
    %c1_49 = arith.constant 1 : index
    %c0_50 = arith.constant 0 : index
    %36 = vector.load %arg0[%c2_46, %c0_47, %c0_48, %c1_49, %c0_50] : memref<4x2x9x9x4xf32, #tpu.memory_space<vmem>>, vector<1x2x8x8x4xf32>
    %37 = vector.shape_cast %36 : vector<1x2x8x8x4xf32> to vector<2x8x8x4xf32>
    %38 = vector.shape_cast %37 : vector<2x8x8x4xf32> to vector<128x4xf32>
    %c1_51 = arith.constant 1 : index
    %c2_52 = arith.constant 2 : index
    %c0_53 = arith.constant 0 : index
    %c0_54 = arith.constant 0 : index
    %39 = vector.load %arg1[%c1_51, %c2_52, %c0_53, %c0_54] : memref<3x3x4x8xf32, #tpu.memory_space<vmem>>, vector<1x1x4x8xf32>
    %40 = vector.shape_cast %39 : vector<1x1x4x8xf32> to vector<4x8xf32>
    %cst_55 = arith.constant dense<0.000000e+00> : vector<128x8xf32>
    %41 = tpu.matmul %38, %40, %cst_55 {dimension_numbers = #tpu.dot_dimension_numbers<[1], [0], [0], [1], [0, 0, 1, 1], [], []>} : vector<128x4xf32>, vector<4x8xf32>, vector<128x8xf32> -> vector<128x8xf32>
    %42 = arith.addf %35, %41 : vector<128x8xf32>
    %c0_56 = arith.constant 0 : index
    %c0_57 = arith.constant 0 : index
    %c1_58 = arith.constant 1 : index
    %c0_59 = arith.constant 0 : index
    %c0_60 = arith.constant 0 : index
    %43 = vector.load %arg0[%c0_56, %c0_57, %c1_58, %c0_59, %c0_60] : memref<4x2x9x9x4xf32, #tpu.memory_space<vmem>>, vector<1x2x8x8x4xf32>
    %44 = vector.shape_cast %43 : vector<1x2x8x8x4xf32> to vector<2x8x8x4xf32>
    %45 = vector.shape_cast %44 : vector<2x8x8x4xf32> to vector<128x4xf32>
    %c2_61 = arith.constant 2 : index
    %c0_62 = arith.constant 0 : index
    %c0_63 = arith.constant 0 : index
    %c0_64 = arith.constant 0 : index
    %46 = vector.load %arg1[%c2_61, %c0_62, %c0_63, %c0_64] : memref<3x3x4x8xf32, #tpu.memory_space<vmem>>, vector<1x1x4x8xf32>
    %47 = vector.shape_cast %46 : vector<1x1x4x8xf32> to vector<4x8xf32>
    %cst_65 = arith.constant dense<0.000000e+00> : vector<128x8xf32>
    %48 = tpu.matmul %45, %47, %cst_65 {dimension_numbers = #tpu.dot_dimension_numbers<[1], [0], [0], [1], [0, 0, 1, 1], [], []>} : vector<128x4xf32>, vector<4x8xf32>, vector<128x8xf32> -> vector<128x8xf32>
    %49 = arith.addf %42, %48 : vector<128x8xf32>
    %c1_66 = arith.constant 1 : index
    %c0_67 = arith.constant 0 : index
    %c1_68 = arith.constant 1 : index
    %c0_69 = arith.constant 0 : index
    %c0_70 = arith.constant 0 : index
    %50 = vector.load %arg0[%c1_66, %c0_67, %c1_68, %c0_69, %c0_70] : memref<4x2x9x9x4xf32, #tpu.memory_space<vmem>>, vector<1x2x8x8x4xf32>
    %51 = vector.shape_cast %50 : vector<1x2x8x8x4xf32> to vector<2x8x8x4xf32>
    %52 = vector.shape_cast %51 : vector<2x8x8x4xf32> to vector<128x4xf32>
    %c2_71 = arith.constant 2 : index
    %c1_72 = arith.constant 1 : index
    %c0_73 = arith.constant 0 : index
    %c0_74 = arith.constant 0 : index
    %53 = vector.load %arg1[%c2_71, %c1_72, %c0_73, %c0_74] : memref<3x3x4x8xf32, #tpu.memory_space<vmem>>, vector<1x1x4x8xf32>
    %54 = vector.shape_cast %53 : vector<1x1x4x8xf32> to vector<4x8xf32>
    %cst_75 = arith.constant dense<0.000000e+00> : vector<128x8xf32>
    %55 = tpu.matmul %52, %54, %cst_75 {dimension_numbers = #tpu.dot_dimension_numbers<[1], [0], [0], [1], [0, 0, 1, 1], [], []>} : vector<128x4xf32>, vector<4x8xf32>, vector<128x8xf32> -> vector<128x8xf32>
    %56 = arith.addf %49, %55 : vector<128x8xf32>
    %c0_76 = arith.constant 0 : index
    %c0_77 = arith.constant 0 : index
    %c1_78 = arith.constant 1 : index
    %c1_79 = arith.constant 1 : index
    %c0_80 = arith.constant 0 : index
    %57 = vector.load %arg0[%c0_76, %c0_77, %c1_78, %c1_79, %c0_80] : memref<4x2x9x9x4xf32, #tpu.memory_space<vmem>>, vector<1x2x8x8x4xf32>
    %58 = vector.shape_cast %57 : vector<1x2x8x8x4xf32> to vector<2x8x8x4xf32>
    %59 = vector.shape_cast %58 : vector<2x8x8x4xf32> to vector<128x4xf32>
    %c2_81 = arith.constant 2 : index
    %c2_82 = arith.constant 2 : index
    %c0_83 = arith.constant 0 : index
    %c0_84 = arith.constant 0 : index
    %60 = vector.load %arg1[%c2_81, %c2_82, %c0_83, %c0_84] : memref<3x3x4x8xf32, #tpu.memory_space<vmem>>, vector<1x1x4x8xf32>
    %61 = vector.shape_cast %60 : vector<1x1x4x8xf32> to vector<4x8xf32>
    %cst_85 = arith.constant dense<0.000000e+00> : vector<128x8xf32>
    %62 = tpu.matmul %59, %61, %cst_85 {dimension_numbers = #tpu.dot_dimension_numbers<[1], [0], [0], [1], [0, 0, 1, 1], [], []>} : vector<128x4xf32>, vector<4x8xf32>, vector<128x8xf32> -> vector<128x8xf32>
    %63 = arith.addf %56, %62 : vector<128x8xf32>
    %c0_86 = arith.constant 0 : index
    %c0_87 = arith.constant 0 : index
    %64 = vector.load %arg2[%c0_86, %c0_87] : memref<1x8xf32, #tpu.memory_space<vmem>>, vector<1x8xf32>
    %65 = vector.broadcast %64 : vector<1x8xf32> to vector<128x8xf32>
    %66 = arith.addf %63, %65 : vector<128x8xf32>
    %cst_88 = arith.constant 0.000000e+00 : f32
    %67 = vector.broadcast %cst_88 : f32 to vector<128x8xf32>
    %68 = arith.cmpf oge, %66, %67 : vector<128x8xf32>
    %cst_89 = arith.constant 2.000000e-01 : f32
    %69 = vector.broadcast %cst_89 : f32 to vector<128x8xf32>
    %70 = arith.mulf %69, %66 : vector<128x8xf32>
    %71 = arith.select %68, %66, %70 : vector<128x8xi1>, vector<128x8xf32>
    %72 = vector.shape_cast %71 : vector<128x8xf32> to vector<2x8x8x8xf32>
    %c0_90 = arith.constant 0 : index
    %c0_91 = arith.constant 0 : index
    %c0_92 = arith.constant 0 : index
    %c0_93 = arith.constant 0 : index
    %73 = vector.load %arg10[%c0_90, %c0_91, %c0_92, %c0_93] : memref<2x8x8x8xf32, #tpu.memory_space<vmem>>, vector<2x8x8x8xf32>
    tpu.vector_store %arg10[%c0_90, %c0_91, %c0_92, %c0_93], %72 {strides = array<i32>} : memref<2x8x8x8xf32, #tpu.memory_space<vmem>>, vector<2x8x8x8xf32>,
    %cst_94 = arith.constant 0.000000e+00 : f32
    %74 = vector.broadcast %cst_94 : f32 to vector<2x2x10x5x8xf32>
    %c0_95 = arith.constant 0 : index
    %c0_96 = arith.constant 0 : index
    %c0_97 = arith.constant 0 : index
    %c0_98 = arith.constant 0 : index
    %c0_99 = arith.constant 0 : index
    %75 = vector.load %arg11[%c0_95, %c0_96, %c0_97, %c0_98, %c0_99] : memref<2x2x10x5x8xf32, #tpu.memory_space<vmem>>, vector<2x2x10x5x8xf32>
    tpu.vector_store %arg11[%c0_95, %c0_96, %c0_97, %c0_98, %c0_99], %74 {strides = array<i32>} : memref<2x2x10x5x8xf32, #tpu.memory_space<vmem>>, vector<2x2x10x5x8xf32>,
    %c0_100 = arith.constant 0 : index
    %c0_101 = arith.constant 0 : index
    %c1_102 = arith.constant 1 : index
    %c0_103 = arith.constant 0 : index
    %76 = vector.load %arg10[%c0_100, %c0_101, %c1_102, %c0_103] : memref<2x8x8x8xf32, #tpu.memory_space<vmem>>, vector<2x8x1x8xf32>
    %77 = vector.shape_cast %76 : vector<2x8x1x8xf32> to vector<2x8x8xf32>
    %c0_104 = arith.constant 0 : index
    %c0_105 = arith.constant 0 : index
    %c1_106 = arith.constant 1 : index
    %c1_107 = arith.constant 1 : index
    %c0_108 = arith.constant 0 : index
    %78 = vector.load %arg11[%c0_104, %c0_105, %c1_106, %c1_107, %c0_108] : memref<2x2x10x5x8xf32, #tpu.memory_space<vmem>>, vector<1x2x8x1x8xf32>
    %79 = vector.shape_cast %78 : vector<1x2x8x1x8xf32> to vector<2x8x8xf32>
    %80 = vector.shape_cast %77 : vector<2x8x8xf32> to vector<1x2x8x1x8xf32>
    tpu.vector_store %arg11[%c0_104, %c0_105, %c1_106, %c1_107, %c0_108], %80 {strides = array<i32>} : memref<2x2x10x5x8xf32, #tpu.memory_space<vmem>>, vector<1x2x8x1x8xf32>,
    %c0_109 = arith.constant 0 : index
    %c0_110 = arith.constant 0 : index
    %c3_111 = arith.constant 3 : index
    %c0_112 = arith.constant 0 : index
    %81 = vector.load %arg10[%c0_109, %c0_110, %c3_111, %c0_112] : memref<2x8x8x8xf32, #tpu.memory_space<vmem>>, vector<2x8x1x8xf32>
    %82 = vector.shape_cast %81 : vector<2x8x1x8xf32> to vector<2x8x8xf32>
    %c0_113 = arith.constant 0 : index
    %c0_114 = arith.constant 0 : index
    %c1_115 = arith.constant 1 : index
    %c2_116 = arith.constant 2 : index
    %c0_117 = arith.constant 0 : index
    %83 = vector.load %arg11[%c0_113, %c0_114, %c1_115, %c2_116, %c0_117] : memref<2x2x10x5x8xf32, #tpu.memory_space<vmem>>, vector<1x2x8x1x8xf32>
    %84 = vector.shape_cast %83 : vector<1x2x8x1x8xf32> to vector<2x8x8xf32>
    %85 = vector.shape_cast %82 : vector<2x8x8xf32> to vector<1x2x8x1x8xf32>
    tpu.vector_store %arg11[%c0_113, %c0_114, %c1_115, %c2_116, %c0_117], %85 {strides = array<i32>} : memref<2x2x10x5x8xf32, #tpu.memory_space<vmem>>, vector<1x2x8x1x8xf32>,
    %c0_118 = arith.constant 0 : index
    %c0_119 = arith.constant 0 : index
    %c5 = arith.constant 5 : index
    %c0_120 = arith.constant 0 : index
    %86 = vector.load %arg10[%c0_118, %c0_119, %c5, %c0_120] : memref<2x8x8x8xf32, #tpu.memory_space<vmem>>, vector<2x8x1x8xf32>
    %87 = vector.shape_cast %86 : vector<2x8x1x8xf32> to vector<2x8x8xf32>
    %c0_121 = arith.constant 0 : index
    %c0_122 = arith.constant 0 : index
    %c1_123 = arith.constant 1 : index
    %c3_124 = arith.constant 3 : index
    %c0_125 = arith.constant 0 : index
    %88 = vector.load %arg11[%c0_121, %c0_122, %c1_123, %c3_124, %c0_125] : memref<2x2x10x5x8xf32, #tpu.memory_space<vmem>>, vector<1x2x8x1x8xf32>
    %89 = vector.shape_cast %88 : vector<1x2x8x1x8xf32> to vector<2x8x8xf32>
    %90 = vector.shape_cast %87 : vector<2x8x8xf32> to vector<1x2x8x1x8xf32>
    tpu.vector_store %arg11[%c0_121, %c0_122, %c1_123, %c3_124, %c0_125], %90 {strides = array<i32>} : memref<2x2x10x5x8xf32, #tpu.memory_space<vmem>>, vector<1x2x8x1x8xf32>,
    %c0_126 = arith.constant 0 : index
    %c0_127 = arith.constant 0 : index
    %c7 = arith.constant 7 : index
    %c0_128 = arith.constant 0 : index
    %91 = vector.load %arg10[%c0_126, %c0_127, %c7, %c0_128] : memref<2x8x8x8xf32, #tpu.memory_space<vmem>>, vector<2x8x1x8xf32>
    %92 = vector.shape_cast %91 : vector<2x8x1x8xf32> to vector<2x8x8xf32>
    %c0_129 = arith.constant 0 : index
    %c0_130 = arith.constant 0 : index
    %c1_131 = arith.constant 1 : index
    %c4 = arith.constant 4 : index
    %c0_132 = arith.constant 0 : index
    %93 = vector.load %arg11[%c0_129, %c0_130, %c1_131, %c4, %c0_132] : memref<2x2x10x5x8xf32, #tpu.memory_space<vmem>>, vector<1x2x8x1x8xf32>
    %94 = vector.shape_cast %93 : vector<1x2x8x1x8xf32> to vector<2x8x8xf32>
    %95 = vector.shape_cast %92 : vector<2x8x8xf32> to vector<1x2x8x1x8xf32>
    tpu.vector_store %arg11[%c0_129, %c0_130, %c1_131, %c4, %c0_132], %95 {strides = array<i32>} : memref<2x2x10x5x8xf32, #tpu.memory_space<vmem>>, vector<1x2x8x1x8xf32>,
    %c0_133 = arith.constant 0 : index
    %c0_134 = arith.constant 0 : index
    %c0_135 = arith.constant 0 : index
    %c0_136 = arith.constant 0 : index
    %96 = vector.load %arg10[%c0_133, %c0_134, %c0_135, %c0_136] : memref<2x8x8x8xf32, #tpu.memory_space<vmem>>, vector<2x8x1x8xf32>
    %97 = vector.shape_cast %96 : vector<2x8x1x8xf32> to vector<2x8x8xf32>
    %c1_137 = arith.constant 1 : index
    %c0_138 = arith.constant 0 : index
    %c1_139 = arith.constant 1 : index
    %c0_140 = arith.constant 0 : index
    %c0_141 = arith.constant 0 : index
    %98 = vector.load %arg11[%c1_137, %c0_138, %c1_139, %c0_140, %c0_141] : memref<2x2x10x5x8xf32, #tpu.memory_space<vmem>>, vector<1x2x8x1x8xf32>
    %99 = vector.shape_cast %98 : vector<1x2x8x1x8xf32> to vector<2x8x8xf32>
    %100 = vector.shape_cast %97 : vector<2x8x8xf32> to vector<1x2x8x1x8xf32>
    tpu.vector_store %arg11[%c1_137, %c0_138, %c1_139, %c0_140, %c0_141], %100 {strides = array<i32>} : memref<2x2x10x5x8xf32, #tpu.memory_space<vmem>>, vector<1x2x8x1x8xf32>,
    %c0_142 = arith.constant 0 : index
    %c0_143 = arith.constant 0 : index
    %c2_144 = arith.constant 2 : index
    %c0_145 = arith.constant 0 : index
    %101 = vector.load %arg10[%c0_142, %c0_143, %c2_144, %c0_145] : memref<2x8x8x8xf32, #tpu.memory_space<vmem>>, vector<2x8x1x8xf32>
    %102 = vector.shape_cast %101 : vector<2x8x1x8xf32> to vector<2x8x8xf32>
    %c1_146 = arith.constant 1 : index
    %c0_147 = arith.constant 0 : index
    %c1_148 = arith.constant 1 : index
    %c1_149 = arith.constant 1 : index
    %c0_150 = arith.constant 0 : index
    %103 = vector.load %arg11[%c1_146, %c0_147, %c1_148, %c1_149, %c0_150] : memref<2x2x10x5x8xf32, #tpu.memory_space<vmem>>, vector<1x2x8x1x8xf32>
    %104 = vector.shape_cast %103 : vector<1x2x8x1x8xf32> to vector<2x8x8xf32>
    %105 = vector.shape_cast %102 : vector<2x8x8xf32> to vector<1x2x8x1x8xf32>
    tpu.vector_store %arg11[%c1_146, %c0_147, %c1_148, %c1_149, %c0_150], %105 {strides = array<i32>} : memref<2x2x10x5x8xf32, #tpu.memory_space<vmem>>, vector<1x2x8x1x8xf32>,
    %c0_151 = arith.constant 0 : index
    %c0_152 = arith.constant 0 : index
    %c4_153 = arith.constant 4 : index
    %c0_154 = arith.constant 0 : index
    %106 = vector.load %arg10[%c0_151, %c0_152, %c4_153, %c0_154] : memref<2x8x8x8xf32, #tpu.memory_space<vmem>>, vector<2x8x1x8xf32>
    %107 = vector.shape_cast %106 : vector<2x8x1x8xf32> to vector<2x8x8xf32>
    %c1_155 = arith.constant 1 : index
    %c0_156 = arith.constant 0 : index
    %c1_157 = arith.constant 1 : index
    %c2_158 = arith.constant 2 : index
    %c0_159 = arith.constant 0 : index
    %108 = vector.load %arg11[%c1_155, %c0_156, %c1_157, %c2_158, %c0_159] : memref<2x2x10x5x8xf32, #tpu.memory_space<vmem>>, vector<1x2x8x1x8xf32>
    %109 = vector.shape_cast %108 : vector<1x2x8x1x8xf32> to vector<2x8x8xf32>
    %110 = vector.shape_cast %107 : vector<2x8x8xf32> to vector<1x2x8x1x8xf32>
    tpu.vector_store %arg11[%c1_155, %c0_156, %c1_157, %c2_158, %c0_159], %110 {strides = array<i32>} : memref<2x2x10x5x8xf32, #tpu.memory_space<vmem>>, vector<1x2x8x1x8xf32>,
    %c0_160 = arith.constant 0 : index
    %c0_161 = arith.constant 0 : index
    %c6 = arith.constant 6 : index
    %c0_162 = arith.constant 0 : index
    %111 = vector.load %arg10[%c0_160, %c0_161, %c6, %c0_162] : memref<2x8x8x8xf32, #tpu.memory_space<vmem>>, vector<2x8x1x8xf32>
    %112 = vector.shape_cast %111 : vector<2x8x1x8xf32> to vector<2x8x8xf32>
    %c1_163 = arith.constant 1 : index
    %c0_164 = arith.constant 0 : index
    %c1_165 = arith.constant 1 : index
    %c3_166 = arith.constant 3 : index
    %c0_167 = arith.constant 0 : index
    %113 = vector.load %arg11[%c1_163, %c0_164, %c1_165, %c3_166, %c0_167] : memref<2x2x10x5x8xf32, #tpu.memory_space<vmem>>, vector<1x2x8x1x8xf32>
    %114 = vector.shape_cast %113 : vector<1x2x8x1x8xf32> to vector<2x8x8xf32>
    %115 = vector.shape_cast %112 : vector<2x8x8xf32> to vector<1x2x8x1x8xf32>
    tpu.vector_store %arg11[%c1_163, %c0_164, %c1_165, %c3_166, %c0_167], %115 {strides = array<i32>} : memref<2x2x10x5x8xf32, #tpu.memory_space<vmem>>, vector<1x2x8x1x8xf32>,
    %cst_168 = arith.constant 0.000000e+00 : f32
    %116 = vector.broadcast %cst_168 : f32 to vector<2x4x8x72xf32>
    %c0_169 = arith.constant 0 : index
    %c0_170 = arith.constant 0 : index
    %c0_171 = arith.constant 0 : index
    %c0_172 = arith.constant 0 : index
    %117 = vector.load %arg12[%c0_169, %c0_170, %c0_171, %c0_172] : memref<2x4x8x72xf32, #tpu.memory_space<vmem>>, vector<2x4x8x72xf32>
    tpu.vector_store %arg12[%c0_169, %c0_170, %c0_171, %c0_172], %116 {strides = array<i32>} : memref<2x4x8x72xf32, #tpu.memory_space<vmem>>, vector<2x4x8x72xf32>,
    %c0_173 = arith.constant 0 : index
    %c0_174 = arith.constant 0 : index
    %c0_175 = arith.constant 0 : index
    %c0_176 = arith.constant 0 : index
    %c0_177 = arith.constant 0 : index
    %118 = vector.load %arg11[%c0_173, %c0_174, %c0_175, %c0_176, %c0_177] : memref<2x2x10x5x8xf32, #tpu.memory_space<vmem>>, vector<1x2x1x4x8xf32>
    %119 = vector.shape_cast %118 : vector<1x2x1x4x8xf32> to vector<2x4x8xf32>
    %c0_178 = arith.constant 0 : index
    %c0_179 = arith.constant 0 : index
    %c0_180 = arith.constant 0 : index
    %c0_181 = arith.constant 0 : index
    %120 = vector.load %arg12[%c0_178, %c0_179, %c0_180, %c0_181] : memref<2x4x8x72xf32, #tpu.memory_space<vmem>>, vector<2x1x4x8xf32>
    %121 = vector.shape_cast %120 : vector<2x1x4x8xf32> to vector<2x4x8xf32>
    %122 = vector.shape_cast %119 : vector<2x4x8xf32> to vector<2x1x4x8xf32>
    tpu.vector_store %arg12[%c0_178, %c0_179, %c0_180, %c0_181], %122 {strides = array<i32>} : memref<2x4x8x72xf32, #tpu.memory_space<vmem>>, vector<2x1x4x8xf32>,
    %c0_182 = arith.constant 0 : index
    %c0_183 = arith.constant 0 : index
    %c2_184 = arith.constant 2 : index
    %c0_185 = arith.constant 0 : index
    %c0_186 = arith.constant 0 : index
    %123 = vector.load %arg11[%c0_182, %c0_183, %c2_184, %c0_185, %c0_186] : memref<2x2x10x5x8xf32, #tpu.memory_space<vmem>>, vector<1x2x1x4x8xf32>
    %124 = vector.shape_cast %123 : vector<1x2x1x4x8xf32> to vector<2x4x8xf32>
    %c0_187 = arith.constant 0 : index
    %c1_188 = arith.constant 1 : index
    %c0_189 = arith.constant 0 : index
    %c0_190 = arith.constant 0 : index
    %125 = vector.load %arg12[%c0_187, %c1_188, %c0_189, %c0_190] : memref<2x4x8x72xf32, #tpu.memory_space<vmem>>, vector<2x1x4x8xf32>
    %126 = vector.shape_cast %125 : vector<2x1x4x8xf32> to vector<2x4x8xf32>
    %127 = vector.shape_cast %124 : vector<2x4x8xf32> to vector<2x1x4x8xf32>
    tpu.vector_store %arg12[%c0_187, %c1_188, %c0_189, %c0_190], %127 {strides = array<i32>} : memref<2x4x8x72xf32, #tpu.memory_space<vmem>>, vector<2x1x4x8xf32>,
    %c0_191 = arith.constant 0 : index
    %c0_192 = arith.constant 0 : index
    %c4_193 = arith.constant 4 : index
    %c0_194 = arith.constant 0 : index
    %c0_195 = arith.constant 0 : index
    %128 = vector.load %arg11[%c0_191, %c0_192, %c4_193, %c0_194, %c0_195] : memref<2x2x10x5x8xf32, #tpu.memory_space<vmem>>, vector<1x2x1x4x8xf32>
    %129 = vector.shape_cast %128 : vector<1x2x1x4x8xf32> to vector<2x4x8xf32>
    %c0_196 = arith.constant 0 : index
    %c2_197 = arith.constant 2 : index
    %c0_198 = arith.constant 0 : index
    %c0_199 = arith.constant 0 : index
    %130 = vector.load %arg12[%c0_196, %c2_197, %c0_198, %c0_199] : memref<2x4x8x72xf32, #tpu.memory_space<vmem>>, vector<2x1x4x8xf32>
    %131 = vector.shape_cast %130 : vector<2x1x4x8xf32> to vector<2x4x8xf32>
    %132 = vector.shape_cast %129 : vector<2x4x8xf32> to vector<2x1x4x8xf32>
    tpu.vector_store %arg12[%c0_196, %c2_197, %c0_198, %c0_199], %132 {strides = array<i32>} : memref<2x4x8x72xf32, #tpu.memory_space<vmem>>, vector<2x1x4x8xf32>,
    %c0_200 = arith.constant 0 : index
    %c0_201 = arith.constant 0 : index
    %c6_202 = arith.constant 6 : index
    %c0_203 = arith.constant 0 : index
    %c0_204 = arith.constant 0 : index
    %133 = vector.load %arg11[%c0_200, %c0_201, %c6_202, %c0_203, %c0_204] : memref<2x2x10x5x8xf32, #tpu.memory_space<vmem>>, vector<1x2x1x4x8xf32>
    %134 = vector.shape_cast %133 : vector<1x2x1x4x8xf32> to vector<2x4x8xf32>
    %c0_205 = arith.constant 0 : index
    %c3_206 = arith.constant 3 : index
    %c0_207 = arith.constant 0 : index
    %c0_208 = arith.constant 0 : index
    %135 = vector.load %arg12[%c0_205, %c3_206, %c0_207, %c0_208] : memref<2x4x8x72xf32, #tpu.memory_space<vmem>>, vector<2x1x4x8xf32>
    %136 = vector.shape_cast %135 : vector<2x1x4x8xf32> to vector<2x4x8xf32>
    %137 = vector.shape_cast %134 : vector<2x4x8xf32> to vector<2x1x4x8xf32>
    tpu.vector_store %arg12[%c0_205, %c3_206, %c0_207, %c0_208], %137 {strides = array<i32>} : memref<2x4x8x72xf32, #tpu.memory_space<vmem>>, vector<2x1x4x8xf32>,
    %c1_209 = arith.constant 1 : index
    %c0_210 = arith.constant 0 : index
    %c0_211 = arith.constant 0 : index
    %c0_212 = arith.constant 0 : index
    %c0_213 = arith.constant 0 : index
    %138 = vector.load %arg11[%c1_209, %c0_210, %c0_211, %c0_212, %c0_213] : memref<2x2x10x5x8xf32, #tpu.memory_space<vmem>>, vector<1x2x1x4x8xf32>
    %139 = vector.shape_cast %138 : vector<1x2x1x4x8xf32> to vector<2x4x8xf32>
    %c0_214 = arith.constant 0 : index
    %c0_215 = arith.constant 0 : index
    %c0_216 = arith.constant 0 : index
    %c8 = arith.constant 8 : index
    %140 = vector.load %arg12[%c0_214, %c0_215, %c0_216, %c8] : memref<2x4x8x72xf32, #tpu.memory_space<vmem>>, vector<2x1x4x8xf32>
    %141 = vector.shape_cast %140 : vector<2x1x4x8xf32> to vector<2x4x8xf32>
    %142 = vector.shape_cast %139 : vector<2x4x8xf32> to vector<2x1x4x8xf32>
    tpu.vector_store %arg12[%c0_214, %c0_215, %c0_216, %c8], %142 {strides = array<i32>} : memref<2x4x8x72xf32, #tpu.memory_space<vmem>>, vector<2x1x4x8xf32>,
    %c1_217 = arith.constant 1 : index
    %c0_218 = arith.constant 0 : index
    %c2_219 = arith.constant 2 : index
    %c0_220 = arith.constant 0 : index
    %c0_221 = arith.constant 0 : index
    %143 = vector.load %arg11[%c1_217, %c0_218, %c2_219, %c0_220, %c0_221] : memref<2x2x10x5x8xf32, #tpu.memory_space<vmem>>, vector<1x2x1x4x8xf32>
    %144 = vector.shape_cast %143 : vector<1x2x1x4x8xf32> to vector<2x4x8xf32>
    %c0_222 = arith.constant 0 : index
    %c1_223 = arith.constant 1 : index
    %c0_224 = arith.constant 0 : index
    %c8_225 = arith.constant 8 : index
    %145 = vector.load %arg12[%c0_222, %c1_223, %c0_224, %c8_225] : memref<2x4x8x72xf32, #tpu.memory_space<vmem>>, vector<2x1x4x8xf32>
    %146 = vector.shape_cast %145 : vector<2x1x4x8xf32> to vector<2x4x8xf32>
    %147 = vector.shape_cast %144 : vector<2x4x8xf32> to vector<2x1x4x8xf32>
    tpu.vector_store %arg12[%c0_222, %c1_223, %c0_224, %c8_225], %147 {strides = array<i32>} : memref<2x4x8x72xf32, #tpu.memory_space<vmem>>, vector<2x1x4x8xf32>,
    %c1_226 = arith.constant 1 : index
    %c0_227 = arith.constant 0 : index
    %c4_228 = arith.constant 4 : index
    %c0_229 = arith.constant 0 : index
    %c0_230 = arith.constant 0 : index
    %148 = vector.load %arg11[%c1_226, %c0_227, %c4_228, %c0_229, %c0_230] : memref<2x2x10x5x8xf32, #tpu.memory_space<vmem>>, vector<1x2x1x4x8xf32>
    %149 = vector.shape_cast %148 : vector<1x2x1x4x8xf32> to vector<2x4x8xf32>
    %c0_231 = arith.constant 0 : index
    %c2_232 = arith.constant 2 : index
    %c0_233 = arith.constant 0 : index
    %c8_234 = arith.constant 8 : index
    %150 = vector.load %arg12[%c0_231, %c2_232, %c0_233, %c8_234] : memref<2x4x8x72xf32, #tpu.memory_space<vmem>>, vector<2x1x4x8xf32>
    %151 = vector.shape_cast %150 : vector<2x1x4x8xf32> to vector<2x4x8xf32>
    %152 = vector.shape_cast %149 : vector<2x4x8xf32> to vector<2x1x4x8xf32>
    tpu.vector_store %arg12[%c0_231, %c2_232, %c0_233, %c8_234], %152 {strides = array<i32>} : memref<2x4x8x72xf32, #tpu.memory_space<vmem>>, vector<2x1x4x8xf32>,
    %c1_235 = arith.constant 1 : index
    %c0_236 = arith.constant 0 : index
    %c6_237 = arith.constant 6 : index
    %c0_238 = arith.constant 0 : index
    %c0_239 = arith.constant 0 : index
    %153 = vector.load %arg11[%c1_235, %c0_236, %c6_237, %c0_238, %c0_239] : memref<2x2x10x5x8xf32, #tpu.memory_space<vmem>>, vector<1x2x1x4x8xf32>
    %154 = vector.shape_cast %153 : vector<1x2x1x4x8xf32> to vector<2x4x8xf32>
    %c0_240 = arith.constant 0 : index
    %c3_241 = arith.constant 3 : index
    %c0_242 = arith.constant 0 : index
    %c8_243 = arith.constant 8 : index
    %155 = vector.load %arg12[%c0_240, %c3_241, %c0_242, %c8_243] : memref<2x4x8x72xf32, #tpu.memory_space<vmem>>, vector<2x1x4x8xf32>
    %156 = vector.shape_cast %155 : vector<2x1x4x8xf32> to vector<2x4x8xf32>
    %157 = vector.shape_cast %154 : vector<2x4x8xf32> to vector<2x1x4x8xf32>
    tpu.vector_store %arg12[%c0_240, %c3_241, %c0_242, %c8_243], %157 {strides = array<i32>} : memref<2x4x8x72xf32, #tpu.memory_space<vmem>>, vector<2x1x4x8xf32>,
    %c0_244 = arith.constant 0 : index
    %c0_245 = arith.constant 0 : index
    %c0_246 = arith.constant 0 : index
    %c1_247 = arith.constant 1 : index
    %c0_248 = arith.constant 0 : index
    %158 = vector.load %arg11[%c0_244, %c0_245, %c0_246, %c1_247, %c0_248] : memref<2x2x10x5x8xf32, #tpu.memory_space<vmem>>, vector<1x2x1x4x8xf32>
    %159 = vector.shape_cast %158 : vector<1x2x1x4x8xf32> to vector<2x4x8xf32>
    %c0_249 = arith.constant 0 : index
    %c0_250 = arith.constant 0 : index
    %c0_251 = arith.constant 0 : index
    %c16 = arith.constant 16 : index
    %160 = vector.load %arg12[%c0_249, %c0_250, %c0_251, %c16] : memref<2x4x8x72xf32, #tpu.memory_space<vmem>>, vector<2x1x4x8xf32>
    %161 = vector.shape_cast %160 : vector<2x1x4x8xf32> to vector<2x4x8xf32>
    %162 = vector.shape_cast %159 : vector<2x4x8xf32> to vector<2x1x4x8xf32>
    tpu.vector_store %arg12[%c0_249, %c0_250, %c0_251, %c16], %162 {strides = array<i32>} : memref<2x4x8x72xf32, #tpu.memory_space<vmem>>, vector<2x1x4x8xf32>,
    %c0_252 = arith.constant 0 : index
    %c0_253 = arith.constant 0 : index
    %c2_254 = arith.constant 2 : index
    %c1_255 = arith.constant 1 : index
    %c0_256 = arith.constant 0 : index
    %163 = vector.load %arg11[%c0_252, %c0_253, %c2_254, %c1_255, %c0_256] : memref<2x2x10x5x8xf32, #tpu.memory_space<vmem>>, vector<1x2x1x4x8xf32>
    %164 = vector.shape_cast %163 : vector<1x2x1x4x8xf32> to vector<2x4x8xf32>
    %c0_257 = arith.constant 0 : index
    %c1_258 = arith.constant 1 : index
    %c0_259 = arith.constant 0 : index
    %c16_260 = arith.constant 16 : index
    %165 = vector.load %arg12[%c0_257, %c1_258, %c0_259, %c16_260] : memref<2x4x8x72xf32, #tpu.memory_space<vmem>>, vector<2x1x4x8xf32>
    %166 = vector.shape_cast %165 : vector<2x1x4x8xf32> to vector<2x4x8xf32>
    %167 = vector.shape_cast %164 : vector<2x4x8xf32> to vector<2x1x4x8xf32>
    tpu.vector_store %arg12[%c0_257, %c1_258, %c0_259, %c16_260], %167 {strides = array<i32>} : memref<2x4x8x72xf32, #tpu.memory_space<vmem>>, vector<2x1x4x8xf32>,
    %c0_261 = arith.constant 0 : index
    %c0_262 = arith.constant 0 : index
    %c4_263 = arith.constant 4 : index
    %c1_264 = arith.constant 1 : index
    %c0_265 = arith.constant 0 : index
    %168 = vector.load %arg11[%c0_261, %c0_262, %c4_263, %c1_264, %c0_265] : memref<2x2x10x5x8xf32, #tpu.memory_space<vmem>>, vector<1x2x1x4x8xf32>
    %169 = vector.shape_cast %168 : vector<1x2x1x4x8xf32> to vector<2x4x8xf32>
    %c0_266 = arith.constant 0 : index
    %c2_267 = arith.constant 2 : index
    %c0_268 = arith.constant 0 : index
    %c16_269 = arith.constant 16 : index
    %170 = vector.load %arg12[%c0_266, %c2_267, %c0_268, %c16_269] : memref<2x4x8x72xf32, #tpu.memory_space<vmem>>, vector<2x1x4x8xf32>
    %171 = vector.shape_cast %170 : vector<2x1x4x8xf32> to vector<2x4x8xf32>
    %172 = vector.shape_cast %169 : vector<2x4x8xf32> to vector<2x1x4x8xf32>
    tpu.vector_store %arg12[%c0_266, %c2_267, %c0_268, %c16_269], %172 {strides = array<i32>} : memref<2x4x8x72xf32, #tpu.memory_space<vmem>>, vector<2x1x4x8xf32>,
    %c0_270 = arith.constant 0 : index
    %c0_271 = arith.constant 0 : index
    %c6_272 = arith.constant 6 : index
    %c1_273 = arith.constant 1 : index
    %c0_274 = arith.constant 0 : index
    %173 = vector.load %arg11[%c0_270, %c0_271, %c6_272, %c1_273, %c0_274] : memref<2x2x10x5x8xf32, #tpu.memory_space<vmem>>, vector<1x2x1x4x8xf32>
    %174 = vector.shape_cast %173 : vector<1x2x1x4x8xf32> to vector<2x4x8xf32>
    %c0_275 = arith.constant 0 : index
    %c3_276 = arith.constant 3 : index
    %c0_277 = arith.constant 0 : index
    %c16_278 = arith.constant 16 : index
    %175 = vector.load %arg12[%c0_275, %c3_276, %c0_277, %c16_278] : memref<2x4x8x72xf32, #tpu.memory_space<vmem>>, vector<2x1x4x8xf32>
    %176 = vector.shape_cast %175 : vector<2x1x4x8xf32> to vector<2x4x8xf32>
    %177 = vector.shape_cast %174 : vector<2x4x8xf32> to vector<2x1x4x8xf32>
    tpu.vector_store %arg12[%c0_275, %c3_276, %c0_277, %c16_278], %177 {strides = array<i32>} : memref<2x4x8x72xf32, #tpu.memory_space<vmem>>, vector<2x1x4x8xf32>,
    %c0_279 = arith.constant 0 : index
    %c0_280 = arith.constant 0 : index
    %c1_281 = arith.constant 1 : index
    %c0_282 = arith.constant 0 : index
    %c0_283 = arith.constant 0 : index
    %178 = vector.load %arg11[%c0_279, %c0_280, %c1_281, %c0_282, %c0_283] : memref<2x2x10x5x8xf32, #tpu.memory_space<vmem>>, vector<1x2x1x4x8xf32>
    %179 = vector.shape_cast %178 : vector<1x2x1x4x8xf32> to vector<2x4x8xf32>
    %c0_284 = arith.constant 0 : index
    %c0_285 = arith.constant 0 : index
    %c0_286 = arith.constant 0 : index
    %c24 = arith.constant 24 : index
    %180 = vector.load %arg12[%c0_284, %c0_285, %c0_286, %c24] : memref<2x4x8x72xf32, #tpu.memory_space<vmem>>, vector<2x1x4x8xf32>
    %181 = vector.shape_cast %180 : vector<2x1x4x8xf32> to vector<2x4x8xf32>
    %182 = vector.shape_cast %179 : vector<2x4x8xf32> to vector<2x1x4x8xf32>
    tpu.vector_store %arg12[%c0_284, %c0_285, %c0_286, %c24], %182 {strides = array<i32>} : memref<2x4x8x72xf32, #tpu.memory_space<vmem>>, vector<2x1x4x8xf32>,
    %c0_287 = arith.constant 0 : index
    %c0_288 = arith.constant 0 : index
    %c3_289 = arith.constant 3 : index
    %c0_290 = arith.constant 0 : index
    %c0_291 = arith.constant 0 : index
    %183 = vector.load %arg11[%c0_287, %c0_288, %c3_289, %c0_290, %c0_291] : memref<2x2x10x5x8xf32, #tpu.memory_space<vmem>>, vector<1x2x1x4x8xf32>
    %184 = vector.shape_cast %183 : vector<1x2x1x4x8xf32> to vector<2x4x8xf32>
    %c0_292 = arith.constant 0 : index
    %c1_293 = arith.constant 1 : index
    %c0_294 = arith.constant 0 : index
    %c24_295 = arith.constant 24 : index
    %185 = vector.load %arg12[%c0_292, %c1_293, %c0_294, %c24_295] : memref<2x4x8x72xf32, #tpu.memory_space<vmem>>, vector<2x1x4x8xf32>
    %186 = vector.shape_cast %185 : vector<2x1x4x8xf32> to vector<2x4x8xf32>
    %187 = vector.shape_cast %184 : vector<2x4x8xf32> to vector<2x1x4x8xf32>
    tpu.vector_store %arg12[%c0_292, %c1_293, %c0_294, %c24_295], %187 {strides = array<i32>} : memref<2x4x8x72xf32, #tpu.memory_space<vmem>>, vector<2x1x4x8xf32>,
    %c0_296 = arith.constant 0 : index
    %c0_297 = arith.constant 0 : index
    %c5_298 = arith.constant 5 : index
    %c0_299 = arith.constant 0 : index
    %c0_300 = arith.constant 0 : index
    %188 = vector.load %arg11[%c0_296, %c0_297, %c5_298, %c0_299, %c0_300] : memref<2x2x10x5x8xf32, #tpu.memory_space<vmem>>, vector<1x2x1x4x8xf32>
    %189 = vector.shape_cast %188 : vector<1x2x1x4x8xf32> to vector<2x4x8xf32>
    %c0_301 = arith.constant 0 : index
    %c2_302 = arith.constant 2 : index
    %c0_303 = arith.constant 0 : index
    %c24_304 = arith.constant 24 : index
    %190 = vector.load %arg12[%c0_301, %c2_302, %c0_303, %c24_304] : memref<2x4x8x72xf32, #tpu.memory_space<vmem>>, vector<2x1x4x8xf32>
    %191 = vector.shape_cast %190 : vector<2x1x4x8xf32> to vector<2x4x8xf32>
    %192 = vector.shape_cast %189 : vector<2x4x8xf32> to vector<2x1x4x8xf32>
    tpu.vector_store %arg12[%c0_301, %c2_302, %c0_303, %c24_304], %192 {strides = array<i32>} : memref<2x4x8x72xf32, #tpu.memory_space<vmem>>, vector<2x1x4x8xf32>,
    %c0_305 = arith.constant 0 : index
    %c0_306 = arith.constant 0 : index
    %c7_307 = arith.constant 7 : index
    %c0_308 = arith.constant 0 : index
    %c0_309 = arith.constant 0 : index
    %193 = vector.load %arg11[%c0_305, %c0_306, %c7_307, %c0_308, %c0_309] : memref<2x2x10x5x8xf32, #tpu.memory_space<vmem>>, vector<1x2x1x4x8xf32>
    %194 = vector.shape_cast %193 : vector<1x2x1x4x8xf32> to vector<2x4x8xf32>
    %c0_310 = arith.constant 0 : index
    %c3_311 = arith.constant 3 : index
    %c0_312 = arith.constant 0 : index
    %c24_313 = arith.constant 24 : index
    %195 = vector.load %arg12[%c0_310, %c3_311, %c0_312, %c24_313] : memref<2x4x8x72xf32, #tpu.memory_space<vmem>>, vector<2x1x4x8xf32>
    %196 = vector.shape_cast %195 : vector<2x1x4x8xf32> to vector<2x4x8xf32>
    %197 = vector.shape_cast %194 : vector<2x4x8xf32> to vector<2x1x4x8xf32>
    tpu.vector_store %arg12[%c0_310, %c3_311, %c0_312, %c24_313], %197 {strides = array<i32>} : memref<2x4x8x72xf32, #tpu.memory_space<vmem>>, vector<2x1x4x8xf32>,
    %c1_314 = arith.constant 1 : index
    %c0_315 = arith.constant 0 : index
    %c1_316 = arith.constant 1 : index
    %c0_317 = arith.constant 0 : index
    %c0_318 = arith.constant 0 : index
    %198 = vector.load %arg11[%c1_314, %c0_315, %c1_316, %c0_317, %c0_318] : memref<2x2x10x5x8xf32, #tpu.memory_space<vmem>>, vector<1x2x1x4x8xf32>
    %199 = vector.shape_cast %198 : vector<1x2x1x4x8xf32> to vector<2x4x8xf32>
    %c0_319 = arith.constant 0 : index
    %c0_320 = arith.constant 0 : index
    %c0_321 = arith.constant 0 : index
    %c32 = arith.constant 32 : index
    %200 = vector.load %arg12[%c0_319, %c0_320, %c0_321, %c32] : memref<2x4x8x72xf32, #tpu.memory_space<vmem>>, vector<2x1x4x8xf32>
    %201 = vector.shape_cast %200 : vector<2x1x4x8xf32> to vector<2x4x8xf32>
    %202 = vector.shape_cast %199 : vector<2x4x8xf32> to vector<2x1x4x8xf32>
    tpu.vector_store %arg12[%c0_319, %c0_320, %c0_321, %c32], %202 {strides = array<i32>} : memref<2x4x8x72xf32, #tpu.memory_space<vmem>>, vector<2x1x4x8xf32>,
    %c1_322 = arith.constant 1 : index
    %c0_323 = arith.constant 0 : index
    %c3_324 = arith.constant 3 : index
    %c0_325 = arith.constant 0 : index
    %c0_326 = arith.constant 0 : index
    %203 = vector.load %arg11[%c1_322, %c0_323, %c3_324, %c0_325, %c0_326] : memref<2x2x10x5x8xf32, #tpu.memory_space<vmem>>, vector<1x2x1x4x8xf32>
    %204 = vector.shape_cast %203 : vector<1x2x1x4x8xf32> to vector<2x4x8xf32>
    %c0_327 = arith.constant 0 : index
    %c1_328 = arith.constant 1 : index
    %c0_329 = arith.constant 0 : index
    %c32_330 = arith.constant 32 : index
    %205 = vector.load %arg12[%c0_327, %c1_328, %c0_329, %c32_330] : memref<2x4x8x72xf32, #tpu.memory_space<vmem>>, vector<2x1x4x8xf32>
    %206 = vector.shape_cast %205 : vector<2x1x4x8xf32> to vector<2x4x8xf32>
    %207 = vector.shape_cast %204 : vector<2x4x8xf32> to vector<2x1x4x8xf32>
    tpu.vector_store %arg12[%c0_327, %c1_328, %c0_329, %c32_330], %207 {strides = array<i32>} : memref<2x4x8x72xf32, #tpu.memory_space<vmem>>, vector<2x1x4x8xf32>,
    %c1_331 = arith.constant 1 : index
    %c0_332 = arith.constant 0 : index
    %c5_333 = arith.constant 5 : index
    %c0_334 = arith.constant 0 : index
    %c0_335 = arith.constant 0 : index
    %208 = vector.load %arg11[%c1_331, %c0_332, %c5_333, %c0_334, %c0_335] : memref<2x2x10x5x8xf32, #tpu.memory_space<vmem>>, vector<1x2x1x4x8xf32>
    %209 = vector.shape_cast %208 : vector<1x2x1x4x8xf32> to vector<2x4x8xf32>
    %c0_336 = arith.constant 0 : index
    %c2_337 = arith.constant 2 : index
    %c0_338 = arith.constant 0 : index
    %c32_339 = arith.constant 32 : index
    %210 = vector.load %arg12[%c0_336, %c2_337, %c0_338, %c32_339] : memref<2x4x8x72xf32, #tpu.memory_space<vmem>>, vector<2x1x4x8xf32>
    %211 = vector.shape_cast %210 : vector<2x1x4x8xf32> to vector<2x4x8xf32>
    %212 = vector.shape_cast %209 : vector<2x4x8xf32> to vector<2x1x4x8xf32>
    tpu.vector_store %arg12[%c0_336, %c2_337, %c0_338, %c32_339], %212 {strides = array<i32>} : memref<2x4x8x72xf32, #tpu.memory_space<vmem>>, vector<2x1x4x8xf32>,
    %c1_340 = arith.constant 1 : index
    %c0_341 = arith.constant 0 : index
    %c7_342 = arith.constant 7 : index
    %c0_343 = arith.constant 0 : index
    %c0_344 = arith.constant 0 : index
    %213 = vector.load %arg11[%c1_340, %c0_341, %c7_342, %c0_343, %c0_344] : memref<2x2x10x5x8xf32, #tpu.memory_space<vmem>>, vector<1x2x1x4x8xf32>
    %214 = vector.shape_cast %213 : vector<1x2x1x4x8xf32> to vector<2x4x8xf32>
    %c0_345 = arith.constant 0 : index
    %c3_346 = arith.constant 3 : index
    %c0_347 = arith.constant 0 : index
    %c32_348 = arith.constant 32 : index
    %215 = vector.load %arg12[%c0_345, %c3_346, %c0_347, %c32_348] : memref<2x4x8x72xf32, #tpu.memory_space<vmem>>, vector<2x1x4x8xf32>
    %216 = vector.shape_cast %215 : vector<2x1x4x8xf32> to vector<2x4x8xf32>
    %217 = vector.shape_cast %214 : vector<2x4x8xf32> to vector<2x1x4x8xf32>
    tpu.vector_store %arg12[%c0_345, %c3_346, %c0_347, %c32_348], %217 {strides = array<i32>} : memref<2x4x8x72xf32, #tpu.memory_space<vmem>>, vector<2x1x4x8xf32>,
    %c0_349 = arith.constant 0 : index
    %c0_350 = arith.constant 0 : index
    %c1_351 = arith.constant 1 : index
    %c1_352 = arith.constant 1 : index
    %c0_353 = arith.constant 0 : index
    %218 = vector.load %arg11[%c0_349, %c0_350, %c1_351, %c1_352, %c0_353] : memref<2x2x10x5x8xf32, #tpu.memory_space<vmem>>, vector<1x2x1x4x8xf32>
    %219 = vector.shape_cast %218 : vector<1x2x1x4x8xf32> to vector<2x4x8xf32>
    %c0_354 = arith.constant 0 : index
    %c0_355 = arith.constant 0 : index
    %c0_356 = arith.constant 0 : index
    %c40 = arith.constant 40 : index
    %220 = vector.load %arg12[%c0_354, %c0_355, %c0_356, %c40] : memref<2x4x8x72xf32, #tpu.memory_space<vmem>>, vector<2x1x4x8xf32>
    %221 = vector.shape_cast %220 : vector<2x1x4x8xf32> to vector<2x4x8xf32>
    %222 = vector.shape_cast %219 : vector<2x4x8xf32> to vector<2x1x4x8xf32>
    tpu.vector_store %arg12[%c0_354, %c0_355, %c0_356, %c40], %222 {strides = array<i32>} : memref<2x4x8x72xf32, #tpu.memory_space<vmem>>, vector<2x1x4x8xf32>,
    %c0_357 = arith.constant 0 : index
    %c0_358 = arith.constant 0 : index
    %c3_359 = arith.constant 3 : index
    %c1_360 = arith.constant 1 : index
    %c0_361 = arith.constant 0 : index
    %223 = vector.load %arg11[%c0_357, %c0_358, %c3_359, %c1_360, %c0_361] : memref<2x2x10x5x8xf32, #tpu.memory_space<vmem>>, vector<1x2x1x4x8xf32>
    %224 = vector.shape_cast %223 : vector<1x2x1x4x8xf32> to vector<2x4x8xf32>
    %c0_362 = arith.constant 0 : index
    %c1_363 = arith.constant 1 : index
    %c0_364 = arith.constant 0 : index
    %c40_365 = arith.constant 40 : index
    %225 = vector.load %arg12[%c0_362, %c1_363, %c0_364, %c40_365] : memref<2x4x8x72xf32, #tpu.memory_space<vmem>>, vector<2x1x4x8xf32>
    %226 = vector.shape_cast %225 : vector<2x1x4x8xf32> to vector<2x4x8xf32>
    %227 = vector.shape_cast %224 : vector<2x4x8xf32> to vector<2x1x4x8xf32>
    tpu.vector_store %arg12[%c0_362, %c1_363, %c0_364, %c40_365], %227 {strides = array<i32>} : memref<2x4x8x72xf32, #tpu.memory_space<vmem>>, vector<2x1x4x8xf32>,
    %c0_366 = arith.constant 0 : index
    %c0_367 = arith.constant 0 : index
    %c5_368 = arith.constant 5 : index
    %c1_369 = arith.constant 1 : index
    %c0_370 = arith.constant 0 : index
    %228 = vector.load %arg11[%c0_366, %c0_367, %c5_368, %c1_369, %c0_370] : memref<2x2x10x5x8xf32, #tpu.memory_space<vmem>>, vector<1x2x1x4x8xf32>
    %229 = vector.shape_cast %228 : vector<1x2x1x4x8xf32> to vector<2x4x8xf32>
    %c0_371 = arith.constant 0 : index
    %c2_372 = arith.constant 2 : index
    %c0_373 = arith.constant 0 : index
    %c40_374 = arith.constant 40 : index
    %230 = vector.load %arg12[%c0_371, %c2_372, %c0_373, %c40_374] : memref<2x4x8x72xf32, #tpu.memory_space<vmem>>, vector<2x1x4x8xf32>
    %231 = vector.shape_cast %230 : vector<2x1x4x8xf32> to vector<2x4x8xf32>
    %232 = vector.shape_cast %229 : vector<2x4x8xf32> to vector<2x1x4x8xf32>
    tpu.vector_store %arg12[%c0_371, %c2_372, %c0_373, %c40_374], %232 {strides = array<i32>} : memref<2x4x8x72xf32, #tpu.memory_space<vmem>>, vector<2x1x4x8xf32>,
    %c0_375 = arith.constant 0 : index
    %c0_376 = arith.constant 0 : index
    %c7_377 = arith.constant 7 : index
    %c1_378 = arith.constant 1 : index
    %c0_379 = arith.constant 0 : index
    %233 = vector.load %arg11[%c0_375, %c0_376, %c7_377, %c1_378, %c0_379] : memref<2x2x10x5x8xf32, #tpu.memory_space<vmem>>, vector<1x2x1x4x8xf32>
    %234 = vector.shape_cast %233 : vector<1x2x1x4x8xf32> to vector<2x4x8xf32>
    %c0_380 = arith.constant 0 : index
    %c3_381 = arith.constant 3 : index
    %c0_382 = arith.constant 0 : index
    %c40_383 = arith.constant 40 : index
    %235 = vector.load %arg12[%c0_380, %c3_381, %c0_382, %c40_383] : memref<2x4x8x72xf32, #tpu.memory_space<vmem>>, vector<2x1x4x8xf32>
    %236 = vector.shape_cast %235 : vector<2x1x4x8xf32> to vector<2x4x8xf32>
    %237 = vector.shape_cast %234 : vector<2x4x8xf32> to vector<2x1x4x8xf32>
    tpu.vector_store %arg12[%c0_380, %c3_381, %c0_382, %c40_383], %237 {strides = array<i32>} : memref<2x4x8x72xf32, #tpu.memory_space<vmem>>, vector<2x1x4x8xf32>,
    %c0_384 = arith.constant 0 : index
    %c0_385 = arith.constant 0 : index
    %c2_386 = arith.constant 2 : index
    %c0_387 = arith.constant 0 : index
    %c0_388 = arith.constant 0 : index
    %238 = vector.load %arg11[%c0_384, %c0_385, %c2_386, %c0_387, %c0_388] : memref<2x2x10x5x8xf32, #tpu.memory_space<vmem>>, vector<1x2x1x4x8xf32>
    %239 = vector.shape_cast %238 : vector<1x2x1x4x8xf32> to vector<2x4x8xf32>
    %c0_389 = arith.constant 0 : index
    %c0_390 = arith.constant 0 : index
    %c0_391 = arith.constant 0 : index
    %c48 = arith.constant 48 : index
    %240 = vector.load %arg12[%c0_389, %c0_390, %c0_391, %c48] : memref<2x4x8x72xf32, #tpu.memory_space<vmem>>, vector<2x1x4x8xf32>
    %241 = vector.shape_cast %240 : vector<2x1x4x8xf32> to vector<2x4x8xf32>
    %242 = vector.shape_cast %239 : vector<2x4x8xf32> to vector<2x1x4x8xf32>
    tpu.vector_store %arg12[%c0_389, %c0_390, %c0_391, %c48], %242 {strides = array<i32>} : memref<2x4x8x72xf32, #tpu.memory_space<vmem>>, vector<2x1x4x8xf32>,
    %c0_392 = arith.constant 0 : index
    %c0_393 = arith.constant 0 : index
    %c4_394 = arith.constant 4 : index
    %c0_395 = arith.constant 0 : index
    %c0_396 = arith.constant 0 : index
    %243 = vector.load %arg11[%c0_392, %c0_393, %c4_394, %c0_395, %c0_396] : memref<2x2x10x5x8xf32, #tpu.memory_space<vmem>>, vector<1x2x1x4x8xf32>
    %244 = vector.shape_cast %243 : vector<1x2x1x4x8xf32> to vector<2x4x8xf32>
    %c0_397 = arith.constant 0 : index
    %c1_398 = arith.constant 1 : index
    %c0_399 = arith.constant 0 : index
    %c48_400 = arith.constant 48 : index
    %245 = vector.load %arg12[%c0_397, %c1_398, %c0_399, %c48_400] : memref<2x4x8x72xf32, #tpu.memory_space<vmem>>, vector<2x1x4x8xf32>
    %246 = vector.shape_cast %245 : vector<2x1x4x8xf32> to vector<2x4x8xf32>
    %247 = vector.shape_cast %244 : vector<2x4x8xf32> to vector<2x1x4x8xf32>
    tpu.vector_store %arg12[%c0_397, %c1_398, %c0_399, %c48_400], %247 {strides = array<i32>} : memref<2x4x8x72xf32, #tpu.memory_space<vmem>>, vector<2x1x4x8xf32>,
    %c0_401 = arith.constant 0 : index
    %c0_402 = arith.constant 0 : index
    %c6_403 = arith.constant 6 : index
    %c0_404 = arith.constant 0 : index
    %c0_405 = arith.constant 0 : index
    %248 = vector.load %arg11[%c0_401, %c0_402, %c6_403, %c0_404, %c0_405] : memref<2x2x10x5x8xf32, #tpu.memory_space<vmem>>, vector<1x2x1x4x8xf32>
    %249 = vector.shape_cast %248 : vector<1x2x1x4x8xf32> to vector<2x4x8xf32>
    %c0_406 = arith.constant 0 : index
    %c2_407 = arith.constant 2 : index
    %c0_408 = arith.constant 0 : index
    %c48_409 = arith.constant 48 : index
    %250 = vector.load %arg12[%c0_406, %c2_407, %c0_408, %c48_409] : memref<2x4x8x72xf32, #tpu.memory_space<vmem>>, vector<2x1x4x8xf32>
    %251 = vector.shape_cast %250 : vector<2x1x4x8xf32> to vector<2x4x8xf32>
    %252 = vector.shape_cast %249 : vector<2x4x8xf32> to vector<2x1x4x8xf32>
    tpu.vector_store %arg12[%c0_406, %c2_407, %c0_408, %c48_409], %252 {strides = array<i32>} : memref<2x4x8x72xf32, #tpu.memory_space<vmem>>, vector<2x1x4x8xf32>,
    %c0_410 = arith.constant 0 : index
    %c0_411 = arith.constant 0 : index
    %c8_412 = arith.constant 8 : index
    %c0_413 = arith.constant 0 : index
    %c0_414 = arith.constant 0 : index
    %253 = vector.load %arg11[%c0_410, %c0_411, %c8_412, %c0_413, %c0_414] : memref<2x2x10x5x8xf32, #tpu.memory_space<vmem>>, vector<1x2x1x4x8xf32>
    %254 = vector.shape_cast %253 : vector<1x2x1x4x8xf32> to vector<2x4x8xf32>
    %c0_415 = arith.constant 0 : index
    %c3_416 = arith.constant 3 : index
    %c0_417 = arith.constant 0 : index
    %c48_418 = arith.constant 48 : index
    %255 = vector.load %arg12[%c0_415, %c3_416, %c0_417, %c48_418] : memref<2x4x8x72xf32, #tpu.memory_space<vmem>>, vector<2x1x4x8xf32>
    %256 = vector.shape_cast %255 : vector<2x1x4x8xf32> to vector<2x4x8xf32>
    %257 = vector.shape_cast %254 : vector<2x4x8xf32> to vector<2x1x4x8xf32>
    tpu.vector_store %arg12[%c0_415, %c3_416, %c0_417, %c48_418], %257 {strides = array<i32>} : memref<2x4x8x72xf32, #tpu.memory_space<vmem>>, vector<2x1x4x8xf32>,
    %c1_419 = arith.constant 1 : index
    %c0_420 = arith.constant 0 : index
    %c2_421 = arith.constant 2 : index
    %c0_422 = arith.constant 0 : index
    %c0_423 = arith.constant 0 : index
    %258 = vector.load %arg11[%c1_419, %c0_420, %c2_421, %c0_422, %c0_423] : memref<2x2x10x5x8xf32, #tpu.memory_space<vmem>>, vector<1x2x1x4x8xf32>
    %259 = vector.shape_cast %258 : vector<1x2x1x4x8xf32> to vector<2x4x8xf32>
    %c0_424 = arith.constant 0 : index
    %c0_425 = arith.constant 0 : index
    %c0_426 = arith.constant 0 : index
    %c56 = arith.constant 56 : index
    %260 = vector.load %arg12[%c0_424, %c0_425, %c0_426, %c56] : memref<2x4x8x72xf32, #tpu.memory_space<vmem>>, vector<2x1x4x8xf32>
    %261 = vector.shape_cast %260 : vector<2x1x4x8xf32> to vector<2x4x8xf32>
    %262 = vector.shape_cast %259 : vector<2x4x8xf32> to vector<2x1x4x8xf32>
    tpu.vector_store %arg12[%c0_424, %c0_425, %c0_426, %c56], %262 {strides = array<i32>} : memref<2x4x8x72xf32, #tpu.memory_space<vmem>>, vector<2x1x4x8xf32>,
    %c1_427 = arith.constant 1 : index
    %c0_428 = arith.constant 0 : index
    %c4_429 = arith.constant 4 : index
    %c0_430 = arith.constant 0 : index
    %c0_431 = arith.constant 0 : index
    %263 = vector.load %arg11[%c1_427, %c0_428, %c4_429, %c0_430, %c0_431] : memref<2x2x10x5x8xf32, #tpu.memory_space<vmem>>, vector<1x2x1x4x8xf32>
    %264 = vector.shape_cast %263 : vector<1x2x1x4x8xf32> to vector<2x4x8xf32>
    %c0_432 = arith.constant 0 : index
    %c1_433 = arith.constant 1 : index
    %c0_434 = arith.constant 0 : index
    %c56_435 = arith.constant 56 : index
    %265 = vector.load %arg12[%c0_432, %c1_433, %c0_434, %c56_435] : memref<2x4x8x72xf32, #tpu.memory_space<vmem>>, vector<2x1x4x8xf32>
    %266 = vector.shape_cast %265 : vector<2x1x4x8xf32> to vector<2x4x8xf32>
    %267 = vector.shape_cast %264 : vector<2x4x8xf32> to vector<2x1x4x8xf32>
    tpu.vector_store %arg12[%c0_432, %c1_433, %c0_434, %c56_435], %267 {strides = array<i32>} : memref<2x4x8x72xf32, #tpu.memory_space<vmem>>, vector<2x1x4x8xf32>,
    %c1_436 = arith.constant 1 : index
    %c0_437 = arith.constant 0 : index
    %c6_438 = arith.constant 6 : index
    %c0_439 = arith.constant 0 : index
    %c0_440 = arith.constant 0 : index
    %268 = vector.load %arg11[%c1_436, %c0_437, %c6_438, %c0_439, %c0_440] : memref<2x2x10x5x8xf32, #tpu.memory_space<vmem>>, vector<1x2x1x4x8xf32>
    %269 = vector.shape_cast %268 : vector<1x2x1x4x8xf32> to vector<2x4x8xf32>
    %c0_441 = arith.constant 0 : index
    %c2_442 = arith.constant 2 : index
    %c0_443 = arith.constant 0 : index
    %c56_444 = arith.constant 56 : index
    %270 = vector.load %arg12[%c0_441, %c2_442, %c0_443, %c56_444] : memref<2x4x8x72xf32, #tpu.memory_space<vmem>>, vector<2x1x4x8xf32>
    %271 = vector.shape_cast %270 : vector<2x1x4x8xf32> to vector<2x4x8xf32>
    %272 = vector.shape_cast %269 : vector<2x4x8xf32> to vector<2x1x4x8xf32>
    tpu.vector_store %arg12[%c0_441, %c2_442, %c0_443, %c56_444], %272 {strides = array<i32>} : memref<2x4x8x72xf32, #tpu.memory_space<vmem>>, vector<2x1x4x8xf32>,
    %c1_445 = arith.constant 1 : index
    %c0_446 = arith.constant 0 : index
    %c8_447 = arith.constant 8 : index
    %c0_448 = arith.constant 0 : index
    %c0_449 = arith.constant 0 : index
    %273 = vector.load %arg11[%c1_445, %c0_446, %c8_447, %c0_448, %c0_449] : memref<2x2x10x5x8xf32, #tpu.memory_space<vmem>>, vector<1x2x1x4x8xf32>
    %274 = vector.shape_cast %273 : vector<1x2x1x4x8xf32> to vector<2x4x8xf32>
    %c0_450 = arith.constant 0 : index
    %c3_451 = arith.constant 3 : index
    %c0_452 = arith.constant 0 : index
    %c56_453 = arith.constant 56 : index
    %275 = vector.load %arg12[%c0_450, %c3_451, %c0_452, %c56_453] : memref<2x4x8x72xf32, #tpu.memory_space<vmem>>, vector<2x1x4x8xf32>
    %276 = vector.shape_cast %275 : vector<2x1x4x8xf32> to vector<2x4x8xf32>
    %277 = vector.shape_cast %274 : vector<2x4x8xf32> to vector<2x1x4x8xf32>
    tpu.vector_store %arg12[%c0_450, %c3_451, %c0_452, %c56_453], %277 {strides = array<i32>} : memref<2x4x8x72xf32, #tpu.memory_space<vmem>>, vector<2x1x4x8xf32>,
    %c0_454 = arith.constant 0 : index
    %c0_455 = arith.constant 0 : index
    %c2_456 = arith.constant 2 : index
    %c1_457 = arith.constant 1 : index
    %c0_458 = arith.constant 0 : index
    %278 = vector.load %arg11[%c0_454, %c0_455, %c2_456, %c1_457, %c0_458] : memref<2x2x10x5x8xf32, #tpu.memory_space<vmem>>, vector<1x2x1x4x8xf32>
    %279 = vector.shape_cast %278 : vector<1x2x1x4x8xf32> to vector<2x4x8xf32>
    %c0_459 = arith.constant 0 : index
    %c0_460 = arith.constant 0 : index
    %c0_461 = arith.constant 0 : index
    %c64 = arith.constant 64 : index
    %280 = vector.load %arg12[%c0_459, %c0_460, %c0_461, %c64] : memref<2x4x8x72xf32, #tpu.memory_space<vmem>>, vector<2x1x4x8xf32>
    %281 = vector.shape_cast %280 : vector<2x1x4x8xf32> to vector<2x4x8xf32>
    %282 = vector.shape_cast %279 : vector<2x4x8xf32> to vector<2x1x4x8xf32>
    tpu.vector_store %arg12[%c0_459, %c0_460, %c0_461, %c64], %282 {strides = array<i32>} : memref<2x4x8x72xf32, #tpu.memory_space<vmem>>, vector<2x1x4x8xf32>,
    %c0_462 = arith.constant 0 : index
    %c0_463 = arith.constant 0 : index
    %c4_464 = arith.constant 4 : index
    %c1_465 = arith.constant 1 : index
    %c0_466 = arith.constant 0 : index
    %283 = vector.load %arg11[%c0_462, %c0_463, %c4_464, %c1_465, %c0_466] : memref<2x2x10x5x8xf32, #tpu.memory_space<vmem>>, vector<1x2x1x4x8xf32>
    %284 = vector.shape_cast %283 : vector<1x2x1x4x8xf32> to vector<2x4x8xf32>
    %c0_467 = arith.constant 0 : index
    %c1_468 = arith.constant 1 : index
    %c0_469 = arith.constant 0 : index
    %c64_470 = arith.constant 64 : index
    %285 = vector.load %arg12[%c0_467, %c1_468, %c0_469, %c64_470] : memref<2x4x8x72xf32, #tpu.memory_space<vmem>>, vector<2x1x4x8xf32>
    %286 = vector.shape_cast %285 : vector<2x1x4x8xf32> to vector<2x4x8xf32>
    %287 = vector.shape_cast %284 : vector<2x4x8xf32> to vector<2x1x4x8xf32>
    tpu.vector_store %arg12[%c0_467, %c1_468, %c0_469, %c64_470], %287 {strides = array<i32>} : memref<2x4x8x72xf32, #tpu.memory_space<vmem>>, vector<2x1x4x8xf32>,
    %c0_471 = arith.constant 0 : index
    %c0_472 = arith.constant 0 : index
    %c6_473 = arith.constant 6 : index
    %c1_474 = arith.constant 1 : index
    %c0_475 = arith.constant 0 : index
    %288 = vector.load %arg11[%c0_471, %c0_472, %c6_473, %c1_474, %c0_475] : memref<2x2x10x5x8xf32, #tpu.memory_space<vmem>>, vector<1x2x1x4x8xf32>
    %289 = vector.shape_cast %288 : vector<1x2x1x4x8xf32> to vector<2x4x8xf32>
    %c0_476 = arith.constant 0 : index
    %c2_477 = arith.constant 2 : index
    %c0_478 = arith.constant 0 : index
    %c64_479 = arith.constant 64 : index
    %290 = vector.load %arg12[%c0_476, %c2_477, %c0_478, %c64_479] : memref<2x4x8x72xf32, #tpu.memory_space<vmem>>, vector<2x1x4x8xf32>
    %291 = vector.shape_cast %290 : vector<2x1x4x8xf32> to vector<2x4x8xf32>
    %292 = vector.shape_cast %289 : vector<2x4x8xf32> to vector<2x1x4x8xf32>
    tpu.vector_store %arg12[%c0_476, %c2_477, %c0_478, %c64_479], %292 {strides = array<i32>} : memref<2x4x8x72xf32, #tpu.memory_space<vmem>>, vector<2x1x4x8xf32>,
    %c0_480 = arith.constant 0 : index
    %c0_481 = arith.constant 0 : index
    %c8_482 = arith.constant 8 : index
    %c1_483 = arith.constant 1 : index
    %c0_484 = arith.constant 0 : index
    %293 = vector.load %arg11[%c0_480, %c0_481, %c8_482, %c1_483, %c0_484] : memref<2x2x10x5x8xf32, #tpu.memory_space<vmem>>, vector<1x2x1x4x8xf32>
    %294 = vector.shape_cast %293 : vector<1x2x1x4x8xf32> to vector<2x4x8xf32>
    %c0_485 = arith.constant 0 : index
    %c3_486 = arith.constant 3 : index
    %c0_487 = arith.constant 0 : index
    %c64_488 = arith.constant 64 : index
    %295 = vector.load %arg12[%c0_485, %c3_486, %c0_487, %c64_488] : memref<2x4x8x72xf32, #tpu.memory_space<vmem>>, vector<2x1x4x8xf32>
    %296 = vector.shape_cast %295 : vector<2x1x4x8xf32> to vector<2x4x8xf32>
    %297 = vector.shape_cast %294 : vector<2x4x8xf32> to vector<2x1x4x8xf32>
    tpu.vector_store %arg12[%c0_485, %c3_486, %c0_487, %c64_488], %297 {strides = array<i32>} : memref<2x4x8x72xf32, #tpu.memory_space<vmem>>, vector<2x1x4x8xf32>,
    %c0_489 = arith.constant 0 : index
    %c0_490 = arith.constant 0 : index
    %c0_491 = arith.constant 0 : index
    %c0_492 = arith.constant 0 : index
    %298 = vector.load %arg12[%c0_489, %c0_490, %c0_491, %c0_492] : memref<2x4x8x72xf32, #tpu.memory_space<vmem>>, vector<2x4x8x72xf32>
    %299 = vector.shape_cast %298 : vector<2x4x8x72xf32> to vector<64x72xf32>
    %c0_493 = arith.constant 0 : index
    %c0_494 = arith.constant 0 : index
    %300 = vector.load %arg3[%c0_493, %c0_494] : memref<72x16xf32, #tpu.memory_space<vmem>>, vector<72x16xf32>
    %cst_495 = arith.constant dense<0.000000e+00> : vector<64x16xf32>
    %301 = tpu.matmul %299, %300, %cst_495 {dimension_numbers = #tpu.dot_dimension_numbers<[1], [0], [0], [1], [0, 0, 1, 1], [], []>} : vector<64x72xf32>, vector<72x16xf32>, vector<64x16xf32> -> vector<64x16xf32>
    %c0_496 = arith.constant 0 : index
    %c0_497 = arith.constant 0 : index
    %302 = vector.load %arg4[%c0_496, %c0_497] : memref<1x16xf32, #tpu.memory_space<vmem>>, vector<1x16xf32>
    %303 = vector.broadcast %302 : vector<1x16xf32> to vector<64x16xf32>
    %304 = arith.addf %301, %303 : vector<64x16xf32>
    %cst_498 = arith.constant 0.000000e+00 : f32
    %305 = vector.broadcast %cst_498 : f32 to vector<64x16xf32>
    %306 = arith.cmpf oge, %304, %305 : vector<64x16xf32>
    %cst_499 = arith.constant 2.000000e-01 : f32
    %307 = vector.broadcast %cst_499 : f32 to vector<64x16xf32>
    %308 = arith.mulf %307, %304 : vector<64x16xf32>
    %309 = arith.select %306, %304, %308 : vector<64x16xi1>, vector<64x16xf32>
    %310 = vector.shape_cast %309 : vector<64x16xf32> to vector<2x32x16xf32>
    %c0_500 = arith.constant 0 : index
    %c0_501 = arith.constant 0 : index
    %c0_502 = arith.constant 0 : index
    %311 = vector.load %arg13[%c0_500, %c0_501, %c0_502] : memref<2x32x16xf32, #tpu.memory_space<vmem>>, vector<2x32x16xf32>
    tpu.vector_store %arg13[%c0_500, %c0_501, %c0_502], %310 {strides = array<i32>} : memref<2x32x16xf32, #tpu.memory_space<vmem>>, vector<2x32x16xf32>,
    %cst_503 = arith.constant 0.000000e+00 : f32
    %312 = vector.broadcast %cst_503 : f32 to vector<2x32xf32>
    %c0_504 = arith.constant 0 : index
    %c0_505 = arith.constant 0 : index
    %c0_506 = arith.constant 0 : index
    %313 = vector.load %arg13[%c0_504, %c0_505, %c0_506] : memref<2x32x16xf32, #tpu.memory_space<vmem>>, vector<2x1x16xf32>
    %314 = vector.shape_cast %313 : vector<2x1x16xf32> to vector<2x16xf32>
    %c0_507 = arith.constant 0 : index
    %c0_508 = arith.constant 0 : index
    %c0_509 = arith.constant 0 : index
    %315 = vector.load %arg5[%c0_507, %c0_508, %c0_509] : memref<16x16x32xf32, #tpu.memory_space<vmem>>, vector<1x16x32xf32>
    %316 = vector.shape_cast %315 : vector<1x16x32xf32> to vector<16x32xf32>
    %cst_510 = arith.constant dense<0.000000e+00> : vector<2x32xf32>
    %317 = tpu.matmul %314, %316, %cst_510 {dimension_numbers = #tpu.dot_dimension_numbers<[1], [0], [0], [1], [0, 0, 1, 1], [], []>} : vector<2x16xf32>, vector<16x32xf32>, vector<2x32xf32> -> vector<2x32xf32>
    %318 = arith.addf %312, %317 : vector<2x32xf32>
    %c0_511 = arith.constant 0 : index
    %c1_512 = arith.constant 1 : index
    %c0_513 = arith.constant 0 : index
    %319 = vector.load %arg13[%c0_511, %c1_512, %c0_513] : memref<2x32x16xf32, #tpu.memory_space<vmem>>, vector<2x1x16xf32>
    %320 = vector.shape_cast %319 : vector<2x1x16xf32> to vector<2x16xf32>
    %c1_514 = arith.constant 1 : index
    %c0_515 = arith.constant 0 : index
    %c0_516 = arith.constant 0 : index
    %321 = vector.load %arg5[%c1_514, %c0_515, %c0_516] : memref<16x16x32xf32, #tpu.memory_space<vmem>>, vector<1x16x32xf32>
    %322 = vector.shape_cast %321 : vector<1x16x32xf32> to vector<16x32xf32>
    %cst_517 = arith.constant dense<0.000000e+00> : vector<2x32xf32>
    %323 = tpu.matmul %320, %322, %cst_517 {dimension_numbers = #tpu.dot_dimension_numbers<[1], [0], [0], [1], [0, 0, 1, 1], [], []>} : vector<2x16xf32>, vector<16x32xf32>, vector<2x32xf32> -> vector<2x32xf32>
    %324 = arith.addf %318, %323 : vector<2x32xf32>
    %c0_518 = arith.constant 0 : index
    %c2_519 = arith.constant 2 : index
    %c0_520 = arith.constant 0 : index
    %325 = vector.load %arg13[%c0_518, %c2_519, %c0_520] : memref<2x32x16xf32, #tpu.memory_space<vmem>>, vector<2x1x16xf32>
    %326 = vector.shape_cast %325 : vector<2x1x16xf32> to vector<2x16xf32>
    %c2_521 = arith.constant 2 : index
    %c0_522 = arith.constant 0 : index
    %c0_523 = arith.constant 0 : index
    %327 = vector.load %arg5[%c2_521, %c0_522, %c0_523] : memref<16x16x32xf32, #tpu.memory_space<vmem>>, vector<1x16x32xf32>
    %328 = vector.shape_cast %327 : vector<1x16x32xf32> to vector<16x32xf32>
    %cst_524 = arith.constant dense<0.000000e+00> : vector<2x32xf32>
    %329 = tpu.matmul %326, %328, %cst_524 {dimension_numbers = #tpu.dot_dimension_numbers<[1], [0], [0], [1], [0, 0, 1, 1], [], []>} : vector<2x16xf32>, vector<16x32xf32>, vector<2x32xf32> -> vector<2x32xf32>
    %330 = arith.addf %324, %329 : vector<2x32xf32>
    %c0_525 = arith.constant 0 : index
    %c3_526 = arith.constant 3 : index
    %c0_527 = arith.constant 0 : index
    %331 = vector.load %arg13[%c0_525, %c3_526, %c0_527] : memref<2x32x16xf32, #tpu.memory_space<vmem>>, vector<2x1x16xf32>
    %332 = vector.shape_cast %331 : vector<2x1x16xf32> to vector<2x16xf32>
    %c3_528 = arith.constant 3 : index
    %c0_529 = arith.constant 0 : index
    %c0_530 = arith.constant 0 : index
    %333 = vector.load %arg5[%c3_528, %c0_529, %c0_530] : memref<16x16x32xf32, #tpu.memory_space<vmem>>, vector<1x16x32xf32>
    %334 = vector.shape_cast %333 : vector<1x16x32xf32> to vector<16x32xf32>
    %cst_531 = arith.constant dense<0.000000e+00> : vector<2x32xf32>
    %335 = tpu.matmul %332, %334, %cst_531 {dimension_numbers = #tpu.dot_dimension_numbers<[1], [0], [0], [1], [0, 0, 1, 1], [], []>} : vector<2x16xf32>, vector<16x32xf32>, vector<2x32xf32> -> vector<2x32xf32>
    %336 = arith.addf %330, %335 : vector<2x32xf32>
    %c0_532 = arith.constant 0 : index
    %c8_533 = arith.constant 8 : index
    %c0_534 = arith.constant 0 : index
    %337 = vector.load %arg13[%c0_532, %c8_533, %c0_534] : memref<2x32x16xf32, #tpu.memory_space<vmem>>, vector<2x1x16xf32>
    %338 = vector.shape_cast %337 : vector<2x1x16xf32> to vector<2x16xf32>
    %c4_535 = arith.constant 4 : index
    %c0_536 = arith.constant 0 : index
    %c0_537 = arith.constant 0 : index
    %339 = vector.load %arg5[%c4_535, %c0_536, %c0_537] : memref<16x16x32xf32, #tpu.memory_space<vmem>>, vector<1x16x32xf32>
    %340 = vector.shape_cast %339 : vector<1x16x32xf32> to vector<16x32xf32>
    %cst_538 = arith.constant dense<0.000000e+00> : vector<2x32xf32>
    %341 = tpu.matmul %338, %340, %cst_538 {dimension_numbers = #tpu.dot_dimension_numbers<[1], [0], [0], [1], [0, 0, 1, 1], [], []>} : vector<2x16xf32>, vector<16x32xf32>, vector<2x32xf32> -> vector<2x32xf32>
    %342 = arith.addf %336, %341 : vector<2x32xf32>
    %c0_539 = arith.constant 0 : index
    %c9 = arith.constant 9 : index
    %c0_540 = arith.constant 0 : index
    %343 = vector.load %arg13[%c0_539, %c9, %c0_540] : memref<2x32x16xf32, #tpu.memory_space<vmem>>, vector<2x1x16xf32>
    %344 = vector.shape_cast %343 : vector<2x1x16xf32> to vector<2x16xf32>
    %c5_541 = arith.constant 5 : index
    %c0_542 = arith.constant 0 : index
    %c0_543 = arith.constant 0 : index
    %345 = vector.load %arg5[%c5_541, %c0_542, %c0_543] : memref<16x16x32xf32, #tpu.memory_space<vmem>>, vector<1x16x32xf32>
    %346 = vector.shape_cast %345 : vector<1x16x32xf32> to vector<16x32xf32>
    %cst_544 = arith.constant dense<0.000000e+00> : vector<2x32xf32>
    %347 = tpu.matmul %344, %346, %cst_544 {dimension_numbers = #tpu.dot_dimension_numbers<[1], [0], [0], [1], [0, 0, 1, 1], [], []>} : vector<2x16xf32>, vector<16x32xf32>, vector<2x32xf32> -> vector<2x32xf32>
    %348 = arith.addf %342, %347 : vector<2x32xf32>
    %c0_545 = arith.constant 0 : index
    %c10 = arith.constant 10 : index
    %c0_546 = arith.constant 0 : index
    %349 = vector.load %arg13[%c0_545, %c10, %c0_546] : memref<2x32x16xf32, #tpu.memory_space<vmem>>, vector<2x1x16xf32>
    %350 = vector.shape_cast %349 : vector<2x1x16xf32> to vector<2x16xf32>
    %c6_547 = arith.constant 6 : index
    %c0_548 = arith.constant 0 : index
    %c0_549 = arith.constant 0 : index
    %351 = vector.load %arg5[%c6_547, %c0_548, %c0_549] : memref<16x16x32xf32, #tpu.memory_space<vmem>>, vector<1x16x32xf32>
    %352 = vector.shape_cast %351 : vector<1x16x32xf32> to vector<16x32xf32>
    %cst_550 = arith.constant dense<0.000000e+00> : vector<2x32xf32>
    %353 = tpu.matmul %350, %352, %cst_550 {dimension_numbers = #tpu.dot_dimension_numbers<[1], [0], [0], [1], [0, 0, 1, 1], [], []>} : vector<2x16xf32>, vector<16x32xf32>, vector<2x32xf32> -> vector<2x32xf32>
    %354 = arith.addf %348, %353 : vector<2x32xf32>
    %c0_551 = arith.constant 0 : index
    %c11 = arith.constant 11 : index
    %c0_552 = arith.constant 0 : index
    %355 = vector.load %arg13[%c0_551, %c11, %c0_552] : memref<2x32x16xf32, #tpu.memory_space<vmem>>, vector<2x1x16xf32>
    %356 = vector.shape_cast %355 : vector<2x1x16xf32> to vector<2x16xf32>
    %c7_553 = arith.constant 7 : index
    %c0_554 = arith.constant 0 : index
    %c0_555 = arith.constant 0 : index
    %357 = vector.load %arg5[%c7_553, %c0_554, %c0_555] : memref<16x16x32xf32, #tpu.memory_space<vmem>>, vector<1x16x32xf32>
    %358 = vector.shape_cast %357 : vector<1x16x32xf32> to vector<16x32xf32>
    %cst_556 = arith.constant dense<0.000000e+00> : vector<2x32xf32>
    %359 = tpu.matmul %356, %358, %cst_556 {dimension_numbers = #tpu.dot_dimension_numbers<[1], [0], [0], [1], [0, 0, 1, 1], [], []>} : vector<2x16xf32>, vector<16x32xf32>, vector<2x32xf32> -> vector<2x32xf32>
    %360 = arith.addf %354, %359 : vector<2x32xf32>
    %c0_557 = arith.constant 0 : index
    %c16_558 = arith.constant 16 : index
    %c0_559 = arith.constant 0 : index
    %361 = vector.load %arg13[%c0_557, %c16_558, %c0_559] : memref<2x32x16xf32, #tpu.memory_space<vmem>>, vector<2x1x16xf32>
    %362 = vector.shape_cast %361 : vector<2x1x16xf32> to vector<2x16xf32>
    %c8_560 = arith.constant 8 : index
    %c0_561 = arith.constant 0 : index
    %c0_562 = arith.constant 0 : index
    %363 = vector.load %arg5[%c8_560, %c0_561, %c0_562] : memref<16x16x32xf32, #tpu.memory_space<vmem>>, vector<1x16x32xf32>
    %364 = vector.shape_cast %363 : vector<1x16x32xf32> to vector<16x32xf32>
    %cst_563 = arith.constant dense<0.000000e+00> : vector<2x32xf32>
    %365 = tpu.matmul %362, %364, %cst_563 {dimension_numbers = #tpu.dot_dimension_numbers<[1], [0], [0], [1], [0, 0, 1, 1], [], []>} : vector<2x16xf32>, vector<16x32xf32>, vector<2x32xf32> -> vector<2x32xf32>
    %366 = arith.addf %360, %365 : vector<2x32xf32>
    %c0_564 = arith.constant 0 : index
    %c17 = arith.constant 17 : index
    %c0_565 = arith.constant 0 : index
    %367 = vector.load %arg13[%c0_564, %c17, %c0_565] : memref<2x32x16xf32, #tpu.memory_space<vmem>>, vector<2x1x16xf32>
    %368 = vector.shape_cast %367 : vector<2x1x16xf32> to vector<2x16xf32>
    %c9_566 = arith.constant 9 : index
    %c0_567 = arith.constant 0 : index
    %c0_568 = arith.constant 0 : index
    %369 = vector.load %arg5[%c9_566, %c0_567, %c0_568] : memref<16x16x32xf32, #tpu.memory_space<vmem>>, vector<1x16x32xf32>
    %370 = vector.shape_cast %369 : vector<1x16x32xf32> to vector<16x32xf32>
    %cst_569 = arith.constant dense<0.000000e+00> : vector<2x32xf32>
    %371 = tpu.matmul %368, %370, %cst_569 {dimension_numbers = #tpu.dot_dimension_numbers<[1], [0], [0], [1], [0, 0, 1, 1], [], []>} : vector<2x16xf32>, vector<16x32xf32>, vector<2x32xf32> -> vector<2x32xf32>
    %372 = arith.addf %366, %371 : vector<2x32xf32>
    %c0_570 = arith.constant 0 : index
    %c18 = arith.constant 18 : index
    %c0_571 = arith.constant 0 : index
    %373 = vector.load %arg13[%c0_570, %c18, %c0_571] : memref<2x32x16xf32, #tpu.memory_space<vmem>>, vector<2x1x16xf32>
    %374 = vector.shape_cast %373 : vector<2x1x16xf32> to vector<2x16xf32>
    %c10_572 = arith.constant 10 : index
    %c0_573 = arith.constant 0 : index
    %c0_574 = arith.constant 0 : index
    %375 = vector.load %arg5[%c10_572, %c0_573, %c0_574] : memref<16x16x32xf32, #tpu.memory_space<vmem>>, vector<1x16x32xf32>
    %376 = vector.shape_cast %375 : vector<1x16x32xf32> to vector<16x32xf32>
    %cst_575 = arith.constant dense<0.000000e+00> : vector<2x32xf32>
    %377 = tpu.matmul %374, %376, %cst_575 {dimension_numbers = #tpu.dot_dimension_numbers<[1], [0], [0], [1], [0, 0, 1, 1], [], []>} : vector<2x16xf32>, vector<16x32xf32>, vector<2x32xf32> -> vector<2x32xf32>
    %378 = arith.addf %372, %377 : vector<2x32xf32>
    %c0_576 = arith.constant 0 : index
    %c19 = arith.constant 19 : index
    %c0_577 = arith.constant 0 : index
    %379 = vector.load %arg13[%c0_576, %c19, %c0_577] : memref<2x32x16xf32, #tpu.memory_space<vmem>>, vector<2x1x16xf32>
    %380 = vector.shape_cast %379 : vector<2x1x16xf32> to vector<2x16xf32>
    %c11_578 = arith.constant 11 : index
    %c0_579 = arith.constant 0 : index
    %c0_580 = arith.constant 0 : index
    %381 = vector.load %arg5[%c11_578, %c0_579, %c0_580] : memref<16x16x32xf32, #tpu.memory_space<vmem>>, vector<1x16x32xf32>
    %382 = vector.shape_cast %381 : vector<1x16x32xf32> to vector<16x32xf32>
    %cst_581 = arith.constant dense<0.000000e+00> : vector<2x32xf32>
    %383 = tpu.matmul %380, %382, %cst_581 {dimension_numbers = #tpu.dot_dimension_numbers<[1], [0], [0], [1], [0, 0, 1, 1], [], []>} : vector<2x16xf32>, vector<16x32xf32>, vector<2x32xf32> -> vector<2x32xf32>
    %384 = arith.addf %378, %383 : vector<2x32xf32>
    %c0_582 = arith.constant 0 : index
    %c24_583 = arith.constant 24 : index
    %c0_584 = arith.constant 0 : index
    %385 = vector.load %arg13[%c0_582, %c24_583, %c0_584] : memref<2x32x16xf32, #tpu.memory_space<vmem>>, vector<2x1x16xf32>
    %386 = vector.shape_cast %385 : vector<2x1x16xf32> to vector<2x16xf32>
    %c12 = arith.constant 12 : index
    %c0_585 = arith.constant 0 : index
    %c0_586 = arith.constant 0 : index
    %387 = vector.load %arg5[%c12, %c0_585, %c0_586] : memref<16x16x32xf32, #tpu.memory_space<vmem>>, vector<1x16x32xf32>
    %388 = vector.shape_cast %387 : vector<1x16x32xf32> to vector<16x32xf32>
    %cst_587 = arith.constant dense<0.000000e+00> : vector<2x32xf32>
    %389 = tpu.matmul %386, %388, %cst_587 {dimension_numbers = #tpu.dot_dimension_numbers<[1], [0], [0], [1], [0, 0, 1, 1], [], []>} : vector<2x16xf32>, vector<16x32xf32>, vector<2x32xf32> -> vector<2x32xf32>
    %390 = arith.addf %384, %389 : vector<2x32xf32>
    %c0_588 = arith.constant 0 : index
    %c25 = arith.constant 25 : index
    %c0_589 = arith.constant 0 : index
    %391 = vector.load %arg13[%c0_588, %c25, %c0_589] : memref<2x32x16xf32, #tpu.memory_space<vmem>>, vector<2x1x16xf32>
    %392 = vector.shape_cast %391 : vector<2x1x16xf32> to vector<2x16xf32>
    %c13 = arith.constant 13 : index
    %c0_590 = arith.constant 0 : index
    %c0_591 = arith.constant 0 : index
    %393 = vector.load %arg5[%c13, %c0_590, %c0_591] : memref<16x16x32xf32, #tpu.memory_space<vmem>>, vector<1x16x32xf32>
    %394 = vector.shape_cast %393 : vector<1x16x32xf32> to vector<16x32xf32>
    %cst_592 = arith.constant dense<0.000000e+00> : vector<2x32xf32>
    %395 = tpu.matmul %392, %394, %cst_592 {dimension_numbers = #tpu.dot_dimension_numbers<[1], [0], [0], [1], [0, 0, 1, 1], [], []>} : vector<2x16xf32>, vector<16x32xf32>, vector<2x32xf32> -> vector<2x32xf32>
    %396 = arith.addf %390, %395 : vector<2x32xf32>
    %c0_593 = arith.constant 0 : index
    %c26 = arith.constant 26 : index
    %c0_594 = arith.constant 0 : index
    %397 = vector.load %arg13[%c0_593, %c26, %c0_594] : memref<2x32x16xf32, #tpu.memory_space<vmem>>, vector<2x1x16xf32>
    %398 = vector.shape_cast %397 : vector<2x1x16xf32> to vector<2x16xf32>
    %c14 = arith.constant 14 : index
    %c0_595 = arith.constant 0 : index
    %c0_596 = arith.constant 0 : index
    %399 = vector.load %arg5[%c14, %c0_595, %c0_596] : memref<16x16x32xf32, #tpu.memory_space<vmem>>, vector<1x16x32xf32>
    %400 = vector.shape_cast %399 : vector<1x16x32xf32> to vector<16x32xf32>
    %cst_597 = arith.constant dense<0.000000e+00> : vector<2x32xf32>
    %401 = tpu.matmul %398, %400, %cst_597 {dimension_numbers = #tpu.dot_dimension_numbers<[1], [0], [0], [1], [0, 0, 1, 1], [], []>} : vector<2x16xf32>, vector<16x32xf32>, vector<2x32xf32> -> vector<2x32xf32>
    %402 = arith.addf %396, %401 : vector<2x32xf32>
    %c0_598 = arith.constant 0 : index
    %c27 = arith.constant 27 : index
    %c0_599 = arith.constant 0 : index
    %403 = vector.load %arg13[%c0_598, %c27, %c0_599] : memref<2x32x16xf32, #tpu.memory_space<vmem>>, vector<2x1x16xf32>
    %404 = vector.shape_cast %403 : vector<2x1x16xf32> to vector<2x16xf32>
    %c15 = arith.constant 15 : index
    %c0_600 = arith.constant 0 : index
    %c0_601 = arith.constant 0 : index
    %405 = vector.load %arg5[%c15, %c0_600, %c0_601] : memref<16x16x32xf32, #tpu.memory_space<vmem>>, vector<1x16x32xf32>
    %406 = vector.shape_cast %405 : vector<1x16x32xf32> to vector<16x32xf32>
    %cst_602 = arith.constant dense<0.000000e+00> : vector<2x32xf32>
    %407 = tpu.matmul %404, %406, %cst_602 {dimension_numbers = #tpu.dot_dimension_numbers<[1], [0], [0], [1], [0, 0, 1, 1], [], []>} : vector<2x16xf32>, vector<16x32xf32>, vector<2x32xf32> -> vector<2x32xf32>
    %408 = arith.addf %402, %407 : vector<2x32xf32>
    %c0_603 = arith.constant 0 : index
    %c0_604 = arith.constant 0 : index
    %409 = vector.load %arg6[%c0_603, %c0_604] : memref<1x32xf32, #tpu.memory_space<vmem>>, vector<1x32xf32>
    %410 = vector.broadcast %409 : vector<1x32xf32> to vector<2x32xf32>
    %411 = arith.addf %408, %410 : vector<2x32xf32>
    %cst_605 = arith.constant 0.000000e+00 : f32
    %412 = vector.broadcast %cst_605 : f32 to vector<2x32xf32>
    %413 = arith.cmpf oge, %411, %412 : vector<2x32xf32>
    %cst_606 = arith.constant 2.000000e-01 : f32
    %414 = vector.broadcast %cst_606 : f32 to vector<2x32xf32>
    %415 = arith.mulf %414, %411 : vector<2x32xf32>
    %416 = arith.select %413, %411, %415 : vector<2x32xi1>, vector<2x32xf32>
    %c0_607 = arith.constant 0 : index
    %c0_608 = arith.constant 0 : index
    %417 = vector.load %arg7[%c0_607, %c0_608] : memref<32x1xf32, #tpu.memory_space<vmem>>, vector<32x1xf32>
    %cst_609 = arith.constant dense<0.000000e+00> : vector<2x1xf32>
    %418 = tpu.matmul %416, %417, %cst_609 {dimension_numbers = #tpu.dot_dimension_numbers<[1], [0], [0], [1], [0, 0, 1, 1], [], []>} : vector<2x32xf32>, vector<32x1xf32>, vector<2x1xf32> -> vector<2x1xf32>
    %c0_610 = arith.constant 0 : index
    %c0_611 = arith.constant 0 : index
    %419 = vector.load %arg8[%c0_610, %c0_611] : memref<1x1xf32, #tpu.memory_space<vmem>>, vector<1x1xf32>
    %420 = vector.broadcast %419 : vector<1x1xf32> to vector<2x1xf32>
    %421 = arith.addf %418, %420 : vector<2x1xf32>
    %422 = arith.negf %421 : vector<2x1xf32>
    %423 = math.exp %422 : vector<2x1xf32>
    %cst_612 = arith.constant 1.000000e+00 : f32
    %424 = vector.broadcast %cst_612 : f32 to vector<2x1xf32>
    %425 = arith.addf %424, %423 : vector<2x1xf32>
    %426 = arith.divf %424, %425 : vector<2x1xf32>
    %c0_613 = arith.constant 0 : index
    %c0_614 = arith.constant 0 : index
    %427 = vector.load %arg9[%c0_613, %c0_614] : memref<2x1xf32, #tpu.memory_space<vmem>>, vector<2x1xf32>
    tpu.vector_store %arg9[%c0_613, %c0_614], %426 {strides = array<i32>} : memref<2x1xf32, #tpu.memory_space<vmem>>, vector<2x1xf32>,
    return
  }
}

</mosaic_0001>

<bundles_post_ra>
// kernel: discriminator_forward.1
= control target key start
LH: loop header
LB: loop body
LE: loop exit
PB: predicated region body
PF: predicated region fallthrough
CT: control target
= control target key end

     0   :  { %vm119_vm0 = vcmask 1043456   ;;  %vm70_vm1 = vcmask 31744   ;;  %vm1443_vm2 = vcmask 61440   ;;  %s3223_s13 = smov 16   ;;  %vm1426_vm4 = vcmask 64512   ;;  %s3225_s17 = smov 40   ;;  %s4791_s1 = inlined_call_operand.vmem [shape: f32[3,3,4,8], index: 1, kind: input, shape index: {}]   ;;  %s4792_s0 = inlined_call_operand.vmem [shape: f32[4,2,9,9,4], index: 0, kind: input, shape index: {}]   ;;  %s4793_s2 = inlined_call_operand.vmem [shape: f32[1,8], index: 2, kind: input, shape index: {}]   ;;  %s4794_s3 = inlined_call_operand.vmem [shape: f32[72,16], index: 3, kind: input, shape index: {}]   ;;  %s4795_s4 = inlined_call_operand.vmem [shape: f32[1,16], index: 4, kind: input, shape index: {}]   ;;  %s4796_s5 = inlined_call_operand.vmem [shape: f32[16,16,32], index: 5, kind: input, shape index: {}]   ;;  %s4797_s6 = inlined_call_operand.vmem [shape: f32[1,32], index: 6, kind: input, shape index: {}]   ;;  %s4798_s7 = inlined_call_operand.vmem [shape: f32[32,1], index: 7, kind: input, shape index: {}]   ;;  %s4799_s8 = inlined_call_operand.<no memory space> [shape: f32[1,1], index: 8, kind: input, shape index: {}]   ;;  %s4800_s9 = inlined_call_operand.vmem [shape: f32[2,1], index: 9, kind: output, shape index: {}]  }
   0x1   :  { %v2889_v0 = vld [vmem:[%s4791_s1 + $0x4] sm:$0xf]  ;;  %v50_v1 = vld [vmem:[%s4791_s1] sm:$0xf]  ;;  %v2992_v5 = vld [vmem:[%s4791_s1 + $0x10] sm:$0xf] }
   0x2   :  { %v2873_v2 = vld [vmem:[%s4792_s0 + $0x120] sm:$0xff]  ;;  %2890 = vmatpush.msk.msra.mxu0 %vm119_vm0, %v2889_v0  ;;  %3202 = vmatpush.msk.msra.mxu2 %vm119_vm0, %v2889_v0  ;;  %v3310_v6 = vld [vmem:[%s4792_s0 + $0x210] sm:$0xff]  ;;  %v2924_v7 = vld [vmem:[%s4791_s1 + $0x8] sm:$0xf]  ;;  %vm1501_vm6 = vcmask 57344   ;;  %s3226_s18 = smov 56  }
   0x3   :  { %v3294_v3 = vld [vmem:[%s4792_s0 + $0x1e0] sm:$0xff]  ;;  %2907 = vmatpush.msk.msra.mxu1 %vm119_vm0, %v50_v1  ;;  %2891 = vmatmul.msk.f32.vlgmr.msra.gmra.mxu0 %vm70_vm1, %v2873_v2  ;;  %v2958_v8 = vld [vmem:[%s4791_s1 + $0xc] sm:$0xf]  ;;  %v3326_v9 = vld [vmem:[%s4792_s0 + $0x130] sm:$0xff]  ;;  %s3227_s19 = smov 48   ;;  %s3228_s20 = smov 32  }
   0x4   :  { %v34_v4 = vld [vmem:[%s4792_s0] sm:$0xff]  ;;  %2902 = vmatmul.msk.f32.vlgmr.msra.gmra.mxu2 %vm70_vm1, %v3294_v3  ;;  %2993 = vmatpush.msk.msrb.mxu0 %vm119_vm0, %v2992_v5  ;;  %v3332_v10 = vld [vmem:[%s4792_s0 + $0x1f0] sm:$0xff]  ;;  %v3060_v29 = vld [vmem:[%s4791_s1 + $0x18] sm:$0xf]  ;;  %vm1743_vm10 = vcmask 588800   ;;  %s3229_s21 = smov 64  }
   0x5   :  { %2908 = vmatmul.msk.f32.vlgmr.msra.gmra.mxu1 %vm70_vm1, %v34_v4  ;;  %3203 = vmatpush.msk.msra.mxu3 %vm119_vm0, %v2889_v0  ;;  %v3337_v11 = vld [vmem:[%s4792_s0 + $0x10] sm:$0xff]  ;;  %v3344_v12 = vld [vmem:[%s4792_s0 + $0x220] sm:$0xff]  ;;  %v3094_v34 = vld [vmem:[%s4791_s1 + $0x1c] sm:$0xf] }
   0x6   :  { %2905 = vmatmul.msk.f32.vlgmr.msra.gmra.mxu3 %vm70_vm1, %v3310_v6  ;;  %2925 = vmatpush.msk.msrb.mxu2 %vm119_vm0, %v2924_v7  ;;  %v3355_v13 = vld [vmem:[%s4792_s0 + $0x140] sm:$0xff]  ;;  %v3380_v17 = vld [vmem:[%s4792_s0 + $0x150] sm:$0xff] }
   0x7   :  { %2959 = vmatpush.msk.msrb.mxu3 %vm119_vm0, %v2958_v8  ;;  %v3360_v14 = vld [vmem:[%s4792_s0 + $0x200] sm:$0xff]  ;;  %v3385_v18 = vld [vmem:[%s4792_s0 + $0x30] sm:$0xff] }
   0x8   :  { %v3365_v15 = vld [vmem:[%s4792_s0 + $0x20] sm:$0xff]  ;;  %v2943_v20 = vld [vmem:[%s4792_s0 + $0x250] sm:$0xff]  ;;  %3061 = vmatpush.msk.msra.mxu2 %vm119_vm0, %v3060_v29 }
   0x9   :  { %v2942_v16 = vld [vmem:[%s4792_s0 + $0x240] sm:$0xff]  ;;  %v3412_v23 = vld [vmem:[%s4792_s0 + $0x11] sm:$0xff]  ;;  %3095 = vmatpush.msk.msra.mxu3 %vm119_vm0, %v3094_v34 }
   0xa   :  { %v304_v19 = vld [vmem:[%s4792_s0 + $0x1] sm:$0xff]  ;;  %v3427_v25 = vld [vmem:[%s4792_s0 + $0x170] sm:$0xff] }
   0xb   :  { %2892 = vmatmul.msk.f32.gmra.mxu0 %vm70_vm1, %v3326_v9  ;;  %v3402_v21 = vld [vmem:[%s4792_s0 + $0x160] sm:$0xff]  ;;  %v3432_v26 = vld [vmem:[%s4792_s0 + $0x50] sm:$0xff] }
   0xc   :  { %2903 = vmatmul.msk.f32.gmra.mxu2 %vm70_vm1, %v3332_v10  ;;  %v3407_v22 = vld [vmem:[%s4792_s0 + $0x40] sm:$0xff]  ;;  %v2945_v28 = vld [vmem:[%s4792_s0 + $0x270] sm:$0xff] }
   0xd   :  { %2909 = vmatmul.msk.f32.gmra.mxu1 %vm70_vm1, %v3337_v11  ;;  %v2944_v24 = vld [vmem:[%s4792_s0 + $0x260] sm:$0xff]  ;;  %v3466_v32 = vld [vmem:[%s4792_s0 + $0x31] sm:$0xff] }
   0xe   :  { %2906 = vmatmul.msk.f32.gmra.mxu3 %vm70_vm1, %v3344_v12  ;;  %v3437_v27 = vld [vmem:[%s4792_s0 + $0x21] sm:$0xff]  ;;  %v3026_v35 = vld [vmem:[%s4791_s1 + $0x14] sm:$0xf] }
   0xf   :  { %v3456_v30 = vld [vmem:[%s4792_s0 + $0x180] sm:$0xff]  ;;  %3027 = vmatpush.msk.msrb.mxu1 %vm119_vm0, %v3026_v35  ;;  %v3489_v36 = vld [vmem:[%s4792_s0 + $0x190] sm:$0xff] }
  0x10   :  { %v3461_v31 = vld [vmem:[%s4792_s0 + $0x60] sm:$0xff]  ;;  %v3494_v37 = vld [vmem:[%s4792_s0 + $0x70] sm:$0xff] }
  0x11   :  { %v2946_v33 = vld [vmem:[%s4792_s0 + $0x280] sm:$0xff]  ;;  %v2947_v39 = vld [vmem:[%s4792_s0 + $0x290] sm:$0xff] }
  0x12   :  { %v3499_v38 = vld [vmem:[%s4792_s0 + $0x41] sm:$0xff]  ;;  %v2881_v41 = vld [vmem:[%s4792_s0 + $0x1b0] sm:$0xff] }
  0x13   :  { %2893 = vmatmul.msk.f32.gmra.mxu0 %vm70_vm1, %v3355_v13  ;;  %v3128_v40 = vld [vmem:[%s4791_s1 + $0x20] sm:$0xf]  ;;  %v42_v42 = vld [vmem:[%s4792_s0 + $0x90] sm:$0xff]  ;;  %s3222_s1 = smov 8  }
  0x14   :  { %2904 = vmatmul.msk.f32.gmra.mxu2 %vm70_vm1, %v3360_v14  ;;  %3129 = vmatpush.msk.msra.mxu0 %vm119_vm0, %v3128_v40  ;;  %v3524_v43 = vld [vmem:[%s4792_s0 + $0x51] sm:$0xff]  ;;  %v2948_v44 = vld [vmem:[%s4792_s0 + $0x2a0] sm:$0xff] }
  0x15   :  { %2910 = vmatmul.msk.f32.gmra.mxu1 %vm70_vm1, %v3365_v15  ;;  %v3537_v45 = vld [vmem:[%s4792_s0 + $0x1c0] sm:$0xff]  ;;  %v2949_v48 = vld [vmem:[%s4792_s0 + $0x2b0] sm:$0xff] }
  0x16   :  { %2960 = vmatmul.msk.f32.vlgmr.msrb.gmra.mxu3 %vm70_vm1, %v2942_v16  ;;  %v3542_v46 = vld [vmem:[%s4792_s0 + $0xa0] sm:$0xff]  ;;  %v3562_v49 = vld [vmem:[%s4792_s0 + $0x1d0] sm:$0xff] }
  0x17   :  { %v3547_v47 = vld [vmem:[%s4792_s0 + $0x61] sm:$0xff]  ;;  %v3567_v50 = vld [vmem:[%s4792_s0 + $0xb0] sm:$0xff] }
  0x18   :  { %v3572_v51 = vld [vmem:[%s4792_s0 + $0x71] sm:$0xff]  ;;  %v2976_v53 = vld [vmem:[%s4792_s0 + $0x360] sm:$0xff] }
  0x19   :  { %v2950_v52 = vld [vmem:[%s4792_s0 + $0x2d0] sm:$0xff]  ;;  %v3590_v54 = vld [vmem:[%s4792_s0 + $0xc0] sm:$0xff] }
  0x1a   :  { %v312_v55 = vld [vmem:[%s4792_s0 + $0x91] sm:$0xff]  ;;  %v2951_v56 = vld [vmem:[%s4792_s0 + $0x2e0] sm:$0xff] }
  0x1b   :  { %2894 = vmatmul.msk.f32.gmra.mxu0 %vm70_vm1, %v3380_v17  ;;  %v2977_v57 = vld [vmem:[%s4792_s0 + $0x370] sm:$0xff]  ;;  %v3614_v59 = vld [vmem:[%s4792_s0 + $0xa1] sm:$0xff] }
  0x1c   :  { %2926 = vmatmul.msk.f32.vlgmr.msrb.gmra.mxu2 %vm70_vm1, %v304_v19  ;;  %v3609_v58 = vld [vmem:[%s4792_s0 + $0xd0] sm:$0xff]  ;;  %v2978_v61 = vld [vmem:[%s4792_s0 + $0x380] sm:$0xff] }
  0x1d   :  { %2911 = vmatmul.msk.f32.gmra.mxu1 %vm70_vm1, %v3385_v18  ;;  %v2952_v60 = vld [vmem:[%s4792_s0 + $0x2f0] sm:$0xff]  ;;  %v3631_v62 = vld [vmem:[%s4792_s0 + $0xe0] sm:$0xff] }
  0x1e   :  { %2961 = vmatmul.msk.f32.gmra.mxu3 %vm70_vm1, %v2943_v20  ;;  %v3636_v63 = vld [vmem:[%s4792_s0 + $0xb1] sm:$0xff]  ;;  %v2953_v0 = vld [vmem:[%s4792_s0 + $0x300] sm:$0xff] }
  0x1f   :  { %v2979_v1 = vld [vmem:[%s4792_s0 + $0x390] sm:$0xff]  ;;  %v3658_v4 = vld [vmem:[%s4792_s0 + $0xc1] sm:$0xff] }
  0x20   :  { %v3653_v2 = vld [vmem:[%s4792_s0 + $0xf0] sm:$0xff]  ;;  %v2980_v7 = vld [vmem:[%s4792_s0 + $0x3a0] sm:$0xff] }
  0x21   :  { %v2954_v5 = vld [vmem:[%s4792_s0 + $0x310] sm:$0xff]  ;;  %v3675_v8 = vld [vmem:[%s4792_s0 + $0x100] sm:$0xff] }
  0x22   :  { %v3680_v16 = vld [vmem:[%s4792_s0 + $0xd1] sm:$0xff]  ;;  %v2955_v19 = vld [vmem:[%s4792_s0 + $0x320] sm:$0xff] }
  0x23   :  { %2895 = vmatmul.msk.f32.gmra.mxu0 %vm70_vm1, %v3402_v21  ;;  %v3010_v29 = vld [vmem:[%s4792_s0 + $0x241] sm:$0xff]  ;;  %v3718_v40 = vld [vmem:[%s4792_s0 + $0xf1] sm:$0xff] }
  0x24   :  { %2927 = vmatmul.msk.f32.gmra.mxu2 %vm70_vm1, %v3412_v23 }
  0x25   :  { %2912 = vmatmul.msk.f32.gmra.mxu1 %vm70_vm1, %v3407_v22 }
  0x26   :  { %2962 = vmatmul.msk.f32.gmra.mxu3 %vm70_vm1, %v2944_v24  ;;  %v2981_v24 = vld [vmem:[%s4792_s0 + $0x3b0] sm:$0xff] }
  0x2b   :  { %2896 = vmatmul.msk.f32.gmra.mxu0 %vm70_vm1, %v3427_v25 }
  0x2c   :  { %2928 = vmatmul.msk.f32.gmra.mxu2 %vm70_vm1, %v3437_v27 }
  0x2d   :  { %2913 = vmatmul.msk.f32.gmra.mxu1 %vm70_vm1, %v3432_v26 }
  0x2e   :  { %2963 = vmatmul.msk.f32.gmra.mxu3 %vm70_vm1, %v2945_v28  ;;  %v3697_v28 = vld [vmem:[%s4792_s0 + $0xe1] sm:$0xff] }
  0x33   :  { %2897 = vmatmul.msk.f32.gmra.mxu0 %vm70_vm1, %v3456_v30 }
  0x34   :  { %2929 = vmatmul.msk.f32.gmra.mxu2 %vm70_vm1, %v3466_v32 }
  0x35   :  { %2914 = vmatmul.msk.f32.gmra.mxu1 %vm70_vm1, %v3461_v31 }
  0x36   :  { %2964 = vmatmul.msk.f32.gmra.mxu3 %vm70_vm1, %v2946_v33  ;;  %v2956_v33 = vld [vmem:[%s4792_s0 + $0x330] sm:$0xff] }
  0x3b   :  { %2898 = vmatmul.msk.f32.gmra.mxu0 %vm70_vm1, %v3489_v36 }
  0x3c   :  { %2930 = vmatmul.msk.f32.gmra.mxu2 %vm70_vm1, %v3499_v38 }
  0x3d   :  { %2915 = vmatmul.msk.f32.gmra.mxu1 %vm70_vm1, %v3494_v37 }
  0x3e   :  { %2965 = vmatmul.msk.f32.gmra.mxu3 %vm70_vm1, %v2947_v39  ;;  %v2982_v39 = vld [vmem:[%s4792_s0 + $0x3c0] sm:$0xff] }
  0x43   :  { %2899 = vmatmul.msk.f32.gmra.mxu0 %vm70_vm1, %v2881_v41  ;;  %v3011_v41 = vld [vmem:[%s4792_s0 + $0x251] sm:$0xff] }
  0x44   :  { %2931 = vmatmul.msk.f32.gmra.mxu2 %vm70_vm1, %v3524_v43 }
  0x45   :  { %2916 = vmatmul.msk.f32.gmra.mxu1 %vm70_vm1, %v42_v42 }
  0x46   :  { %2966 = vmatmul.msk.f32.gmra.mxu3 %vm70_vm1, %v2948_v44  ;;  %v2957_v44 = vld [vmem:[%s4792_s0 + $0x340] sm:$0xff] }
  0x4b   :  { %2900 = vmatmul.msk.f32.gmra.mxu0 %vm70_vm1, %v3537_v45 }
  0x4c   :  { %2932 = vmatmul.msk.f32.gmra.mxu2 %vm70_vm1, %v3547_v47 }
  0x4d   :  { %2917 = vmatmul.msk.f32.gmra.mxu1 %vm70_vm1, %v3542_v46 }
  0x4e   :  { %2967 = vmatmul.msk.f32.gmra.mxu3 %vm70_vm1, %v2949_v48 }
  0x53   :  { %2901 = vmatmul.msk.f32.gmra.mxu0 %vm70_vm1, %v3562_v49 }
  0x54   :  { %2933 = vmatmul.msk.f32.gmra.mxu2 %vm70_vm1, %v3572_v51 }
  0x55   :  { %2918 = vmatmul.msk.f32.gmra.mxu1 %vm70_vm1, %v3567_v50 }
  0x56   :  { %2968 = vmatmul.msk.f32.gmra.mxu3 %vm70_vm1, %v2950_v52 }
  0x5b   :  { %2994 = vmatmul.msk.f32.vlgmr.msrb.gmra.mxu0 %vm70_vm1, %v2976_v53 }
  0x5c   :  { %2934 = vmatmul.msk.f32.gmra.mxu2 %vm70_vm1, %v312_v55  ;;  %v2983_v55 = vld [vmem:[%s4792_s0 + $0x3d0] sm:$0xff] }
  0x5d   :  { %2919 = vmatmul.msk.f32.gmra.mxu1 %vm70_vm1, %v3590_v54 }
  0x5e   :  { %2969 = vmatmul.msk.f32.gmra.mxu3 %vm70_vm1, %v2951_v56  ;;  %v3741_v56 = vld [vmem:[%s4792_s0 + $0x101] sm:$0xff] }
  0x63   :  { %2995 = vmatmul.msk.f32.gmra.mxu0 %vm70_vm1, %v2977_v57  ;;  %v3012_v57 = vld [vmem:[%s4792_s0 + $0x261] sm:$0xff] }
  0x64   :  { %2935 = vmatmul.msk.f32.gmra.mxu2 %vm70_vm1, %v3614_v59 }
  0x65   :  { %2920 = vmatmul.msk.f32.gmra.mxu1 %vm70_vm1, %v3609_v58 }
  0x66   :  { %2970 = vmatmul.msk.f32.gmra.mxu3 %vm70_vm1, %v2952_v60 }
  0x6b   :  { %2996 = vmatmul.msk.f32.gmra.mxu0 %vm70_vm1, %v2978_v61 }
  0x6c   :  { %2936 = vmatmul.msk.f32.gmra.mxu2 %vm70_vm1, %v3636_v63 }
  0x6d   :  { %2921 = vmatmul.msk.f32.gmra.mxu1 %vm70_vm1, %v3631_v62 }
  0x6e   :  { %2971 = vmatmul.msk.f32.gmra.mxu3 %vm70_vm1, %v2953_v0 }
  0x73   :  { %2997 = vmatmul.msk.f32.gmra.mxu0 %vm70_vm1, %v2979_v1 }
  0x74   :  { %2937 = vmatmul.msk.f32.gmra.mxu2 %vm70_vm1, %v3658_v4 }
  0x75   :  { %2922 = vmatmul.msk.f32.gmra.mxu1 %vm70_vm1, %v3653_v2 }
  0x76   :  { %2972 = vmatmul.msk.f32.gmra.mxu3 %vm70_vm1, %v2954_v5  ;;  %v2984_v5 = vld [vmem:[%s4792_s0 + $0x3f0] sm:$0xff] }
  0x7b   :  { %2998 = vmatmul.msk.f32.gmra.mxu0 %vm70_vm1, %v2980_v7  ;;  %v3013_v7 = vld [vmem:[%s4792_s0 + $0x271] sm:$0xff] }
  0x7c   :  { %2938 = vmatmul.msk.f32.gmra.mxu2 %vm70_vm1, %v3680_v16 }
  0x7d   :  { %2923 = vmatmul.msk.f32.gmra.mxu1 %vm70_vm1, %v3675_v8 }
  0x7e   :  { %2973 = vmatmul.msk.f32.gmra.mxu3 %vm70_vm1, %v2955_v19 }
  0x80   :  { %v140_v20 = vpop.f32.mrf.mxu0 }
  0x82   :  { %v256_v48 = vpop.f32.mrf.mxu1 }
  0x83   :  { %2999 = vmatmul.msk.f32.gmra.mxu0 %vm70_vm1, %v2981_v24 }
  0x84   :  { %2939 = vmatmul.msk.f32.gmra.mxu2 %vm70_vm1, %v3697_v28 }
  0x85   :  { %3028 = vmatmul.msk.f32.vlgmr.msrb.gmra.mxu1 %vm70_vm1, %v3010_v29 }
  0x86   :  { %2974 = vmatmul.msk.f32.gmra.mxu3 %vm70_vm1, %v2956_v33 }
  0x87   :  { %v3710_v34 = vpop.f32.mrf.mxu2 }
  0x88   :  { %v143_v35 = vpop.f32.mrf.mxu0 }
  0x89   :  { %v3723_v42 = vpop.f32.mrf.mxu3 }
  0x8a   :  { %4801 = vst [vmem:[#allocation7_spill] sm:$0xff] %v3723_v42  ;;  %v259_v61 = vpop.f32.mrf.mxu1 }
  0x8b   :  { %3000 = vmatmul.msk.f32.gmra.mxu0 %vm70_vm1, %v2982_v39  ;;  %v2985_v39 = vld [vmem:[%s4792_s0 + $0x400] sm:$0xff] }
  0x8c   :  { %2940 = vmatmul.msk.f32.gmra.mxu2 %vm70_vm1, %v3718_v40 }
  0x8d   :  { %3029 = vmatmul.msk.f32.gmra.mxu1 %vm70_vm1, %v3011_v41 }
  0x8e   :  { %2975 = vmatmul.msk.f32.gmra.mxu3 %vm70_vm1, %v2957_v44  ;;  %v3014_v44 = vld [vmem:[%s4792_s0 + $0x281] sm:$0xff] }
  0x8f   :  { %v3733_v52 = vpop.f32.mrf.mxu2 }
  0x90   :  { %v146_v53 = vpop.f32.mrf.mxu0 }
  0x91   :  { %v3746_v60 = vpop.f32.mrf.mxu3 }
  0x92   :  { %4802 = vst [vmem:[#allocation8_spill] sm:$0xff] %v3746_v60  ;;  %v262_v41 = vpop.f32.mrf.mxu1 }
  0x93   :  { %3001 = vmatmul.msk.f32.gmra.mxu0 %vm70_vm1, %v2983_v55 }
  0x94   :  { %2941 = vmatmul.msk.f32.gmra.mxu2 %vm70_vm1, %v3741_v56 }
  0x95   :  { %3030 = vmatmul.msk.f32.gmra.mxu1 %vm70_vm1, %v3012_v57 }
  0x96   :  { %3096 = vmatmul.msk.f32.vlgmr.msra.gmra.mxu3 %vm70_vm1, %v3326_v9  ;;  %v257_v9 = vadd.f32 %v256_v48, %v140_v20 }
  0x97   :  { %v3754_v0 = vpop.f32.mrf.mxu2 }
  0x98   :  { %v149_v1 = vpop.f32.mrf.mxu0 }
  0x99   :  { %v541_v19 = vpop.f32.mrf.mxu3 }
  0x9b   :  { %3002 = vmatmul.msk.f32.gmra.mxu0 %vm70_vm1, %v2984_v5  ;;  %v2986_v5 = vld [vmem:[%s4792_s0 + $0x410] sm:$0xff] }
  0x9c   :  { %3062 = vmatmul.msk.f32.vlgmr.msra.gmra.mxu2 %vm70_vm1, %v3337_v11  ;;  %v260_v11 = vadd.f32 %v259_v61, %v143_v35 }
  0x9d   :  { %3031 = vmatmul.msk.f32.gmra.mxu1 %vm70_vm1, %v3013_v7  ;;  %v3015_v7 = vld [vmem:[%s4792_s0 + $0x291] sm:$0xff] }
  0x9e   :  { %3097 = vmatmul.msk.f32.gmra.mxu3 %vm70_vm1, %v3355_v13 }
  0x9f   :  { %v390_v24 = vpop.f32.mrf.mxu2 }
  0xa0   :  { %v438_v29 = vadd.f32 %v390_v24, %v257_v9  ;;  %v152_v33 = vpop.f32.mrf.mxu0  ;;  %v265_v24 = vpop.f32.mrf.mxu1 }
  0xa1   :  { %v544_v55 = vpop.f32.mrf.mxu3 }
  0xa2   :  { %v3774_v57 = vadd.f32 %v541_v19, %v438_v29  ;;  %v2987_v29 = vld [vmem:[%s4792_s0 + $0x420] sm:$0xff] }
  0xa3   :  { %3003 = vmatmul.msk.f32.gmra.mxu0 %vm70_vm1, %v2985_v39  ;;  %v3016_v39 = vld [vmem:[%s4792_s0 + $0x2a1] sm:$0xff] }
  0xa4   :  { %3063 = vmatmul.msk.f32.gmra.mxu2 %vm70_vm1, %v3365_v15  ;;  %v263_v15 = vadd.f32 %v262_v41, %v146_v53 }
  0xa5   :  { %3032 = vmatmul.msk.f32.gmra.mxu1 %vm70_vm1, %v3014_v44 }
  0xa6   :  { %3098 = vmatmul.msk.f32.gmra.mxu3 %vm70_vm1, %v3380_v17 }
  0xa7   :  { %v393_v13 = vpop.f32.mrf.mxu2 }
  0xa8   :  { %v439_v20 = vadd.f32 %v393_v13, %v260_v11  ;;  %v155_v48 = vpop.f32.mrf.mxu0  ;;  %v2988_v13 = vld [vmem:[%s4792_s0 + $0x430] sm:$0xff] }
  0xa9   :  { %v547_v19 = vpop.f32.mrf.mxu3 }
  0xaa   :  { %v3788_v9 = vadd.f32 %v544_v55, %v439_v20  ;;  %v3017_v20 = vld [vmem:[%s4792_s0 + $0x2b1] sm:$0xff] }
  0xab   :  { %3004 = vmatmul.msk.f32.gmra.mxu0 %vm70_vm1, %v2986_v5 }
  0xac   :  { %3064 = vmatmul.msk.f32.gmra.mxu2 %vm70_vm1, %v3385_v18  ;;  %v268_v18 = vpop.f32.mrf.mxu1 }
  0xad   :  { %3033 = vmatmul.msk.f32.gmra.mxu1 %vm70_vm1, %v3015_v7 }
  0xae   :  { %3099 = vmatmul.msk.f32.gmra.mxu3 %vm70_vm1, %v3402_v21  ;;  %v266_v21 = vadd.f32 %v265_v24, %v149_v1 }
  0xaf   :  { %v396_v17 = vpop.f32.mrf.mxu2 }
  0xb0   :  { %v440_v35 = vadd.f32 %v396_v17, %v263_v15  ;;  %v158_v61 = vpop.f32.mrf.mxu0  ;;  %v2989_v15 = vld [vmem:[%s4792_s0 + $0x440] sm:$0xff]  ;;  %v3018_v17 = vld [vmem:[%s4792_s0 + $0x2d1] sm:$0xff] }
  0xb1   :  { %v550_v44 = vpop.f32.mrf.mxu3 }
  0xb2   :  { %v3802_v55 = vadd.f32 %v547_v19, %v440_v35 }
  0xb3   :  { %3005 = vmatmul.msk.f32.gmra.mxu0 %vm70_vm1, %v2987_v29 }
  0xb4   :  { %3065 = vmatmul.msk.f32.gmra.mxu2 %vm70_vm1, %v3407_v22  ;;  %v269_v22 = vadd.f32 %v268_v18, %v152_v33 }
  0xb5   :  { %3034 = vmatmul.msk.f32.gmra.mxu1 %vm70_vm1, %v3016_v39 }
  0xb6   :  { %3100 = vmatmul.msk.f32.gmra.mxu3 %vm70_vm1, %v3427_v25  ;;  %v271_v25 = vpop.f32.mrf.mxu1 }
  0xb7   :  { %v399_v53 = vpop.f32.mrf.mxu2 }
  0xb8   :  { %v441_v41 = vadd.f32 %v399_v53, %v266_v21  ;;  %v161_v11 = vpop.f32.mrf.mxu0  ;;  %v3019_v21 = vld [vmem:[%s4792_s0 + $0x2e1] sm:$0xff] }
  0xb9   :  { %v553_v5 = vpop.f32.mrf.mxu3 }
  0xba   :  { %v3816_v7 = vadd.f32 %v550_v44, %v441_v41  ;;  %v2990_v44 = vld [vmem:[%s4792_s0 + $0x450] sm:$0xff] }
  0xbb   :  { %3006 = vmatmul.msk.f32.gmra.mxu0 %vm70_vm1, %v2988_v13 }
  0xbc   :  { %3066 = vmatmul.msk.f32.gmra.mxu2 %vm70_vm1, %v3432_v26 }
  0xbd   :  { %3035 = vmatmul.msk.f32.gmra.mxu1 %vm70_vm1, %v3017_v20 }
  0xbe   :  { %3101 = vmatmul.msk.f32.gmra.mxu3 %vm70_vm1, %v3456_v30  ;;  %v272_v30 = vadd.f32 %v271_v25, %v155_v48  ;;  %v274_v18 = vpop.f32.mrf.mxu1 }
  0xbf   :  { %v402_v1 = vpop.f32.mrf.mxu2  ;;  %v275_v48 = vadd.f32 %v274_v18, %v158_v61 }
  0xc0   :  { %v442_v19 = vadd.f32 %v402_v1, %v269_v22  ;;  %v3824_v24 = vpop.f32.mrf.mxu0  ;;  %v3020_v22 = vld [vmem:[%s4792_s0 + $0x2f1] sm:$0xff] }
  0xc1   :  { %v556_v26 = vpop.f32.mrf.mxu3 }
  0xc2   :  { %v3832_v35 = vadd.f32 %v553_v5, %v442_v19  ;;  %v2991_v5 = vld [vmem:[%s4792_s0 + $0x460] sm:$0xff] }
  0xc3   :  { %3007 = vmatmul.msk.f32.gmra.mxu0 %vm70_vm1, %v2989_v15 }
  0xc4   :  { %3067 = vmatmul.msk.f32.gmra.mxu2 %vm70_vm1, %v3461_v31  ;;  %v3085_v31 = vld [vmem:[%s4792_s0 + $0x1a0] sm:$0xff] }
  0xc5   :  { %3036 = vmatmul.msk.f32.gmra.mxu1 %vm70_vm1, %v3018_v17 }
  0xc6   :  { %3102 = vmatmul.msk.f32.gmra.mxu3 %vm70_vm1, %v3489_v36  ;;  %v277_v61 = vpop.f32.mrf.mxu1 }
  0xc7   :  { %v405_v33 = vpop.f32.mrf.mxu2  ;;  %v278_v1 = vadd.f32 %v277_v61, %v161_v11 }
  0xc8   :  { %v443_v29 = vadd.f32 %v405_v33, %v272_v30  ;;  %v3840_v39 = vpop.f32.mrf.mxu0  ;;  %v3021_v30 = vld [vmem:[%s4792_s0 + $0x301] sm:$0xff] }
  0xc9   :  { %v559_v36 = vpop.f32.mrf.mxu3 }
  0xca   :  { %v3848_v53 = vadd.f32 %v556_v26, %v443_v29  ;;  %v3022_v29 = vld [vmem:[%s4792_s0 + $0x311] sm:$0xff] }
  0xcb   :  { %3008 = vmatmul.msk.f32.gmra.mxu0 %vm70_vm1, %v2990_v44 }
  0xcc   :  { %3068 = vmatmul.msk.f32.gmra.mxu2 %vm70_vm1, %v3494_v37  ;;  %v3051_v37 = vld [vmem:[%s4792_s0 + $0x80] sm:$0xff] }
  0xcd   :  { %3037 = vmatmul.msk.f32.gmra.mxu1 %vm70_vm1, %v3019_v21  ;;  %v3024_v21 = vld [vmem:[%s4792_s0 + $0x331] sm:$0xff] }
  0xce   :  { %3103 = vmatmul.msk.f32.gmra.mxu3 %vm70_vm1, %v3085_v31  ;;  %v3025_v31 = vld [vmem:[%s4792_s0 + $0x341] sm:$0xff] }
  0xcf   :  { %v408_v41 = vpop.f32.mrf.mxu2 }
  0xd0   :  { %v444_v13 = vadd.f32 %v408_v41, %v275_v48  ;;  %v3858_v20 = vpop.f32.mrf.mxu0  ;;  %v3119_v41 = vld [vmem:[%s4792_s0 + $0x81] sm:$0xff] }
  0xd1   :  { %v562_v15 = vpop.f32.mrf.mxu3 }
  0xd2   :  { %v3869_v25 = vadd.f32 %v559_v36, %v444_v13 }
  0xd3   :  { %3009 = vmatmul.msk.f32.gmra.mxu0 %vm70_vm1, %v2991_v5 }
  0xd4   :  { %3069 = vmatmul.msk.f32.gmra.mxu2 %vm70_vm1, %v3051_v37 }
  0xd5   :  { %3038 = vmatmul.msk.f32.gmra.mxu1 %vm70_vm1, %v3020_v22 }
  0xd6   :  { %3104 = vmatmul.msk.f32.gmra.mxu3 %vm70_vm1, %v3537_v45  ;;  %v3890_v45 = vpop.f32.mrf.mxu1 }
  0xd7   :  { %v411_v19 = vpop.f32.mrf.mxu2 }
  0xd8   :  { %v445_v17 = vadd.f32 %v411_v19, %v278_v1  ;;  %v3876_v26 = vpop.f32.mrf.mxu0 }
  0xda   :  { %v3881_v33 = vadd.f32 %v562_v15, %v445_v17 }
  0xdb   :  { %3130 = vmatmul.msk.f32.vlgmr.msra.gmra.mxu0 %vm70_vm1, %v3412_v23  ;;  %v3904_v23 = vpop.f32.mrf.mxu3 }
  0xdc   :  { %3070 = vmatmul.msk.f32.gmra.mxu2 %vm70_vm1, %v3542_v46 }
  0xdd   :  { %3039 = vmatmul.msk.f32.gmra.mxu1 %vm70_vm1, %v3021_v30 }
  0xde   :  { %3105 = vmatmul.msk.f32.gmra.mxu3 %vm70_vm1, %v3562_v49  ;;  %v3023_v49 = vld [vmem:[%s4792_s0 + $0x321] sm:$0xff]  ;;  %v3913_v18 = vpop.f32.mrf.mxu1 }
  0xdf   :  { %v3897_v44 = vpop.f32.mrf.mxu2 }
  0xe0   :  { %v3892_v11 = vpop.f32.mrf.mxu0 }
  0xe3   :  { %3131 = vmatmul.msk.f32.gmra.mxu0 %vm70_vm1, %v3437_v27 }
  0xe4   :  { %3071 = vmatmul.msk.f32.gmra.mxu2 %vm70_vm1, %v3567_v50 }
  0xe5   :  { %3040 = vmatmul.msk.f32.gmra.mxu1 %vm70_vm1, %v3022_v29 }
  0xe6   :  { %3106 = vmatmul.msk.f32.gmra.mxu3 %vm70_vm1, %v3294_v3  ;;  %v3924_v3 = vpop.f32.mrf.mxu3 }
  0xe7   :  { %v3917_v27 = vpop.f32.mrf.mxu2 }
  0xe8   :  { %v3908_v46 = vpop.f32.mrf.mxu0 }
  0xeb   :  { %3132 = vmatmul.msk.f32.gmra.mxu0 %vm70_vm1, %v3466_v32  ;;  %v3933_v32 = vpop.f32.mrf.mxu1 }
  0xec   :  { %3072 = vmatmul.msk.f32.gmra.mxu2 %vm70_vm1, %v3590_v54 }
  0xed   :  { %3041 = vmatmul.msk.f32.gmra.mxu1 %vm70_vm1, %v3023_v49 }
  0xee   :  { %3107 = vmatmul.msk.f32.gmra.mxu3 %vm70_vm1, %v3332_v10  ;;  %v3947_v36 = vpop.f32.mrf.mxu3 }
  0xef   :  { %v3938_v54 = vpop.f32.mrf.mxu2 }
  0xf0   :  { %v3926_v50 = vpop.f32.mrf.mxu0 }
  0xf3   :  { %3133 = vmatmul.msk.f32.gmra.mxu0 %vm70_vm1, %v3499_v38  ;;  %v3954_v38 = vpop.f32.mrf.mxu1 }
  0xf4   :  { %3073 = vmatmul.msk.f32.gmra.mxu2 %vm70_vm1, %v3609_v58 }
  0xf5   :  { %3042 = vmatmul.msk.f32.gmra.mxu1 %vm70_vm1, %v3024_v21 }
  0xf6   :  { %3108 = vmatmul.msk.f32.gmra.mxu3 %vm70_vm1, %v3360_v14  ;;  %v3964_v48 = vpop.f32.mrf.mxu3 }
  0xf7   :  { %v3958_v14 = vpop.f32.mrf.mxu2 }
  0xf8   :  { %v3942_v10 = vpop.f32.mrf.mxu0 }
  0xfb   :  { %3134 = vmatmul.msk.f32.gmra.mxu0 %vm70_vm1, %v3524_v43  ;;  %v3970_v43 = vpop.f32.mrf.mxu1 }
  0xfc   :  { %3074 = vmatmul.msk.f32.gmra.mxu2 %vm70_vm1, %v3631_v62 }
  0xfd   :  { %3043 = vmatmul.msk.f32.gmra.mxu1 %vm70_vm1, %v3025_v31 }
  0xfe   :  { %3109 = vmatmul.msk.f32.gmra.mxu3 %vm70_vm1, %v3310_v6 }
  0xff   :  { %v3974_v6 = vpop.f32.mrf.mxu2 }
 0x100   :  { %v3960_v58 = vpop.f32.mrf.mxu0 }
 0x103   :  { %3135 = vmatmul.msk.f32.gmra.mxu0 %vm70_vm1, %v3547_v47  ;;  %v3093_v47 = vld [vmem:[%s4792_s0 + $0x230] sm:$0xff]  ;;  %v3994_v13 = vpop.f32.mrf.mxu1 }
 0x104   :  { %3075 = vmatmul.msk.f32.gmra.mxu2 %vm70_vm1, %v3653_v2  ;;  %v3983_v2 = vpop.f32.mrf.mxu3 }
 0x106   :  { %3110 = vmatmul.msk.f32.gmra.mxu3 %vm70_vm1, %v3344_v12 }
 0x107   :  { %v3997_v5 = vpop.f32.mrf.mxu2 }
 0x108   :  { %v3972_v62 = vpop.f32.mrf.mxu0 }
 0x10b   :  { %3136 = vmatmul.msk.f32.gmra.mxu0 %vm70_vm1, %v3572_v51  ;;  %v3059_v51 = vld [vmem:[%s4792_s0 + $0x110] sm:$0xff]  ;;  %v4006_v37 = vpop.f32.mrf.mxu1 }
 0x10c   :  { %3076 = vmatmul.msk.f32.gmra.mxu2 %vm70_vm1, %v3675_v8  ;;  %v4000_v8 = vpop.f32.mrf.mxu3  ;;  %4804 = vst [vmem:[#allocation10_spill] sm:$0xff] %v4006_v37 }
 0x10d   :  { %4803 = vst [vmem:[#allocation9_spill] sm:$0xff] %v4000_v8 }
 0x10e   :  { %3111 = vmatmul.msk.f32.gmra.mxu3 %vm70_vm1, %v3093_v47  ;;  %v3221_v47 = vmov 0.0  }
 0x10f   :  { %v4008_v61 = vpop.f32.mrf.mxu2  ;;  %1464 = vst.msk [vmem:[#allocation3 + $0xa0] sm:$0x1f] %vm1443_vm2, %v3221_v47 }
 0x110   :  { %v3986_v12 = vpop.f32.mrf.mxu0  ;;  %4805 = vst [vmem:[#allocation11_spill] sm:$0xff] %v4008_v61 }
 0x111   :  { %1444 = vst.msk [vmem:[#allocation3] sm:$0x1f] %vm1443_vm2, %v3221_v47 }
 0x112   :  { %1445 = vst.msk [vmem:[#allocation3 + $0x8] sm:$0x1f] %vm1443_vm2, %v3221_v47 }
 0x113   :  { %3137 = vmatmul.msk.f32.gmra.mxu0 %vm70_vm1, %v3119_v41  ;;  %v4016_v15 = vpop.f32.mrf.mxu1  ;;  %1446 = vst.msk [vmem:[#allocation3 + $0x10] sm:$0x1f] %vm1443_vm2, %v3221_v47 }
 0x114   :  { %3077 = vmatmul.msk.f32.gmra.mxu2 %vm70_vm1, %v3059_v51  ;;  %v4012_v19 = vpop.f32.mrf.mxu3  ;;  %4807 = vst [vmem:[#allocation13_spill] sm:$0xff] %v4016_v15 }
 0x115   :  { %4806 = vst [vmem:[#allocation12_spill] sm:$0xff] %v4012_v19  ;;  %v3127_v19 = vld [vmem:[%s4792_s0 + $0x111] sm:$0xff] }
 0x116   :  { %1447 = vst.msk [vmem:[#allocation3 + $0x18] sm:$0x1f] %vm1443_vm2, %v3221_v47 }
 0x117   :  { %v4018_v17 = vpop.f32.mrf.mxu2  ;;  %1448 = vst.msk [vmem:[#allocation3 + $0x20] sm:$0x1f] %vm1443_vm2, %v3221_v47 }
 0x118   :  { %v4002_v22 = vpop.f32.mrf.mxu0  ;;  %4808 = vst [vmem:[#allocation14_spill] sm:$0xff] %v4018_v17 }
 0x119   :  { %1449 = vst.msk [vmem:[#allocation3 + $0x28] sm:$0x1f] %vm1443_vm2, %v3221_v47 }
 0x11a   :  { %1450 = vst.msk [vmem:[#allocation3 + $0x30] sm:$0x1f] %vm1443_vm2, %v3221_v47 }
 0x11b   :  { %3138 = vmatmul.msk.f32.gmra.mxu0 %vm70_vm1, %v3614_v59  ;;  %v842_v29 = vpop.f32.mrf.mxu1  ;;  %1451 = vst.msk [vmem:[#allocation3 + $0x38] sm:$0x1f] %vm1443_vm2, %v3221_v47 }
 0x11c   :  { %v4024_v59 = vpop.f32.mrf.mxu3  ;;  %1452 = vst.msk [vmem:[#allocation3 + $0x40] sm:$0x1f] %vm1443_vm2, %v3221_v47 }
 0x11d   :  { %4809 = vst [vmem:[#allocation15_spill] sm:$0xff] %v4024_v59 }
 0x11e   :  { %1454 = vst.msk [vmem:[#allocation3 + $0x50] sm:$0x1f] %vm1443_vm2, %v3221_v47 }
 0x11f   :  { %v993_v21 = vpop.f32.mrf.mxu2  ;;  %1455 = vst.msk [vmem:[#allocation3 + $0x58] sm:$0x1f] %vm1443_vm2, %v3221_v47 }
 0x120   :  { %v4010_v1 = vpop.f32.mrf.mxu0  ;;  %1456 = vst.msk [vmem:[#allocation3 + $0x60] sm:$0x1f] %vm1443_vm2, %v3221_v47 }
 0x121   :  { %1457 = vst.msk [vmem:[#allocation3 + $0x68] sm:$0x1f] %vm1443_vm2, %v3221_v47 }
 0x122   :  { %1458 = vst.msk [vmem:[#allocation3 + $0x70] sm:$0x1f] %vm1443_vm2, %v3221_v47 }
 0x123   :  { %3139 = vmatmul.msk.f32.gmra.mxu0 %vm70_vm1, %v3636_v63  ;;  %v845_v41 = vpop.f32.mrf.mxu1  ;;  %1459 = vst.msk [vmem:[#allocation3 + $0x78] sm:$0x1f] %vm1443_vm2, %v3221_v47 }
 0x124   :  { %v1144_v31 = vpop.f32.mrf.mxu3  ;;  %1460 = vst.msk [vmem:[#allocation3 + $0x80] sm:$0x1f] %vm1443_vm2, %v3221_v47 }
 0x125   :  { %1461 = vst.msk [vmem:[#allocation3 + $0x88] sm:$0x1f] %vm1443_vm2, %v3221_v47  ;;  %v1829_v61 = vld [vmem:[#allocation3 + $0x51] sm:$0xf] }
 0x126   :  { %1462 = vst.msk [vmem:[#allocation3 + $0x90] sm:$0x1f] %vm1443_vm2, %v3221_v47 }
 0x127   :  { %1465 = vst.msk [vmem:[#allocation3 + $0xa8] sm:$0x1f] %vm1443_vm2, %v3221_v47 }
 0x128   :  { %v4020_v30 = vpop.f32.mrf.mxu0  ;;  %1466 = vst.msk [vmem:[#allocation3 + $0xb0] sm:$0x1f] %vm1443_vm2, %v3221_v47 }
 0x129   :  { %1467 = vst.msk [vmem:[#allocation3 + $0xb8] sm:$0x1f] %vm1443_vm2, %v3221_v47 }
 0x12a   :  { %1468 = vst.msk [vmem:[#allocation3 + $0xc0] sm:$0x1f] %vm1443_vm2, %v3221_v47 }
 0x12b   :  { %3140 = vmatmul.msk.f32.gmra.mxu0 %vm70_vm1, %v3658_v4  ;;  %v996_v4 = vpop.f32.mrf.mxu2  ;;  %v4061_v59 = vpop.f32.mrf.mxu1  ;;  %1469 = vst.msk [vmem:[#allocation3 + $0xc8] sm:$0x1f] %vm1443_vm2, %v3221_v47 }
 0x12c   :  { %1470 = vst.msk [vmem:[#allocation3 + $0xd0] sm:$0x1f] %vm1443_vm2, %v3221_v47 }
 0x12d   :  { %1471 = vst.msk [vmem:[#allocation3 + $0xd8] sm:$0x1f] %vm1443_vm2, %v3221_v47 }
 0x12e   :  { %1472 = vst.msk [vmem:[#allocation3 + $0xe0] sm:$0x1f] %vm1443_vm2, %v3221_v47 }
 0x12f   :  { %1474 = vst.msk [vmem:[#allocation3 + $0xf0] sm:$0x1f] %vm1443_vm2, %v3221_v47 }
 0x130   :  { %v4026_v49 = vpop.f32.mrf.mxu0  ;;  %1475 = vst.msk [vmem:[#allocation3 + $0xf8] sm:$0x1f] %vm1443_vm2, %v3221_v47 }
 0x131   :  { %1476 = vst.msk [vmem:[#allocation3 + $0x100] sm:$0x1f] %vm1443_vm2, %v3221_v47 }
 0x132   :  { %1477 = vst.msk [vmem:[#allocation3 + $0x108] sm:$0x1f] %vm1443_vm2, %v3221_v47 }
 0x133   :  { %3141 = vmatmul.msk.f32.gmra.mxu0 %vm70_vm1, %v3680_v16  ;;  %v4048_v16 = vpop.f32.mrf.mxu3  ;;  %v4067_v17 = vpop.f32.mrf.mxu2  ;;  %1478 = vst.msk [vmem:[#allocation3 + $0x110] sm:$0x1f] %vm1443_vm2, %v3221_v47 }
 0x134   :  { %1479 = vst.msk [vmem:[#allocation3 + $0x118] sm:$0x1f] %vm1443_vm2, %v3221_v47 }
 0x135   :  { %1480 = vst.msk [vmem:[#allocation3 + $0x120] sm:$0x1f] %vm1443_vm2, %v3221_v47 }
 0x136   :  { %1481 = vst.msk [vmem:[#allocation3 + $0x128] sm:$0x1f] %vm1443_vm2, %v3221_v47 }
 0x137   :  { %1482 = vst.msk [vmem:[#allocation3 + $0x130] sm:$0x1f] %vm1443_vm2, %v3221_v47 }
 0x138   :  { %v4030_v63 = vpop.f32.mrf.mxu0  ;;  %1748 = vst.msk [vmem:[#allocation4 + $0x20] sm:$0xff] %vm1743_vm10, %v3221_v47 }
 0x139   :  { %1744 = vst.msk [vmem:[#allocation4] sm:$0xff] %vm1743_vm10, %v3221_v47 }
 0x13a   :  { %1745 = vst.msk [vmem:[#allocation4 + $0x8] sm:$0xff] %vm1743_vm10, %v3221_v47 }
 0x13b   :  { %3142 = vmatmul.msk.f32.gmra.mxu0 %vm70_vm1, %v3697_v28  ;;  %v1776_v28 = vld [vmem:[#allocation3 + $0xa0] sm:$0xf]  ;;  %v4080_v15 = vpop.f32.mrf.mxu3  ;;  %v4098_v60 = vpop.f32.mrf.mxu2  ;;  %1746 = vst.msk [vmem:[#allocation4 + $0x10] sm:$0xff] %vm1743_vm10, %v3221_v47 }
 0x13c   :  { %1780 = vrot.lane.b32.xlu0 %v1776_v28, %s3222_s1  ;;  %1747 = vst.msk [vmem:[#allocation4 + $0x18] sm:$0xff] %vm1743_vm10, %v3221_v47 }
 0x13d   :  { %1749 = vst.msk [vmem:[#allocation4 + $0x28] sm:$0xff] %vm1743_vm10, %v3221_v47 }
 0x13e   :  { %1750 = vst.msk [vmem:[#allocation4 + $0x30] sm:$0xff] %vm1743_vm10, %v3221_v47 }
 0x13f   :  { %1751 = vst.msk [vmem:[#allocation4 + $0x38] sm:$0xff] %vm1743_vm10, %v3221_v47 }
 0x140   :  { %v4050_v51 = vpop.f32.mrf.mxu0 }
 0x141   :  { %4810 = vst [vmem:[#allocation16_spill] sm:$0xff] %v4050_v51 }
 0x143   :  { %3143 = vmatmul.msk.f32.gmra.mxu0 %vm70_vm1, %v3718_v40  ;;  %v1828_v40 = vld [vmem:[#allocation3 + $0x1] sm:$0xf] }
 0x144   :  { %1832 = vrot.lane.b32.xlu0 %v1828_v40, %s3223_s13  ;;  %v740_v40 = vadd.f32 %v3876_v26, %v3774_v57  ;;  %v4115_v26 = vpop.f32.mrf.mxu3 }
 0x146   :  { %v890_v51 = vadd.f32 %v842_v29, %v740_v40 }
 0x148   :  { %v4073_v28 = vpop.f32.mrf.mxu0  ;;  %v1041_v57 = vadd.f32 %v993_v21, %v890_v51  ;;  %v4126_v21 = vld [vmem:[%s4793_s2] ss:$0 sm:$0xff]  ;;  %s3224_s2 = smov 24  }
 0x149   :  { %4811 = vst [vmem:[#allocation17_spill] sm:$0xff] %v4073_v28  ;;  %v4090_v28 = vpop.f32.mrf.mxu1 }
 0x14a   :  { %v1192_v29 = vadd.f32 %v1144_v31, %v1041_v57 }
 0x14b   :  { %3144 = vmatmul.msk.f32.gmra.mxu0 %vm70_vm1, %v3741_v56 }
 0x14c   :  { %1834 = vrot.lane.b32.xlu0 %v1829_v61, %s3223_s13  ;;  %v741_v61 = vadd.f32 %v3892_v11, %v3788_v9  ;;  %v4136_v9 = vpop.f32.mrf.mxu2  ;;  %v4147_v57 = vpop.f32.mrf.mxu3 }
 0x14e   :  { %v891_v40 = vadd.f32 %v845_v41, %v741_v61 }
 0x150   :  { %v4100_v56 = vpop.f32.mrf.mxu0  ;;  %v1042_v11 = vadd.f32 %v996_v4, %v891_v40  ;;  %v1777_v4 = vld [vmem:[#allocation3 + $0xf0] sm:$0xf] }
 0x151   :  { %4812 = vst [vmem:[#allocation18_spill] sm:$0xff] %v4100_v56  ;;  %1782 = vrot.lane.b32.xlu2 %v1777_v4, %s3222_s1 }
 0x152   :  { %v1193_v61 = vadd.f32 %v4048_v16, %v1042_v11  ;;  %v743_v11 = vadd.f32 %v3926_v50, %v3816_v7 }
 0x153   :  { %3145 = vmatmul.msk.f32.gmra.mxu0 %vm70_vm1, %v3127_v19  ;;  %v4130_v19 = vpop.f32.mrf.mxu1 }
 0x158   :  { %v1294_v51 = vpop.f32.mrf.mxu0 }
 0x159   :  { %v1342_v56 = vadd.f32 %v1294_v51, %v1192_v29 }
 0x15b   :  { %v1362_v31 = vadd.f32 %v4126_v21, %v1342_v56  ;;  %v742_v56 = vadd.f32 %v3908_v46, %v3802_v55  ;;  %v4159_v42 = vpop.f32.mrf.mxu1  ;;  %v4163_v46 = vpop.f32.mrf.mxu2 }
 0x15d   :  { %vm1378_vm3 = vcmp.ge.f32.partialorder %v1362_v31, 0.0  ;;  %v1394_v41 = vmul.f32 0.2, %v1362_v31  ;;  %v892_v40 = vadd.f32 %v4061_v59, %v742_v56  ;;  %v4168_v56 = vpop.f32.mrf.mxu3 }
 0x15f   :  { %v1410_v29 = vsel %vm1378_vm3, %v1362_v31, %v1394_v41  ;;  %v1043_v8 = vadd.f32 %v4067_v17, %v892_v40  ;;  %vm1754_vm3 = vcmask 60416  }
 0x160   :  { %1427 = vst.msk [vmem:[#allocation2] sm:$0xff] %vm1426_vm4, %v1410_v29  ;;  %v1297_v51 = vpop.f32.mrf.mxu0 }
 0x161   :  { %v1343_v37 = vadd.f32 %v1297_v51, %v1193_v61  ;;  %v1194_v31 = vadd.f32 %v4080_v15, %v1043_v8 }
 0x163   :  { %v1363_v55 = vadd.f32 %v4126_v21, %v1343_v37  ;;  %v893_v37 = vadd.f32 %v4090_v28, %v743_v11  ;;  %v4177_v40 = vpop.f32.mrf.mxu1 }
 0x165   :  { %vm1379_vm5 = vcmp.ge.f32.partialorder %v1363_v55, 0.0  ;;  %v1395_v16 = vmul.f32 0.2, %v1363_v55  ;;  %v1044_v50 = vadd.f32 %v4098_v60, %v893_v37  ;;  %v744_v60 = vadd.f32 %v3942_v10, %v3832_v35 }
 0x167   :  { %v1411_v41 = vsel %vm1379_vm5, %v1363_v55, %v1395_v16  ;;  %v1484_v4 = vld [vmem:[#allocation2 + $0x1] sm:$0x1]  ;;  %v1518_v59 = vld [vmem:[#allocation2 + $0x3] sm:$0x1]  ;;  %v1550_v61 = vld [vmem:[#allocation2 + $0x5] sm:$0x1]  ;;  %v4181_v55 = vpop.f32.mrf.mxu2  ;;  %v1195_v16 = vadd.f32 %v4115_v26, %v1044_v50 }
 0x168   :  { %1428 = vst.msk [vmem:[#allocation2 + $0x8] sm:$0xff] %vm1426_vm4, %v1411_v41  ;;  %v1300_v17 = vpop.f32.mrf.mxu0  ;;  %v1582_v51 = vld [vmem:[#allocation2 + $0x7] sm:$0x1]  ;;  %v1614_v7 = vld [vmem:[#allocation2] sm:$0x1]  ;;  %vm1786_vm5 = vcmask 126016  }
 0x169   :  { %v1344_v29 = vadd.f32 %v1300_v17, %v1194_v31  ;;  %1502 = vst.msk [vmem:[#allocation3 + $0x9] sm:$0x1] %vm1501_vm6, %v1484_v4  ;;  %v1647_v15 = vld [vmem:[#allocation2 + $0x2] sm:$0x1]  ;;  %v894_v17 = vadd.f32 %v4130_v19, %v744_v60 }
 0x16a   :  { %1534 = vst.msk [vmem:[#allocation3 + $0xa] sm:$0x1] %vm1501_vm6, %v1518_v59 }
 0x16b   :  { %v1364_v8 = vadd.f32 %v4126_v21, %v1344_v29  ;;  %1566 = vst.msk [vmem:[#allocation3 + $0xb] sm:$0x1] %vm1501_vm6, %v1550_v61  ;;  %v4190_v29 = vpop.f32.mrf.mxu3  ;;  %v1045_v10 = vadd.f32 %v4136_v9, %v894_v17  ;;  %v4200_v9 = vpop.f32.mrf.mxu1 }
 0x16c   :  { %1598 = vst.msk [vmem:[#allocation3 + $0xc] sm:$0x1] %vm1501_vm6, %v1582_v51 }
 0x16d   :  { %vm1380_vm7 = vcmp.ge.f32.partialorder %v1364_v8, 0.0  ;;  %v1396_v28 = vmul.f32 0.2, %v1364_v8  ;;  %1631 = vst.msk [vmem:[#allocation3 + $0xa8] sm:$0x1] %vm1501_vm6, %v1614_v7  ;;  %v1196_v60 = vadd.f32 %v4147_v57, %v1045_v10 }
 0x16e   :  { %1663 = vst.msk [vmem:[#allocation3 + $0xa9] sm:$0x1] %vm1501_vm6, %v1647_v15  ;;  %v1679_v15 = vld [vmem:[#allocation2 + $0x4] sm:$0x1] }
 0x16f   :  { %v1412_v11 = vsel %vm1380_vm7, %v1364_v8, %v1396_v28  ;;  %v1615_v31 = vld [vmem:[#allocation2 + $0x8] sm:$0x1]  ;;  %v1648_v41 = vld [vmem:[#allocation2 + $0xa] sm:$0x1]  ;;  %v1680_v59 = vld [vmem:[#allocation2 + $0xc] sm:$0x1]  ;;  %v745_v28 = vadd.f32 %v3960_v58, %v3848_v53 }
 0x170   :  { %1429 = vst.msk [vmem:[#allocation2 + $0x10] sm:$0xff] %vm1426_vm4, %v1412_v11  ;;  %v1303_v4 = vpop.f32.mrf.mxu0  ;;  %v1712_v37 = vld [vmem:[#allocation2 + $0xe] sm:$0x1]  ;;  %v1485_v35 = vld [vmem:[#allocation2 + $0x9] sm:$0x1] }
 0x171   :  { %v1345_v61 = vadd.f32 %v1303_v4, %v1195_v16  ;;  %1632 = vst.msk [vmem:[#allocation3 + $0xb0] sm:$0x1] %vm1501_vm6, %v1615_v31  ;;  %v1519_v19 = vld [vmem:[#allocation2 + $0xb] sm:$0x1]  ;;  %v1551_v50 = vld [vmem:[#allocation2 + $0xd] sm:$0x1]  ;;  %v4207_v31 = vpop.f32.mrf.mxu2 }
 0x172   :  { %v1877_v51 = vld [vmem:[#allocation3 + $0x8] sm:$0xf]  ;;  %1664 = vst.msk [vmem:[#allocation3 + $0xb1] sm:$0x1] %vm1501_vm6, %v1648_v41  ;;  %v1711_v11 = vld [vmem:[#allocation2 + $0x6] sm:$0x1] }
 0x173   :  { %v1365_v26 = vadd.f32 %v4126_v21, %v1345_v61  ;;  %v1981_v7 = vld [vmem:[#allocation3 + $0x9] sm:$0xf]  ;;  %1881 = vrot.lane.b32.xlu1 %v1877_v51, %s3224_s2  ;;  %1696 = vst.msk [vmem:[#allocation3 + $0xb2] sm:$0x1] %vm1501_vm6, %v1680_v59  ;;  %v1583_v4 = vld [vmem:[#allocation2 + $0xf] sm:$0x1]  ;;  %v895_v59 = vadd.f32 %v4159_v42, %v745_v28 }
 0x174   :  { %1985 = vrot.lane.b32.xlu2 %v1981_v7, %s3225_s17  ;;  %1728 = vst.msk [vmem:[#allocation3 + $0xb3] sm:$0x1] %vm1501_vm6, %v1712_v37  ;;  %v746_v7 = vadd.f32 %v3972_v62, %v3869_v25 }
 0x175   :  { %vm1381_vm8 = vcmp.ge.f32.partialorder %v1365_v26, 0.0  ;;  %v1397_v8 = vmul.f32 0.2, %v1365_v26  ;;  %1503 = vst.msk [vmem:[#allocation3 + $0x11] sm:$0x1] %vm1501_vm6, %v1485_v35  ;;  %v1046_v58 = vadd.f32 %v4163_v46, %v895_v59  ;;  %v4216_v35 = vpop.f32.mrf.mxu3 }
 0x176   :  { %1535 = vst.msk [vmem:[#allocation3 + $0x12] sm:$0x1] %vm1501_vm6, %v1519_v19 }
 0x177   :  { %v1413_v16 = vsel %vm1381_vm8, %v1365_v26, %v1397_v8  ;;  %1567 = vst.msk [vmem:[#allocation3 + $0x13] sm:$0x1] %vm1501_vm6, %v1551_v50  ;;  %v1486_v61 = vld [vmem:[#allocation2 + $0x11] sm:$0x1]  ;;  %v1520_v53 = vld [vmem:[#allocation2 + $0x13] sm:$0x1]  ;;  %v1197_v19 = vadd.f32 %v4168_v56, %v1046_v58 }
 0x178   :  { %1430 = vst.msk [vmem:[#allocation2 + $0x18] sm:$0xff] %vm1426_vm4, %v1413_v16  ;;  %v1306_v41 = vpop.f32.mrf.mxu0  ;;  %v1552_v51 = vld [vmem:[#allocation2 + $0x15] sm:$0x1]  ;;  %v1584_v42 = vld [vmem:[#allocation2 + $0x17] sm:$0x1]  ;;  %v896_v16 = vadd.f32 %v4177_v40, %v746_v7 }
 0x179   :  { %v1346_v17 = vadd.f32 %v1306_v41, %v1196_v60  ;;  %1695 = vst.msk [vmem:[#allocation3 + $0xaa] sm:$0x1] %vm1501_vm6, %v1679_v15  ;;  %v1616_v46 = vld [vmem:[#allocation2 + $0x10] sm:$0x1]  ;;  %v1649_v8 = vld [vmem:[#allocation2 + $0x12] sm:$0x1]  ;;  %v4227_v15 = vpop.f32.mrf.mxu1  ;;  %v4232_v62 = vpop.f32.mrf.mxu2 }
 0x17a   :  { %1727 = vst.msk [vmem:[#allocation3 + $0xab] sm:$0x1] %vm1501_vm6, %v1711_v11  ;;  %v1681_v60 = vld [vmem:[#allocation2 + $0x14] sm:$0x1]  ;;  %v1713_v25 = vld [vmem:[#allocation2 + $0x16] sm:$0x1]  ;;  %v1047_v56 = vadd.f32 %v4181_v55, %v896_v16  ;;  %v281_v55 = vadd.f32 %v3890_v45, %v3824_v24 }
 0x17b   :  { %v1366_v57 = vadd.f32 %v4126_v21, %v1346_v17  ;;  %v2080_v37 = vld [vmem:[#allocation3 + $0xb0] sm:$0xf]  ;;  %1599 = vst.msk [vmem:[#allocation3 + $0x14] sm:$0x1] %vm1501_vm6, %v1583_v4 }
 0x17c   :  { %2084 = vrot.lane.b32.xlu0 %v2080_v37, %s3226_s18  ;;  %1504 = vst.msk [vmem:[#allocation3 + $0x19] sm:$0x1] %vm1501_vm6, %v1486_v61  ;;  %v1790_v58 = vld [vmem:[#allocation3 + $0xb0] sm:$0xf]  ;;  %v747_v37 = vadd.f32 %v3986_v12, %v3881_v33 }
 0x17d   :  { %vm1382_vm9 = vcmp.ge.f32.partialorder %v1366_v57, 0.0  ;;  %v1398_v10 = vmul.f32 0.2, %v1366_v57  ;;  %1536 = vst.msk [vmem:[#allocation3 + $0x1a] sm:$0x1] %vm1501_vm6, %v1520_v53  ;;  %v4245_v53 = vpop.f32.mrf.mxu3 }
 0x17e   :  { %v2030_v26 = vld [vmem:[#allocation3 + $0x10] sm:$0xf]  ;;  %1568 = vst.msk [vmem:[#allocation3 + $0x1b] sm:$0x1] %vm1501_vm6, %v1552_v51  ;;  %v1198_v51 = vadd.f32 %v4190_v29, %v1047_v56 }
 0x17f   :  { %v1414_v50 = vsel %vm1382_vm9, %v1366_v57, %v1398_v10  ;;  %2034 = vrot.lane.b32.xlu2 %v2030_v26, %s3227_s19  ;;  %1600 = vst.msk [vmem:[#allocation3 + $0x1c] sm:$0x1] %vm1501_vm6, %v1584_v42  ;;  %v1487_v40 = vld [vmem:[#allocation2 + $0x19] sm:$0x1]  ;;  %v1521_v17 = vld [vmem:[#allocation2 + $0x1b] sm:$0x1]  ;;  %v446_v26 = vadd.f32 %v3897_v44, %v281_v55 }
 0x180   :  { %1431 = vst.msk [vmem:[#allocation2 + $0x20] sm:$0xff] %vm1426_vm4, %v1414_v50  ;;  %v1309_v28 = vpop.f32.mrf.mxu0  ;;  %v1553_v57 = vld [vmem:[#allocation2 + $0x1d] sm:$0x1]  ;;  %v1585_v10 = vld [vmem:[#allocation2 + $0x1f] sm:$0x1] }
 0x181   :  { %v1929_v11 = vld [vmem:[#allocation3 + $0xa8] sm:$0xf]  ;;  %v1347_v41 = vadd.f32 %v1309_v28, %v1197_v19  ;;  %1633 = vst.msk [vmem:[#allocation3 + $0xb8] sm:$0x1] %vm1501_vm6, %v1616_v46  ;;  %v1617_v45 = vld [vmem:[#allocation2 + $0x18] sm:$0x1]  ;;  %v897_v46 = vadd.f32 %v4200_v9, %v747_v37  ;;  %v4257_v12 = vpop.f32.mrf.mxu1  ;;  %v4264_v28 = vpop.f32.mrf.mxu2  ;;  %v597_v16 = vadd.f32 %v3904_v23, %v446_v26 }
 0x182   :  { %1933 = vrot.lane.b32.xlu1 %v1929_v11, %s3228_s20  ;;  %1665 = vst.msk [vmem:[#allocation3 + $0xb9] sm:$0x1] %vm1501_vm6, %v1649_v8  ;;  %v1841_v59 = vld [vmem:[#allocation3 + $0x11] sm:$0xf]  ;;  %v1650_v33 = vld [vmem:[#allocation2 + $0x1a] sm:$0x1] }
 0x183   :  { %v1367_v4 = vadd.f32 %v4126_v21, %v1347_v41  ;;  %1697 = vst.msk [vmem:[#allocation3 + $0xba] sm:$0x1] %vm1501_vm6, %v1681_v60  ;;  %v2130_v7 = vld [vmem:[#allocation3 + $0x11] sm:$0xf]  ;;  %v1682_v29 = vld [vmem:[#allocation2 + $0x1c] sm:$0x1]  ;;  %v1048_v50 = vadd.f32 %v4207_v31, %v897_v46  ;;  %v284_v31 = vadd.f32 %v3913_v18, %v3840_v39  ;;  %v748_v56 = vadd.f32 %v4002_v22, %v597_v16 }
 0x184   :  { %1845 = vrot.lane.b32.xlu0 %v1841_v59, %s3223_s13  ;;  %1729 = vst.msk [vmem:[#allocation3 + $0xbb] sm:$0x1] %vm1501_vm6, %v1713_v25  ;;  %v1714_v9 = vld [vmem:[#allocation2 + $0x1e] sm:$0x1] }
 0x185   :  { %vm1383_vm11 = vcmp.ge.f32.partialorder %v1367_v4, 0.0  ;;  %v1399_v61 = vmul.f32 0.2, %v1367_v4  ;;  %1505 = vst.msk [vmem:[#allocation3 + $0x21] sm:$0x1] %vm1501_vm6, %v1487_v40  ;;  %v4277_v40 = vpop.f32.mrf.mxu3  ;;  %v447_v18 = vadd.f32 %v3917_v27, %v284_v31 }
 0x186   :  { %1537 = vst.msk [vmem:[#allocation3 + $0x22] sm:$0x1] %vm1501_vm6, %v1521_v17  ;;  %v1994_v44 = vld [vmem:[#allocation3 + $0x19] sm:$0xf] }
 0x187   :  { %v1415_v42 = vsel %vm1383_vm11, %v1367_v4, %v1399_v61  ;;  %1794 = vrot.lane.b32.xlu2 %v1790_v58, %s3222_s1  ;;  %1569 = vst.msk [vmem:[#allocation3 + $0x23] sm:$0x1] %vm1501_vm6, %v1553_v57  ;;  %v1488_v60 = vld [vmem:[#allocation2 + $0x21] sm:$0x1]  ;;  %v1522_v25 = vld [vmem:[#allocation2 + $0x23] sm:$0x1]  ;;  %v1199_v4 = vadd.f32 %v4216_v35, %v1048_v50  ;;  %v898_v61 = vadd.f32 %v4227_v15, %v748_v56 }
 0x188   :  { %1432 = vst.msk [vmem:[#allocation2 + $0x28] sm:$0xff] %vm1426_vm4, %v1415_v42  ;;  %v1312_v24 = vpop.f32.mrf.mxu0  ;;  %v1554_v23 = vld [vmem:[#allocation2 + $0x25] sm:$0x1]  ;;  %v1891_v55 = vld [vmem:[#allocation3 + $0x18] sm:$0xf]  ;;  %v598_v42 = vadd.f32 %v3924_v3, %v447_v18  ;;  %vm1838_vm11 = vcmask 191616  }
 0x189   :  { %v1348_v19 = vadd.f32 %v1312_v24, %v1198_v51  ;;  %1601 = vst.msk [vmem:[#allocation3 + $0x24] sm:$0x1] %vm1501_vm6, %v1585_v10  ;;  %v1049_v58 = vadd.f32 %v4232_v62, %v898_v61  ;;  %v872_v27 = vpop.f32.mrf.mxu1  ;;  %v1586_v15 = vld [vmem:[#allocation2 + $0x27] sm:$0x1]  ;;  %v287_v62 = vadd.f32 %v3933_v32, %v3858_v20  ;;  %v1023_v24 = vpop.f32.mrf.mxu2  ;;  %v1618_v26 = vld [vmem:[#allocation2 + $0x20] sm:$0x1] }
 0x18a   :  { %2134 = vrot.lane.b32.xlu1 %v2130_v7, %s3229_s21  ;;  %1634 = vst.msk [vmem:[#allocation3 + $0xc0] sm:$0x1] %vm1501_vm6, %v1617_v45  ;;  %v749_v46 = vadd.f32 %v4010_v1, %v598_v42  ;;  %v1651_v3 = vld [vmem:[#allocation2 + $0x22] sm:$0x1]  ;;  %v1715_v1 = vld [vmem:[#allocation2 + $0x26] sm:$0x1] }
 0x18b   :  { %v1368_v8 = vadd.f32 %v4126_v21, %v1348_v19  ;;  %1666 = vst.msk [vmem:[#allocation3 + $0xc1] sm:$0x1] %vm1501_vm6, %v1650_v33  ;;  %v1943_v41 = vld [vmem:[#allocation3 + $0xb8] sm:$0xf]  ;;  %v1200_v7 = vadd.f32 %v4245_v53, %v1049_v58  ;;  %v448_v20 = vadd.f32 %v3938_v54, %v287_v62 }
 0x18c   :  { %1998 = vrot.lane.b32.xlu0 %v1994_v44, %s3225_s17  ;;  %1698 = vst.msk [vmem:[#allocation3 + $0xc2] sm:$0x1] %vm1501_vm6, %v1682_v29  ;;  %v1683_v29 = vld [vmem:[#allocation2 + $0x24] sm:$0x1]  ;;  %v899_v32 = vadd.f32 %v4257_v12, %v749_v46 }
 0x18d   :  { %vm1384_vm12 = vcmp.ge.f32.partialorder %v1368_v8, 0.0  ;;  %v1400_v11 = vmul.f32 0.2, %v1368_v8  ;;  %1730 = vst.msk [vmem:[#allocation3 + $0xc3] sm:$0x1] %vm1501_vm6, %v1714_v9  ;;  %v1174_v53 = vpop.f32.mrf.mxu3  ;;  %v599_v16 = vadd.f32 %v3947_v36, %v448_v20 }
 0x18e   :  { %1506 = vst.msk [vmem:[#allocation3 + $0x29] sm:$0x1] %vm1501_vm6, %v1488_v60  ;;  %v2043_v50 = vld [vmem:[#allocation3 + $0x20] sm:$0xf]  ;;  %v1050_v44 = vadd.f32 %v4264_v28, %v899_v32  ;;  %v290_v28 = vadd.f32 %v3954_v38, %v3710_v34 }
 0x18f   :  { %v1416_v59 = vsel %vm1384_vm12, %v1368_v8, %v1400_v11  ;;  %1947 = vrot.lane.b32.xlu2 %v1943_v41, %s3228_s20  ;;  %v1489_v39 = vld [vmem:[#allocation2 + $0x29] sm:$0x1]  ;;  %1538 = vst.msk [vmem:[#allocation3 + $0x2a] sm:$0x1] %vm1501_vm6, %v1522_v25  ;;  %v1523_v35 = vld [vmem:[#allocation2 + $0x2b] sm:$0x1]  ;;  %v750_v56 = vadd.f32 %v4020_v30, %v599_v16 }
 0x190   :  { %1433 = vst.msk [vmem:[#allocation2 + $0x30] sm:$0xff] %vm1426_vm4, %v1416_v59  ;;  %v1315_v17 = vpop.f32.mrf.mxu0  ;;  %v2143_v37 = vld [vmem:[#allocation3 + $0x21] sm:$0xf]  ;;  %v1555_v51 = vld [vmem:[#allocation2 + $0x2d] sm:$0x1]  ;;  %v449_v38 = vadd.f32 %v3958_v14, %v290_v28  ;;  %vm1939_vm12 = vcmask 322816  }
 0x191   :  { %v1349_v22 = vadd.f32 %v1315_v17, %v1199_v4  ;;  %1570 = vst.msk [vmem:[#allocation3 + $0x2b] sm:$0x1] %vm1501_vm6, %v1554_v23  ;;  %v1619_v54 = vld [vmem:[#allocation2 + $0x28] sm:$0x1]  ;;  %v1652_v12 = vld [vmem:[#allocation2 + $0x2a] sm:$0x1]  ;;  %v875_v31 = vpop.f32.mrf.mxu1  ;;  %v1201_v4 = vadd.f32 %v4277_v40, %v1050_v44  ;;  %v1026_v23 = vpop.f32.mrf.mxu2  ;;  %v296_v44 = vadd.f32 %v3994_v13, %v3754_v0 }
 0x192   :  { %1895 = vrot.lane.b32.xlu1 %v1891_v55, %s3224_s2  ;;  %1507 = vst.msk [vmem:[#allocation3 + $0x31] sm:$0x1] %vm1501_vm6, %v1489_v39  ;;  %v1853_v41 = vld [vmem:[#allocation3 + $0x21] sm:$0xf]  ;;  %v1684_v25 = vld [vmem:[#allocation2 + $0x2c] sm:$0x1]  ;;  %v900_v39 = vadd.f32 %v872_v27, %v750_v56 }
 0x193   :  { %v1369_v57 = vadd.f32 %v4126_v21, %v1349_v22  ;;  %1539 = vst.msk [vmem:[#allocation3 + $0x32] sm:$0x1] %vm1501_vm6, %v1523_v35  ;;  %v1716_v36 = vld [vmem:[#allocation2 + $0x2e] sm:$0x1]  ;;  %v1587_v34 = vld [vmem:[#allocation2 + $0x2f] sm:$0x1]  ;;  %v451_v0 = vadd.f32 %v3997_v5, %v296_v44 }
 0x194   :  { %2147 = vrot.lane.b32.xlu0 %v2143_v37, %s3229_s21  ;;  %v2093_v45 = vld [vmem:[#allocation3 + $0xc0] sm:$0xf]  ;;  %1571 = vst.msk [vmem:[#allocation3 + $0x33] sm:$0x1] %vm1501_vm6, %v1555_v51  ;;  %v1051_v22 = vadd.f32 %v1023_v24, %v900_v39  ;;  %v600_v51 = vadd.f32 %v3964_v48, %v449_v38  ;;  %v4813_v38 = vld [vmem:[#allocation9_spill] sm:$0xff] }
 0x195   :  { %vm1385_vm13 = vcmp.ge.f32.partialorder %v1369_v57, 0.0  ;;  %v1401_v10 = vmul.f32 0.2, %v1369_v57  ;;  %1602 = vst.msk [vmem:[#allocation3 + $0x2c] sm:$0x1] %vm1501_vm6, %v1586_v15  ;;  %v2195_v55 = vld [vmem:[%s4794_s3 + $0x40] sm:$0xff]  ;;  %v293_v15 = vadd.f32 %v3970_v43, %v3733_v52  ;;  %v602_v39 = vadd.f32 %v4813_v38, %v451_v0 }
 0x196   :  { %1635 = vst.msk [vmem:[#allocation3 + $0xc8] sm:$0x1] %vm1501_vm6, %v1618_v26  ;;  %v1803_v18 = vld [vmem:[#allocation3 + $0xc0] sm:$0xf]  ;;  %2231 = vmatpush.msra.mxu1 %v2195_v55  ;;  %v751_v62 = vadd.f32 %v4026_v49, %v600_v51  ;;  %v1202_v24 = vadd.f32 %v1174_v53, %v1051_v22  ;;  %v2194_v51 = vld [vmem:[%s4794_s3 + $0x38] sm:$0xff] }
 0x197   :  { %v1417_v19 = vsel %vm1385_vm13, %v1369_v57, %v1401_v10  ;;  %2097 = vrot.lane.b32.xlu2 %v2093_v45, %s3226_s18  ;;  %1667 = vst.msk [vmem:[#allocation3 + $0xc9] sm:$0x1] %vm1501_vm6, %v1651_v3  ;;  %v1620_v30 = vld [vmem:[#allocation2 + $0x30] sm:$0x1]  ;;  %v1653_v40 = vld [vmem:[#allocation2 + $0x32] sm:$0x1]  ;;  %v1177_v57 = vpop.f32.mrf.mxu3  ;;  %v450_v52 = vadd.f32 %v3974_v6, %v293_v15 }
 0x198   :  { %1434 = vst.msk [vmem:[#allocation2 + $0x38] sm:$0xff] %vm1426_vm4, %v1417_v19  ;;  %v1318_v33 = vpop.f32.mrf.mxu0  ;;  %v1904_v60 = vld [vmem:[#allocation3 + $0x28] sm:$0xf]  ;;  %v1685_v14 = vld [vmem:[#allocation2 + $0x34] sm:$0x1]  ;;  %v901_v43 = vadd.f32 %v875_v31, %v751_v62  ;;  %2232 = vmatpush.msra.mxu1 %v2194_v51  ;;  %vm1991_vm13 = vcmask 388416  }
 0x199   :  { %v1350_v8 = vadd.f32 %v1318_v33, %v1200_v7  ;;  %1699 = vst.msk [vmem:[#allocation3 + $0xca] sm:$0x1] %vm1501_vm6, %v1683_v29  ;;  %v1717_v37 = vld [vmem:[#allocation2 + $0x36] sm:$0x1]  ;;  %v1490_v10 = vld [vmem:[#allocation2 + $0x31] sm:$0x1]  ;;  %v878_v26 = vpop.f32.mrf.mxu1  ;;  %v1029_v33 = vpop.f32.mrf.mxu2 }
 0x19a   :  { %2047 = vrot.lane.b32.xlu1 %v2043_v50, %s3227_s19  ;;  %1731 = vst.msk [vmem:[#allocation3 + $0xcb] sm:$0x1] %vm1501_vm6, %v1715_v1  ;;  %v1524_v48 = vld [vmem:[#allocation2 + $0x33] sm:$0x1]  ;;  %v1556_v7 = vld [vmem:[#allocation2 + $0x35] sm:$0x1]  ;;  %v1052_v20 = vadd.f32 %v1026_v23, %v901_v43  ;;  %v601_v1 = vadd.f32 %v3983_v2, %v450_v52 }
 0x19b   :  { %v1370_v9 = vadd.f32 %v4126_v21, %v1350_v8  ;;  %1636 = vst.msk [vmem:[#allocation3 + $0xd0] sm:$0x1] %vm1501_vm6, %v1619_v54  ;;  %v2055_v58 = vld [vmem:[#allocation3 + $0x30] sm:$0xf]  ;;  %v1588_v56 = vld [vmem:[#allocation2 + $0x37] sm:$0x1] }
 0x19c   :  { %1908 = vrot.lane.b32.xlu0 %v1904_v60, %s3224_s2  ;;  %1668 = vst.msk [vmem:[#allocation3 + $0xd1] sm:$0x1] %vm1501_vm6, %v1652_v12  ;;  %v2006_v42 = vld [vmem:[#allocation3 + $0x29] sm:$0xf]  ;;  %v752_v12 = vadd.f32 %v4030_v63, %v601_v1  ;;  %v1203_v16 = vadd.f32 %v1177_v57, %v1052_v20 }
 0x19d   :  { %vm1386_vm14 = vcmp.ge.f32.partialorder %v1370_v9, 0.0  ;;  %v1402_v11 = vmul.f32 0.2, %v1370_v9  ;;  %1700 = vst.msk [vmem:[#allocation3 + $0xd2] sm:$0x1] %vm1501_vm6, %v1684_v25 }
 0x19e   :  { %1732 = vst.msk [vmem:[#allocation3 + $0xd3] sm:$0x1] %vm1501_vm6, %v1716_v36  ;;  %v902_v13 = vadd.f32 %v878_v26, %v752_v12 }
 0x19f   :  { %v1418_v59 = vsel %vm1386_vm14, %v1370_v9, %v1402_v11  ;;  %1857 = vrot.lane.b32.xlu2 %v1853_v41, %s3223_s13  ;;  %1603 = vst.msk [vmem:[#allocation3 + $0x34] sm:$0x1] %vm1501_vm6, %v1587_v34  ;;  %v1621_v49 = vld [vmem:[#allocation2 + $0x38] sm:$0x1]  ;;  %v1654_v29 = vld [vmem:[#allocation2 + $0x3a] sm:$0x1]  ;;  %v1180_v9 = vpop.f32.mrf.mxu3 }
 0x1a0   :  { %1435 = vst.msk [vmem:[#allocation2 + $0x40] sm:$0xff] %vm1426_vm4, %v1418_v59  ;;  %v1321_v17 = vpop.f32.mrf.mxu0  ;;  %v1686_v8 = vld [vmem:[#allocation2 + $0x3c] sm:$0x1]  ;;  %v1718_v6 = vld [vmem:[#allocation2 + $0x3e] sm:$0x1]  ;;  %v1053_v59 = vadd.f32 %v1029_v33, %v902_v13  ;;  %v4818_v33 = vld [vmem:[#allocation12_spill] sm:$0xff] }
 0x1a1   :  { %v1351_v61 = vadd.f32 %v1321_v17, %v1201_v4  ;;  %1637 = vst.msk [vmem:[#allocation3 + $0xd8] sm:$0x1] %vm1501_vm6, %v1620_v30  ;;  %v1956_v19 = vld [vmem:[#allocation3 + $0xc8] sm:$0xf]  ;;  %v1491_v54 = vld [vmem:[#allocation2 + $0x39] sm:$0x1]  ;;  %v881_v63 = vpop.f32.mrf.mxu1  ;;  %v1032_v5 = vpop.f32.mrf.mxu2 }
 0x1a2   :  { %1807 = vrot.lane.b32.xlu1 %v1803_v18, %s3222_s1  ;;  %1669 = vst.msk [vmem:[#allocation3 + $0xd9] sm:$0x1] %vm1501_vm6, %v1653_v40  ;;  %v1525_v2 = vld [vmem:[#allocation2 + $0x3b] sm:$0x1]  ;;  %v1557_v31 = vld [vmem:[#allocation2 + $0x3d] sm:$0x1] }
 0x1a3   :  { %v1371_v35 = vadd.f32 %v4126_v21, %v1351_v61  ;;  %1701 = vst.msk [vmem:[#allocation3 + $0xda] sm:$0x1] %vm1501_vm6, %v1685_v14  ;;  %v4814_v61 = vld [vmem:[#allocation7_spill] sm:$0xff]  ;;  %v4815_v30 = vld [vmem:[#allocation10_spill] sm:$0xff]  ;;  %v1204_v14 = vadd.f32 %v1180_v9, %v1053_v59  ;;  %vm2040_vm14 = vcmask 454016  }
 0x1a4   :  { %2059 = vrot.lane.b32.xlu0 %v2055_v58, %s3227_s19  ;;  %1733 = vst.msk [vmem:[#allocation3 + $0xdb] sm:$0x1] %vm1501_vm6, %v1717_v37  ;;  %v299_v40 = vadd.f32 %v4815_v30, %v4814_v61  ;;  %v2193_v61 = vld [vmem:[%s4794_s3 + $0x30] sm:$0xff] }
 0x1a5   :  { %vm1387_vm15 = vcmp.ge.f32.partialorder %v1371_v35, 0.0  ;;  %v1403_v27 = vmul.f32 0.2, %v1371_v35  ;;  %1508 = vst.msk [vmem:[#allocation3 + $0x39] sm:$0x1] %vm1501_vm6, %v1490_v10  ;;  %v4817_v10 = vld [vmem:[#allocation11_spill] sm:$0xff]  ;;  %2233 = vmatpush.msra.mxu1 %v2193_v61 }
 0x1a6   :  { %1540 = vst.msk [vmem:[#allocation3 + $0x3a] sm:$0x1] %vm1501_vm6, %v1524_v48  ;;  %v1816_v50 = vld [vmem:[#allocation3 + $0xd0] sm:$0xf]  ;;  %v452_v62 = vadd.f32 %v4817_v10, %v299_v40 }
 0x1a7   :  { %v1419_v45 = vsel %vm1387_vm15, %v1371_v35, %v1403_v27  ;;  %2010 = vrot.lane.b32.xlu2 %v2006_v42, %s3225_s17  ;;  %1572 = vst.msk [vmem:[#allocation3 + $0x3b] sm:$0x1] %vm1501_vm6, %v1556_v7  ;;  %v2155_v60 = vld [vmem:[#allocation3 + $0x31] sm:$0xf]  ;;  %v1492_v4 = vld [vmem:[#allocation2 + $0x41] sm:$0x1]  ;;  %v1183_v27 = vpop.f32.mrf.mxu3 }
 0x1a8   :  { %1436 = vst.msk [vmem:[#allocation2 + $0x48] sm:$0xff] %vm1426_vm4, %v1419_v45  ;;  %v1324_v46 = vpop.f32.mrf.mxu0  ;;  %v2105_v41 = vld [vmem:[#allocation3 + $0xd0] sm:$0xf]  ;;  %v1526_v17 = vld [vmem:[#allocation2 + $0x43] sm:$0x1]  ;;  %vm2090_vm15 = vcmask 519616  }
 0x1a9   :  { %v1352_v3 = vadd.f32 %v1324_v46, %v1202_v24  ;;  %1638 = vst.msk [vmem:[#allocation3 + $0xe0] sm:$0x1] %vm1501_vm6, %v1621_v49  ;;  %v1558_v34 = vld [vmem:[#allocation2 + $0x45] sm:$0x1]  ;;  %v1590_v22 = vld [vmem:[#allocation2 + $0x47] sm:$0x1] }
 0x1aa   :  { %1960 = vrot.lane.b32.xlu1 %v1956_v19, %s3228_s20  ;;  %1670 = vst.msk [vmem:[#allocation3 + $0xe1] sm:$0x1] %vm1501_vm6, %v1654_v29  ;;  %v4816_v35 = vld [vmem:[#allocation16_spill] sm:$0xff]  ;;  %v1622_v37 = vld [vmem:[#allocation2 + $0x40] sm:$0x1]  ;;  %v603_v29 = vadd.f32 %v4818_v33, %v452_v62 }
 0x1ab   :  { %v1372_v32 = vadd.f32 %v4126_v21, %v1352_v3  ;;  %1702 = vst.msk [vmem:[#allocation3 + $0xe2] sm:$0x1] %vm1501_vm6, %v1686_v8  ;;  %v1969_v23 = vld [vmem:[#allocation3 + $0xd8] sm:$0xf]  ;;  %v753_v58 = vadd.f32 %v4816_v35, %v602_v39  ;;  %v1655_v42 = vld [vmem:[#allocation2 + $0x42] sm:$0x1]  ;;  %v884_v3 = vpop.f32.mrf.mxu1  ;;  %v1783_v12 = vpop.permute.xlu2 %1782 }
 0x1ac   :  { %1820 = vrot.lane.b32.xlu0 %v1816_v50, %s3222_s1  ;;  %1734 = vst.msk [vmem:[#allocation3 + $0xe3] sm:$0x1] %vm1501_vm6, %v1718_v6  ;;  %v1865_v45 = vld [vmem:[#allocation3 + $0x31] sm:$0xf]  ;;  %v1687_v26 = vld [vmem:[#allocation2 + $0x44] sm:$0x1]  ;;  %v1035_v6 = vpop.f32.mrf.mxu2 }
 0x1ad   :  { %vm1388_vm0 = vcmp.ge.f32.partialorder %v1372_v32, 0.0  ;;  %v1404_v53 = vmul.f32 0.2, %v1372_v32  ;;  %1509 = vst.msk [vmem:[#allocation3 + $0x41] sm:$0x1] %vm1501_vm6, %v1491_v54  ;;  %v903_v24 = vadd.f32 %v881_v63, %v753_v58  ;;  %v4820_v50 = vld [vmem:[#allocation13_spill] sm:$0xff] }
 0x1ae   :  { %1541 = vst.msk [vmem:[#allocation3 + $0x42] sm:$0x1] %vm1501_vm6, %v1525_v2  ;;  %v1917_v55 = vld [vmem:[#allocation3 + $0x38] sm:$0xf]  ;;  %v1719_v46 = vld [vmem:[#allocation2 + $0x46] sm:$0x1] }
 0x1af   :  { %v1420_v11 = vsel %vm1388_vm0, %v1372_v32, %v1404_v53  ;;  %2159 = vrot.lane.b32.xlu2 %v2155_v60, %s3229_s21  ;;  %1573 = vst.msk [vmem:[#allocation3 + $0x43] sm:$0x1] %vm1501_vm6, %v1557_v31  ;;  %v1054_v7 = vadd.f32 %v1032_v5, %v903_v24  ;;  %v1589_v19 = vld [vmem:[#allocation2 + $0x3f] sm:$0x1]  ;;  %v1753_v49 = vld [vmem:[#allocation3 + $0x50] sm:$0xf]  ;;  %v1186_v0 = vpop.f32.mrf.mxu3 }
 0x1b0   :  { %1437 = vst.msk [vmem:[#allocation2 + $0x50] sm:$0xff] %vm1426_vm4, %v1420_v11  ;;  %v1327_v28 = vpop.f32.mrf.mxu0  ;;  %v4819_v32 = vld [vmem:[#allocation8_spill] sm:$0xff]  ;;  %v4821_v53 = vld [vmem:[#allocation17_spill] sm:$0xff]  ;;  %v4823_v63 = vld [vmem:[#allocation15_spill] sm:$0xff]  ;;  %vm2140_vm0 = vcmask 585216  }
 0x1b1   :  { %v1353_v25 = vadd.f32 %v1327_v28, %v1203_v16  ;;  %1604 = vst.msk [vmem:[#allocation3 + $0x3c] sm:$0x1] %vm1501_vm6, %v1588_v56  ;;  %v302_v8 = vadd.f32 %v4820_v50, %v4819_v32  ;;  %v754_v44 = vadd.f32 %v4821_v53, %v603_v29  ;;  %v1205_v9 = vadd.f32 %v1183_v27, %v1054_v7  ;;  %v4822_v16 = vld [vmem:[#allocation14_spill] sm:$0xff]  ;;  %v1493_v56 = vld [vmem:[#allocation2 + $0x49] sm:$0x1] }
 0x1b2   :  { %2109 = vrot.lane.b32.xlu1 %v2105_v41, %s3226_s18  ;;  %1510 = vst.msk [vmem:[#allocation3 + $0x59] sm:$0x1] %vm1501_vm6, %v1492_v4  ;;  %v4824_v5 = vld [vmem:[#allocation18_spill] sm:$0xff]  ;;  %v1623_v58 = vld [vmem:[#allocation2 + $0x48] sm:$0x1] }
 0x1b3   :  { %v1373_v36 = vadd.f32 %v4126_v21, %v1353_v25  ;;  %1542 = vst.msk [vmem:[#allocation3 + $0x5a] sm:$0x1] %vm1501_vm6, %v1526_v17  ;;  %v2118_v43 = vld [vmem:[#allocation3 + $0xe0] sm:$0xf]  ;;  %v453_v11 = vadd.f32 %v4822_v16, %v302_v8  ;;  %v904_v2 = vadd.f32 %v884_v3, %v754_v44  ;;  %v1527_v17 = vld [vmem:[#allocation2 + $0x4b] sm:$0x1] }
 0x1b4   :  { %1973 = vrot.lane.b32.xlu0 %v1969_v23, %s3228_s20  ;;  %1574 = vst.msk [vmem:[#allocation3 + $0x5b] sm:$0x1] %vm1501_vm6, %v1558_v34  ;;  %v1038_v30 = vpop.f32.mrf.mxu2  ;;  %v1688_v51 = vld [vmem:[#allocation2 + $0x4c] sm:$0x1]  ;;  %v1758_v44 = vld [vmem:[#allocation3 + $0x10] sm:$0xf] }
 0x1b5   :  { %vm1389_vm1 = vcmp.ge.f32.partialorder %v1373_v36, 0.0  ;;  %v1405_v18 = vmul.f32 0.2, %v1373_v36  ;;  %1606 = vst.msk [vmem:[#allocation3 + $0x5c] sm:$0x1] %vm1501_vm6, %v1590_v22  ;;  %v1055_v13 = vadd.f32 %v1035_v6, %v904_v2  ;;  %v604_v4 = vadd.f32 %v4823_v63, %v453_v11  ;;  %v2192_v3 = vld [vmem:[%s4794_s3 + $0x28] sm:$0xff] }
 0x1b6   :  { %1639 = vst.msk [vmem:[#allocation3 + $0xf8] sm:$0x1] %vm1501_vm6, %v1622_v37  ;;  %v2068_v1 = vld [vmem:[#allocation3 + $0x40] sm:$0xf]  ;;  %2234 = vmatpush.msra.mxu1 %v2192_v3 }
 0x1b7   :  { %v1421_v57 = vsel %vm1389_vm1, %v1373_v36, %v1405_v18  ;;  %1921 = vrot.lane.b32.xlu2 %v1917_v55, %s3224_s2  ;;  %1671 = vst.msk [vmem:[#allocation3 + $0xf9] sm:$0x1] %vm1501_vm6, %v1655_v42  ;;  %v887_v36 = vpop.f32.mrf.mxu1  ;;  %v755_v34 = vadd.f32 %v4824_v5, %v604_v4  ;;  %v1206_v38 = vadd.f32 %v1186_v0, %v1055_v13  ;;  %v1559_v18 = vld [vmem:[#allocation2 + $0x4d] sm:$0x1]  ;;  %v1591_v55 = vld [vmem:[#allocation2 + $0x4f] sm:$0x1]  ;;  %v1189_v27 = vpop.f32.mrf.mxu3 }
 0x1b8   :  { %1438 = vst.msk [vmem:[#allocation2 + $0x58] sm:$0xff] %vm1426_vm4, %v1421_v57  ;;  %v1330_v15 = vpop.f32.mrf.mxu0  ;;  %v2018_v28 = vld [vmem:[#allocation3 + $0x39] sm:$0xf]  ;;  %v1494_v10 = vld [vmem:[#allocation2 + $0x51] sm:$0x1]  ;;  %v2191_v13 = vld [vmem:[%s4794_s3 + $0x20] sm:$0xff] }
 0x1b9   :  { %v1354_v48 = vadd.f32 %v1330_v15, %v1204_v14  ;;  %1703 = vst.msk [vmem:[#allocation3 + $0xfa] sm:$0x1] %vm1501_vm6, %v1687_v26  ;;  %v905_v47 = vadd.f32 %v887_v36, %v755_v34  ;;  %v1656_v14 = vld [vmem:[#allocation2 + $0x4a] sm:$0x1]  ;;  %v1720_v15 = vld [vmem:[#allocation2 + $0x4e] sm:$0x1]  ;;  %2235 = vmatpush.msra.mxu1 %v2191_v13 }
 0x1ba   :  { %1869 = vrot.lane.b32.xlu1 %v1865_v45, %s3223_s13  ;;  %1735 = vst.msk [vmem:[#allocation3 + $0xfb] sm:$0x1] %vm1501_vm6, %v1719_v46  ;;  %v1560_v7 = vld [vmem:[#allocation2 + $0x55] sm:$0x1]  ;;  %v1657_v0 = vld [vmem:[#allocation2 + $0x52] sm:$0x1] }
 0x1bb   :  { %v1374_v52 = vadd.f32 %v4126_v21, %v1354_v48  ;;  %1605 = vst.msk [vmem:[#allocation3 + $0x44] sm:$0x1] %vm1501_vm6, %v1589_v19  ;;  %v1056_v57 = vadd.f32 %v1038_v30, %v905_v47  ;;  %v1528_v48 = vld [vmem:[#allocation2 + $0x53] sm:$0x1]  ;;  %v1878_v26 = vld [vmem:[#allocation3 + $0x58] sm:$0xf] }
 0x1bc   :  { %2122 = vrot.lane.b32.xlu0 %v2118_v43, %s3226_s18  ;;  %1756 = vst.msk [vmem:[#allocation4 + $0x20] sm:$0xf] %vm1754_vm3, %v1753_v49  ;;  %v1982_v25 = vld [vmem:[#allocation3 + $0x59] sm:$0xf]  ;;  %v1752_v19 = vld [vmem:[#allocation3] sm:$0xf] }
 0x1bd   :  { %vm1390_vm2 = vcmp.ge.f32.partialorder %v1374_v52, 0.0  ;;  %v1406_v20 = vmul.f32 0.2, %v1374_v52  ;;  %1788 = vst.msk [vmem:[#allocation4 + $0x20] sm:$0xf] %vm1786_vm5, %v1783_v12  ;;  %v1207_v62 = vadd.f32 %v1189_v27, %v1056_v57  ;;  %v2190_v4 = vld [vmem:[%s4794_s3 + $0x18] sm:$0xff] }
 0x1be   :  { %1511 = vst.msk [vmem:[#allocation3 + $0x61] sm:$0x1] %vm1501_vm6, %v1493_v56  ;;  %v1689_v56 = vld [vmem:[#allocation2 + $0x54] sm:$0x1]  ;;  %v1721_v36 = vld [vmem:[#allocation2 + $0x56] sm:$0x1]  ;;  %2236 = vmatpush.msra.mxu1 %v2190_v4 }
 0x1bf   :  { %v1422_v60 = vsel %vm1390_vm2, %v1374_v52, %v1406_v20  ;;  %2072 = vrot.lane.b32.xlu2 %v2068_v1, %s3227_s19  ;;  %1543 = vst.msk [vmem:[#allocation3 + $0x62] sm:$0x1] %vm1501_vm6, %v1527_v17  ;;  %v1781_v52 = vpop.permute.xlu0 %1780  ;;  %v1495_v29 = vld [vmem:[#allocation2 + $0x59] sm:$0x1]  ;;  %v1529_v20 = vld [vmem:[#allocation2 + $0x5b] sm:$0x1] }
 0x1c0   :  { %1439 = vst.msk [vmem:[#allocation2 + $0x60] sm:$0xff] %vm1426_vm4, %v1422_v60  ;;  %v1333_v54 = vpop.f32.mrf.mxu0  ;;  %v1561_v8 = vld [vmem:[#allocation2 + $0x5d] sm:$0x1]  ;;  %v1658_v12 = vld [vmem:[#allocation2 + $0x5a] sm:$0x1]  ;;  %v2188_v17 = vld [vmem:[%s4794_s3 + $0x8] sm:$0xff] }
 0x1c1   :  { %v1355_v31 = vadd.f32 %v1333_v54, %v1205_v9  ;;  %v1930_v23 = vld [vmem:[#allocation3 + $0xf8] sm:$0xf]  ;;  %1575 = vst.msk [vmem:[#allocation3 + $0x63] sm:$0x1] %vm1501_vm6, %v1559_v18  ;;  %v1690_v16 = vld [vmem:[#allocation2 + $0x5c] sm:$0x1] }
 0x1c2   :  { %2022 = vrot.lane.b32.xlu1 %v2018_v28, %s3225_s17  ;;  %v2167_v22 = vld [vmem:[#allocation3 + $0x41] sm:$0xf]  ;;  %1607 = vst.msk [vmem:[#allocation3 + $0x64] sm:$0x1] %vm1501_vm6, %v1591_v55  ;;  %v1625_v54 = vld [vmem:[#allocation2 + $0x58] sm:$0x1] }
 0x1c3   :  { %v1375_v41 = vadd.f32 %v4126_v21, %v1355_v31  ;;  %1640 = vst.msk [vmem:[#allocation3 + $0x100] sm:$0x1] %vm1501_vm6, %v1623_v58  ;;  %v1722_v11 = vld [vmem:[#allocation2 + $0x5e] sm:$0x1]  ;;  %v1593_v28 = vld [vmem:[#allocation2 + $0x5f] sm:$0x1] }
 0x1c4   :  { %1987 = vrot.lane.b32.xlu0 %v1982_v25, %s3225_s17  ;;  %1672 = vst.msk [vmem:[#allocation3 + $0x101] sm:$0x1] %vm1501_vm6, %v1656_v14  ;;  %v1624_v31 = vld [vmem:[#allocation2 + $0x50] sm:$0x1]  ;;  %vm2289_vm1 = vcmask 130048  }
 0x1c5   :  { %vm1391_vm7 = vcmp.ge.f32.partialorder %v1375_v41, 0.0  ;;  %v1407_v59 = vmul.f32 0.2, %v1375_v41  ;;  %1704 = vst.msk [vmem:[#allocation3 + $0x102] sm:$0x1] %vm1501_vm6, %v1688_v51 }
 0x1c6   :  { %1736 = vst.msk [vmem:[#allocation3 + $0x103] sm:$0x1] %vm1501_vm6, %v1720_v15 }
 0x1c7   :  { %v1423_v39 = vsel %vm1391_vm7, %v1375_v41, %v1407_v59  ;;  %1935 = vrot.lane.b32.xlu2 %v1930_v23, %s3228_s20  ;;  %1512 = vst.msk [vmem:[#allocation3 + $0x69] sm:$0x1] %vm1501_vm6, %v1494_v10  ;;  %v1833_v60 = vpop.permute.xlu0 %1832  ;;  %v2189_v59 = vld [vmem:[%s4794_s3 + $0x10] sm:$0xff]  ;;  %v1691_v18 = vld [vmem:[#allocation2 + $0x64] sm:$0x1]  ;;  %vm2310_vm7 = vcmask 1041409  }
 0x1c8   :  { %1440 = vst.msk [vmem:[#allocation2 + $0x68] sm:$0xff] %vm1426_vm4, %v1423_v39  ;;  %v1336_v40 = vpop.f32.mrf.mxu0  ;;  %v2031_v1 = vld [vmem:[#allocation3 + $0x60] sm:$0xf]  ;;  %2237 = vmatpush.msra.mxu1 %v2189_v59  ;;  %v1723_v30 = vld [vmem:[#allocation2 + $0x66] sm:$0x1] }
 0x1c9   :  { %v1356_v35 = vadd.f32 %v1336_v40, %v1206_v38  ;;  %v2131_v49 = vld [vmem:[#allocation3 + $0x61] sm:$0xf]  ;;  %1544 = vst.msk [vmem:[#allocation3 + $0x6a] sm:$0x1] %vm1501_vm6, %v1528_v48  ;;  %v1626_v38 = vld [vmem:[#allocation2 + $0x60] sm:$0x1] }
 0x1ca   :  { %2171 = vrot.lane.b32.xlu1 %v2167_v22, %s3229_s21  ;;  %1576 = vst.msk [vmem:[#allocation3 + $0x6b] sm:$0x1] %vm1501_vm6, %v1560_v7  ;;  %v1842_v2 = vld [vmem:[#allocation3 + $0x61] sm:$0xf]  ;;  %2238 = vmatpush.msra.mxu1 %v2188_v17 }
 0x1cb   :  { %v1376_v37 = vadd.f32 %v4126_v21, %v1356_v35  ;;  %1755 = vst.msk [vmem:[#allocation4] sm:$0xf] %vm1754_vm3, %v1752_v19  ;;  %v1659_v39 = vld [vmem:[#allocation2 + $0x62] sm:$0x1]  ;;  %v1496_v47 = vld [vmem:[#allocation2 + $0x61] sm:$0x1] }
 0x1cc   :  { %2136 = vrot.lane.b32.xlu0 %v2131_v49, %s3229_s21  ;;  %1787 = vst.msk [vmem:[#allocation4] sm:$0xf] %vm1786_vm5, %v1781_v52  ;;  %v2187_v40 = vld [vmem:[%s4794_s3] sm:$0xff] }
 0x1cd   :  { %vm1392_vm8 = vcmp.ge.f32.partialorder %v1376_v37, 0.0  ;;  %v1408_v42 = vmul.f32 0.2, %v1376_v37  ;;  %v2081_v50 = vld [vmem:[#allocation3 + $0x100] sm:$0xf]  ;;  %2239 = vmatpush.msra.mxu1 %v2187_v40 }
 0x1ce   :  { %v4428_v45 = vpop.permute.xlu2 %1985  ;;  %1513 = vst.msk [vmem:[#allocation3 + $0x71] sm:$0x1] %vm1501_vm6, %v1495_v29  ;;  %v1791_v41 = vld [vmem:[#allocation3 + $0x100] sm:$0xf]  ;;  %v1562_v35 = vld [vmem:[#allocation2 + $0x65] sm:$0x1] }
 0x1cf   :  { %v1424_v24 = vsel %vm1392_vm8, %v1376_v37, %v1408_v42  ;;  %2086 = vrot.lane.b32.xlu2 %v2081_v50, %s3226_s18  ;;  %1545 = vst.msk [vmem:[#allocation3 + $0x72] sm:$0x1] %vm1501_vm6, %v1529_v20  ;;  %v1835_v23 = vpop.permute.xlu0 %1834  ;;  %v1530_v22 = vld [vmem:[#allocation2 + $0x63] sm:$0x1]  ;;  %v1627_v14 = vld [vmem:[#allocation2 + $0x68] sm:$0x1] }
 0x1d0   :  { %1441 = vst.msk [vmem:[#allocation2 + $0x70] sm:$0xff] %vm1426_vm4, %v1424_v24  ;;  %v1339_v46 = vpop.f32.mrf.mxu0  ;;  %v1660_v51 = vld [vmem:[#allocation2 + $0x6a] sm:$0x1]  ;;  %v1692_v27 = vld [vmem:[#allocation2 + $0x6c] sm:$0x1] }
 0x1d1   :  { %v1357_v43 = vadd.f32 %v1339_v46, %v1207_v62  ;;  %1577 = vst.msk [vmem:[#allocation3 + $0x73] sm:$0x1] %vm1501_vm6, %v1561_v8  ;;  %v1892_v9 = vld [vmem:[#allocation3 + $0x68] sm:$0xf]  ;;  %v1724_v15 = vld [vmem:[#allocation2 + $0x6e] sm:$0x1] }
 0x1d2   :  { %1883 = vrot.lane.b32.xlu1 %v1878_v26, %s3224_s2  ;;  %1839 = vst.msk [vmem:[#allocation4] sm:$0xf] %vm1838_vm11, %v1833_v60  ;;  %v1497_v10 = vld [vmem:[#allocation2 + $0x69] sm:$0x1]  ;;  %v1531_v48 = vld [vmem:[#allocation2 + $0x6b] sm:$0x1] }
 0x1d3   :  { %v1377_v33 = vadd.f32 %v4126_v21, %v1357_v43  ;;  %v1592_v21 = vld [vmem:[#allocation2 + $0x57] sm:$0x1]  ;;  %1761 = vst.msk [vmem:[#allocation4 + $0x8] sm:$0xf] %vm1754_vm3, %v1758_v44  ;;  %v1563_v46 = vld [vmem:[#allocation2 + $0x6d] sm:$0x1] }
 0x1d4   :  { %1608 = vst.msk [vmem:[#allocation3 + $0x6c] sm:$0x1] %vm1501_vm6, %v1592_v21  ;;  %1897 = vrot.lane.b32.xlu0 %v1892_v9, %s3224_s2  ;;  %v1595_v19 = vld [vmem:[#allocation2 + $0x6f] sm:$0x1]  ;;  %v1770_v40 = vld [vmem:[#allocation3 + $0x30] sm:$0xf] }
 0x1d5   :  { %vm1393_vm9 = vcmp.ge.f32.partialorder %v1377_v33, 0.0  ;;  %v1409_v32 = vmul.f32 0.2, %v1377_v33  ;;  %1642 = vst.msk [vmem:[#allocation3 + $0x110] sm:$0x1] %vm1501_vm6, %v1625_v54 }
 0x1d6   :  { %1674 = vst.msk [vmem:[#allocation3 + $0x111] sm:$0x1] %vm1501_vm6, %v1658_v12 }
 0x1d7   :  { %v1425_v6 = vsel %vm1393_vm9, %v1377_v33, %v1409_v32  ;;  %1847 = vrot.lane.b32.xlu2 %v1842_v2, %s3223_s13  ;;  %1706 = vst.msk [vmem:[#allocation3 + $0x112] sm:$0x1] %vm1501_vm6, %v1690_v16  ;;  %v1498_v33 = vld [vmem:[#allocation2 + $0x71] sm:$0x1]  ;;  %v1532_v20 = vld [vmem:[#allocation2 + $0x73] sm:$0x1] }
 0x1d8   :  { %1442 = vst.msk [vmem:[#allocation2 + $0x78] sm:$0xff] %vm1426_vm4, %v1425_v6  ;;  %v2044_v63 = vld [vmem:[#allocation3 + $0x70] sm:$0xf]  ;;  %vm1887_vm4 = vcmask 257216   ;;  %v1564_v50 = vld [vmem:[#allocation2 + $0x75] sm:$0x1] }
 0x1d9   :  { %v4446_v53 = vpop.permute.xlu2 %2034  ;;  %1738 = vst.msk [vmem:[#allocation3 + $0x113] sm:$0x1] %vm1501_vm6, %v1722_v11  ;;  %v1596_v6 = vld [vmem:[#allocation2 + $0x77] sm:$0x1]  ;;  %v1628_v21 = vld [vmem:[#allocation2 + $0x70] sm:$0x1] }
 0x1da   :  { %2036 = vrot.lane.b32.xlu1 %v2031_v1, %s3227_s19  ;;  %1609 = vst.msk [vmem:[#allocation3 + $0x74] sm:$0x1] %vm1501_vm6, %v1593_v28  ;;  %v1693_v12 = vld [vmem:[#allocation2 + $0x74] sm:$0x1]  ;;  %v1725_v16 = vld [vmem:[#allocation2 + $0x76] sm:$0x1] }
 0x1db   :  { %1641 = vst.msk [vmem:[#allocation3 + $0x108] sm:$0x1] %vm1501_vm6, %v1624_v31  ;;  %v1995_v34 = vld [vmem:[#allocation3 + $0x69] sm:$0xf] }
 0x1dc   :  { %2049 = vrot.lane.b32.xlu0 %v2044_v63, %s3227_s19  ;;  %1673 = vst.msk [vmem:[#allocation3 + $0x109] sm:$0x1] %vm1501_vm6, %v1657_v0 }
 0x1dd   :  { %1705 = vst.msk [vmem:[#allocation3 + $0x10a] sm:$0x1] %vm1501_vm6, %v1689_v56 }
 0x1de   :  { %1737 = vst.msk [vmem:[#allocation3 + $0x10b] sm:$0x1] %vm1501_vm6, %v1721_v36 }
 0x1df   :  { %2000 = vrot.lane.b32.xlu2 %v1995_v34, %s3225_s17  ;;  %1840 = vst.msk [vmem:[#allocation4 + $0x20] sm:$0xf] %vm1838_vm11, %v1835_v23  ;;  %v1499_v28 = vld [vmem:[#allocation2 + $0x79] sm:$0x1]  ;;  %v1533_v31 = vld [vmem:[#allocation2 + $0x7b] sm:$0x1] }
 0x1e0   :  { %1643 = vst.msk [vmem:[#allocation3 + $0x118] sm:$0x1] %vm1501_vm6, %v1626_v38  ;;  %v1804_v55 = vld [vmem:[#allocation3 + $0x110] sm:$0xf]  ;;  %v1565_v13 = vld [vmem:[#allocation2 + $0x7d] sm:$0x1] }
 0x1e1   :  { %v1795_v25 = vpop.permute.xlu2 %1794  ;;  %1675 = vst.msk [vmem:[#allocation3 + $0x119] sm:$0x1] %vm1501_vm6, %v1659_v39  ;;  %v2144_v57 = vld [vmem:[#allocation3 + $0x71] sm:$0xf]  ;;  %v1597_v63 = vld [vmem:[#allocation2 + $0x7f] sm:$0x1] }
 0x1e2   :  { %1796 = vrot.lane.b32.xlu1 %v1791_v41, %s3222_s1  ;;  %1800 = vst.msk [vmem:[#allocation4 + $0x8] sm:$0xf] %vm1786_vm5, %v1795_v25  ;;  %v2094_v26 = vld [vmem:[#allocation3 + $0x110] sm:$0xf]  ;;  %v1629_v4 = vld [vmem:[#allocation2 + $0x78] sm:$0x1] }
 0x1e3   :  { %1707 = vst.msk [vmem:[#allocation3 + $0x11a] sm:$0x1] %vm1501_vm6, %v1691_v18  ;;  %v1854_v29 = vld [vmem:[#allocation3 + $0x71] sm:$0xf]  ;;  %v1662_v36 = vld [vmem:[#allocation2 + $0x7a] sm:$0x1] }
 0x1e4   :  { %1809 = vrot.lane.b32.xlu0 %v1804_v55, %s3222_s1  ;;  %1739 = vst.msk [vmem:[#allocation3 + $0x11b] sm:$0x1] %vm1501_vm6, %v1723_v30  ;;  %v1694_v17 = vld [vmem:[#allocation2 + $0x7c] sm:$0x1]  ;;  %v1764_v34 = vld [vmem:[#allocation3 + $0x20] sm:$0xf] }
 0x1e5   :  { %v1882_v5 = vpop.permute.xlu1 %1881  ;;  %v1944_v58 = vld [vmem:[#allocation3 + $0x108] sm:$0xf]  ;;  %1514 = vst.msk [vmem:[#allocation3 + $0x79] sm:$0x1] %vm1501_vm6, %v1496_v47 }
 0x1e6   :  { %1888 = vst.msk [vmem:[#allocation4] sm:$0xf] %vm1887_vm4, %v1882_v5  ;;  %v1726_v5 = vld [vmem:[#allocation2 + $0x7e] sm:$0x1] }
 0x1e7   :  { %1546 = vst.msk [vmem:[#allocation3 + $0x7a] sm:$0x1] %vm1501_vm6, %v1530_v22  ;;  %2149 = vrot.lane.b32.xlu2 %v2144_v57, %s3229_s21 }
 0x1e8   :  { %1578 = vst.msk [vmem:[#allocation3 + $0x7b] sm:$0x1] %vm1501_vm6, %v1562_v35 }
 0x1e9   :  { %v4482_v61 = vpop.permute.xlu2 %1947  ;;  %1644 = vst.msk [vmem:[#allocation3 + $0x120] sm:$0x1] %vm1501_vm6, %v1627_v14 }
 0x1ea   :  { %1949 = vrot.lane.b32.xlu1 %v1944_v58, %s3228_s20  ;;  %1676 = vst.msk [vmem:[#allocation3 + $0x121] sm:$0x1] %vm1501_vm6, %v1660_v51 }
 0x1eb   :  { %1708 = vst.msk [vmem:[#allocation3 + $0x122] sm:$0x1] %vm1501_vm6, %v1692_v27  ;;  %v1957_v62 = vld [vmem:[#allocation3 + $0x118] sm:$0xf] }
 0x1ec   :  { %1740 = vst.msk [vmem:[#allocation3 + $0x123] sm:$0x1] %vm1501_vm6, %v1724_v15  ;;  %1962 = vrot.lane.b32.xlu0 %v1957_v62, %s3228_s20 }
 0x1ed   :  { %1515 = vst.msk [vmem:[#allocation3 + $0x81] sm:$0x1] %vm1501_vm6, %v1497_v10 }
 0x1ee   :  { %v2085_v37 = vpop.permute.xlu0 %2084  ;;  %1547 = vst.msk [vmem:[#allocation3 + $0x82] sm:$0x1] %vm1501_vm6, %v1531_v48  ;;  %v1765_v48 = vld [vmem:[#allocation3 + $0x70] sm:$0xf] }
 0x1ef   :  { %v1905_v7 = vld [vmem:[#allocation3 + $0x78] sm:$0xf]  ;;  %1579 = vst.msk [vmem:[#allocation3 + $0x83] sm:$0x1] %vm1501_vm6, %v1563_v46 }
 0x1f0   :  { %1910 = vrot.lane.b32.xlu2 %v1905_v7, %s3224_s2  ;;  %1611 = vst.msk [vmem:[#allocation3 + $0x84] sm:$0x1] %vm1501_vm6, %v1595_v19 }
 0x1f1   :  { %v4498_v42 = vpop.permute.xlu2 %2097  ;;  %1516 = vst.msk [vmem:[#allocation3 + $0x89] sm:$0x1] %vm1501_vm6, %v1498_v33 }
 0x1f2   :  { %2099 = vrot.lane.b32.xlu1 %v2094_v26, %s3226_s18  ;;  %1548 = vst.msk [vmem:[#allocation3 + $0x8a] sm:$0x1] %vm1501_vm6, %v1532_v20 }
 0x1f3   :  { %v2106_v3 = vld [vmem:[#allocation3 + $0x120] sm:$0xf]  ;;  %1580 = vst.msk [vmem:[#allocation3 + $0x8b] sm:$0x1] %vm1501_vm6, %v1564_v50 }
 0x1f4   :  { %v1934_v24 = vpop.permute.xlu1 %1933  ;;  %2111 = vrot.lane.b32.xlu0 %v2106_v3, %s3226_s18  ;;  %1612 = vst.msk [vmem:[#allocation3 + $0x8c] sm:$0x1] %vm1501_vm6, %v1596_v6  ;;  %v1817_v2 = vld [vmem:[#allocation3 + $0x120] sm:$0xf] }
 0x1f5   :  { %1940 = vst.msk [vmem:[#allocation4] sm:$0xf] %vm1939_vm12, %v1934_v24 }
 0x1f6   :  { %1992 = vst.msk [vmem:[#allocation4] sm:$0xf] %vm1991_vm13, %v4428_v45  ;;  %v1846_v52 = vpop.permute.xlu0 %1845  ;;  %v1594_v45 = vld [vmem:[#allocation2 + $0x67] sm:$0x1]  ;;  %v2056_v8 = vld [vmem:[#allocation3 + $0x80] sm:$0xf] }
 0x1f7   :  { %1851 = vst.msk [vmem:[#allocation4 + $0x8] sm:$0xf] %vm1838_vm11, %v1846_v52  ;;  %v1866_v44 = vld [vmem:[#allocation3 + $0x81] sm:$0xf] }
 0x1f8   :  { %2041 = vst.msk [vmem:[#allocation4] sm:$0xf] %vm2040_vm14, %v4446_v53  ;;  %2061 = vrot.lane.b32.xlu2 %v2056_v8, %s3227_s19  ;;  %v1661_v53 = vld [vmem:[#allocation2 + $0x72] sm:$0x1]  ;;  %v2156_v56 = vld [vmem:[#allocation3 + $0x81] sm:$0xf] }
 0x1f9   :  { %v4513_v43 = vpop.permute.xlu2 %1857  ;;  %2091 = vst.msk [vmem:[#allocation4] sm:$0xf] %vm2090_vm15, %v2085_v37  ;;  %v1759_v37 = vld [vmem:[#allocation3 + $0x60] sm:$0xf] }
 0x1fa   :  { %1859 = vrot.lane.b32.xlu1 %v1854_v29, %s3223_s13  ;;  %1610 = vst.msk [vmem:[#allocation3 + $0x7c] sm:$0x1] %vm1501_vm6, %v1594_v45  ;;  %v1918_v18 = vld [vmem:[#allocation3 + $0x88] sm:$0xf]  ;;  %v1771_v52 = vld [vmem:[#allocation3 + $0x80] sm:$0xf] }
 0x1fb   :  { %1645 = vst.msk [vmem:[#allocation3 + $0x128] sm:$0x1] %vm1501_vm6, %v1628_v21  ;;  %v2019_v41 = vld [vmem:[#allocation3 + $0x89] sm:$0xf]  ;;  %v3155_v21 = vld [vmem:[%s4796_s5 + $0x18] sm:$0xff] }
 0x1fc   :  { %v2135_v49 = vpop.permute.xlu1 %2134  ;;  %1871 = vrot.lane.b32.xlu0 %v1866_v44, %s3223_s13  ;;  %1677 = vst.msk [vmem:[#allocation3 + $0x129] sm:$0x1] %vm1501_vm6, %v1661_v53  ;;  %2328 = vmatpush.msrb.mxu2 %v3155_v21 }
 0x1fd   :  { %2141 = vst.msk [vmem:[#allocation4] sm:$0xf] %vm2140_vm0, %v2135_v49 }
 0x1fe   :  { %v1999_v32 = vpop.permute.xlu0 %1998  ;;  %1709 = vst.msk [vmem:[#allocation3 + $0x12a] sm:$0x1] %vm1501_vm6, %v1693_v12 }
 0x1ff   :  { %1741 = vst.msk [vmem:[#allocation3 + $0x12b] sm:$0x1] %vm1501_vm6, %v1725_v16 }
 0x200   :  { %1822 = vrot.lane.b32.xlu2 %v1817_v2, %s3222_s1  ;;  %1517 = vst.msk [vmem:[#allocation3 + $0x91] sm:$0x1] %vm1501_vm6, %v1499_v28 }
 0x201   :  { %v4526_v1 = vpop.permute.xlu2 %2010  ;;  %v2007_v54 = vld [vmem:[#allocation3 + $0x79] sm:$0xf]  ;;  %1549 = vst.msk [vmem:[#allocation3 + $0x92] sm:$0x1] %vm1501_vm6, %v1533_v31  ;;  %v4621_v31 = vld [vmem:[%s4795_s4] ss:$0 sm:$0xff] }
 0x202   :  { %2012 = vrot.lane.b32.xlu1 %v2007_v54, %s3225_s17  ;;  %1581 = vst.msk [vmem:[#allocation3 + $0x93] sm:$0x1] %vm1501_vm6, %v1565_v13 }
 0x203   :  { %1613 = vst.msk [vmem:[#allocation3 + $0x94] sm:$0x1] %vm1501_vm6, %v1597_v63 }
 0x204   :  { %v1896_v9 = vpop.permute.xlu1 %1895  ;;  %v2179_v60 = vld [vmem:[#allocation4] sm:$0xff]  ;;  %2024 = vrot.lane.b32.xlu0 %v2019_v41, %s3225_s17  ;;  %1646 = vst.msk [vmem:[#allocation3 + $0x130] sm:$0x1] %vm1501_vm6, %v1629_v4 }
 0x205   :  { %1901 = vst.msk [vmem:[#allocation4 + $0x8] sm:$0xf] %vm1887_vm4, %v1896_v9  ;;  %3146 = vmatmul.msk.f32.vlgmr.msra.gmra.mxu1 %vm1743_vm10, %v2179_v60 }
 0x206   :  { %1953 = vst.msk [vmem:[#allocation4 + $0x8] sm:$0xf] %vm1939_vm12, %v4482_v61  ;;  %v2148_v11 = vpop.permute.xlu0 %2147  ;;  %v1970_v23 = vld [vmem:[#allocation3 + $0x128] sm:$0xf] }
 0x207   :  { %2004 = vst.msk [vmem:[#allocation4 + $0x8] sm:$0xf] %vm1991_vm13, %v1999_v32 }
 0x208   :  { %1975 = vrot.lane.b32.xlu2 %v1970_v23, %s3228_s20  ;;  %1678 = vst.msk [vmem:[#allocation3 + $0x131] sm:$0x1] %vm1501_vm6, %v1662_v36 }
 0x209   :  { %v2160_v0 = vpop.permute.xlu2 %2159  ;;  %1710 = vst.msk [vmem:[#allocation3 + $0x132] sm:$0x1] %vm1501_vm6, %v1694_v17  ;;  %v2069_v35 = vld [vmem:[#allocation3 + $0x90] sm:$0xf] }
 0x20a   :  { %2161 = vrot.lane.b32.xlu1 %v2156_v56, %s3229_s21  ;;  %1742 = vst.msk [vmem:[#allocation3 + $0x133] sm:$0x1] %vm1501_vm6, %v1726_v5  ;;  %v2168_v55 = vld [vmem:[#allocation3 + $0x91] sm:$0xf] }
 0x20b   :  { %1767 = vst.msk [vmem:[#allocation4 + $0x10] sm:$0xf] %vm1754_vm3, %v1764_v34  ;;  %v3154_v5 = vld [vmem:[%s4796_s5 + $0x10] sm:$0xff]  ;;  %v2300_v34 = vld [vmem:[%s4796_s5] sm:$0xff] }
 0x20c   :  { %v2048_v25 = vpop.permute.xlu1 %2047  ;;  %2173 = vrot.lane.b32.xlu0 %v2168_v55, %s3229_s21  ;;  %1773 = vst.msk [vmem:[#allocation4 + $0x18] sm:$0xf] %vm1754_vm3, %v1770_v40  ;;  %2329 = vmatpush.msrb.mxu2 %v3154_v5 }
 0x20d   :  { %2053 = vst.msk [vmem:[#allocation4 + $0x8] sm:$0xf] %vm2040_vm14, %v2048_v25 }
 0x20e   :  { %2103 = vst.msk [vmem:[#allocation4 + $0x8] sm:$0xf] %vm2090_vm15, %v4498_v42  ;;  %v1909_v59 = vpop.permute.xlu0 %1908 }
 0x20f   :  { %2153 = vst.msk [vmem:[#allocation4 + $0x8] sm:$0xf] %vm2140_vm0, %v2148_v11 }
 0x210   :  { %1762 = vst.msk [vmem:[#allocation4 + $0x28] sm:$0xf] %vm1754_vm3, %v1759_v37  ;;  %v3159_v37 = vld [vmem:[%s4796_s5 + $0x28] sm:$0xff] }
 0x211   :  { %v1922_v38 = vpop.permute.xlu2 %1921  ;;  %v2119_v47 = vld [vmem:[#allocation3 + $0x130] sm:$0xf]  ;;  %1768 = vst.msk [vmem:[#allocation4 + $0x30] sm:$0xf] %vm1754_vm3, %v1765_v48  ;;  %2385 = vmatpush.msra.mxu2 %v3159_v37 }
 0x212   :  { %1923 = vrot.lane.b32.xlu1 %v1918_v18, %s3224_s2  ;;  %2124 = vrot.lane.b32.xlu2 %v2119_v47, %s3226_s18  ;;  %1774 = vst.msk [vmem:[#allocation4 + $0x38] sm:$0xf] %vm1754_vm3, %v1771_v52 }
 0x214   :  { %v1808_v39 = vpop.permute.xlu1 %1807 }
 0x215   :  { %1813 = vst.msk [vmem:[#allocation4 + $0x10] sm:$0xf] %vm1786_vm5, %v1808_v39 }
 0x216   :  { %v2180_v61 = vld [vmem:[#allocation4 + $0x8] sm:$0xff]  ;;  %v2060_v30 = vpop.permute.xlu0 %2059  ;;  %1863 = vst.msk [vmem:[#allocation4 + $0x10] sm:$0xf] %vm1838_vm11, %v4513_v43 }
 0x217   :  { %3147 = vmatmul.msk.f32.gmra.mxu1 %vm1743_vm10, %v2180_v61  ;;  %1914 = vst.msk [vmem:[#allocation4 + $0x10] sm:$0xf] %vm1887_vm4, %v1909_v59 }
 0x219   :  { %v2073_v58 = vpop.permute.xlu2 %2072 }
 0x21a   :  { %2074 = vrot.lane.b32.xlu1 %v2069_v35, %s3227_s19 }
 0x21c   :  { %v1961_v22 = vpop.permute.xlu1 %1960 }
 0x21d   :  { %1966 = vst.msk [vmem:[#allocation4 + $0x10] sm:$0xf] %vm1939_vm12, %v1961_v22 }
 0x21e   :  { %2016 = vst.msk [vmem:[#allocation4 + $0x10] sm:$0xf] %vm1991_vm13, %v4526_v1  ;;  %v1821_v14 = vpop.permute.xlu0 %1820  ;;  %v2301_v1 = vld [vmem:[%s4796_s5 + $0x8] sm:$0xff] }
 0x21f   :  { %2065 = vst.msk [vmem:[#allocation4 + $0x10] sm:$0xf] %vm2040_vm14, %v2060_v30  ;;  %2354 = vmatpush.msrb.mxu3 %v2301_v1 }
 0x220   :  { %1826 = vst.msk [vmem:[#allocation4 + $0x18] sm:$0xf] %vm1786_vm5, %v1821_v14 }
 0x221   :  { %v1936_v51 = vpop.permute.xlu2 %1935  ;;  %2355 = vmatpush.msrb.mxu3 %v2300_v34 }
 0x224   :  { %v2110_v57 = vpop.permute.xlu1 %2109 }
 0x225   :  { %2115 = vst.msk [vmem:[#allocation4 + $0x10] sm:$0xf] %vm2090_vm15, %v2110_v57 }
 0x226   :  { %2165 = vst.msk [vmem:[#allocation4 + $0x10] sm:$0xf] %vm2140_vm0, %v2160_v0  ;;  %v1974_v27 = vpop.permute.xlu0 %1973 }
 0x229   :  { %v2087_v10 = vpop.permute.xlu2 %2086 }
 0x22c   :  { %v1870_v15 = vpop.permute.xlu1 %1869 }
 0x22d   :  { %1875 = vst.msk [vmem:[#allocation4 + $0x18] sm:$0xf] %vm1838_vm11, %v1870_v15  ;;  %v2181_v42 = vld [vmem:[#allocation4 + $0x10] sm:$0xff] }
 0x22e   :  { %1927 = vst.msk [vmem:[#allocation4 + $0x18] sm:$0xf] %vm1887_vm4, %v1922_v38  ;;  %3148 = vmatmul.msk.f32.gmra.mxu1 %vm1743_vm10, %v2181_v42  ;;  %v2123_v62 = vpop.permute.xlu0 %2122 }
 0x22f   :  { %1979 = vst.msk [vmem:[#allocation4 + $0x18] sm:$0xf] %vm1939_vm12, %v1974_v27 }
 0x231   :  { %v1848_v26 = vpop.permute.xlu2 %1847 }
 0x234   :  { %v2023_v24 = vpop.permute.xlu1 %2022 }
 0x235   :  { %2028 = vst.msk [vmem:[#allocation4 + $0x18] sm:$0xf] %vm1991_vm13, %v2023_v24 }
 0x236   :  { %2078 = vst.msk [vmem:[#allocation4 + $0x18] sm:$0xf] %vm2040_vm14, %v2073_v58  ;;  %v1988_v46 = vpop.permute.xlu0 %1987 }
 0x237   :  { %2128 = vst.msk [vmem:[#allocation4 + $0x18] sm:$0xf] %vm2090_vm15, %v2123_v62  ;;  %v3161_v62 = vld [vmem:[%s4796_s5 + $0x30] sm:$0xff] }
 0x239   :  { %v2001_v43 = vpop.permute.xlu2 %2000 }
 0x23c   :  { %v2172_v7 = vpop.permute.xlu1 %2171 }
 0x23d   :  { %2177 = vst.msk [vmem:[#allocation4 + $0x18] sm:$0xf] %vm2140_vm0, %v2172_v7 }
 0x23e   :  { %v2137_v45 = vpop.permute.xlu0 %2136 }
 0x241   :  { %v2150_v49 = vpop.permute.xlu2 %2149 }
 0x244   :  { %v1884_v19 = vpop.permute.xlu1 %1883  ;;  %v2182_v3 = vld [vmem:[#allocation4 + $0x18] sm:$0xff] }
 0x245   :  { %1889 = vst.msk [vmem:[#allocation4 + $0x20] sm:$0xf] %vm1887_vm4, %v1884_v19  ;;  %3149 = vmatmul.msk.f32.gmra.mxu1 %vm1743_vm10, %v2182_v3  ;;  %v3165_v3 = vld [vmem:[%s4796_s5 + $0x48] sm:$0xff] }
 0x246   :  { %1941 = vst.msk [vmem:[#allocation4 + $0x20] sm:$0xf] %vm1939_vm12, %v1936_v51  ;;  %v1898_v29 = vpop.permute.xlu0 %1897  ;;  %v3162_v51 = vld [vmem:[%s4796_s5 + $0x38] sm:$0xff] }
 0x247   :  { %1993 = vst.msk [vmem:[#allocation4 + $0x20] sm:$0xf] %vm1991_vm13, %v1988_v46  ;;  %2417 = vmatpush.msra.mxu3 %v3162_v51 }
 0x249   :  { %2418 = vmatpush.msra.mxu3 %v3161_v62 }
 0x24a   :  { %v1911_v20 = vpop.permute.xlu2 %1910 }
 0x24c   :  { %v2037_v33 = vpop.permute.xlu1 %2036 }
 0x24d   :  { %2042 = vst.msk [vmem:[#allocation4 + $0x20] sm:$0xf] %vm2040_vm14, %v2037_v33 }
 0x24e   :  { %2092 = vst.msk [vmem:[#allocation4 + $0x20] sm:$0xf] %vm2090_vm15, %v2087_v10  ;;  %v2050_v50 = vpop.permute.xlu0 %2049  ;;  %v3158_v10 = vld [vmem:[%s4796_s5 + $0x20] sm:$0xff] }
 0x24f   :  { %2142 = vst.msk [vmem:[#allocation4 + $0x20] sm:$0xf] %vm2140_vm0, %v2137_v45  ;;  %2386 = vmatpush.msra.mxu2 %v3158_v10  ;;  %v3168_v45 = vld [vmem:[%s4796_s5 + $0x58] sm:$0xff] }
 0x252   :  { %v2062_v6 = vpop.permute.xlu2 %2061 }
 0x254   :  { %v1797_v32 = vpop.permute.xlu1 %1796 }
 0x255   :  { %1801 = vst.msk [vmem:[#allocation4 + $0x28] sm:$0xf] %vm1786_vm5, %v1797_v32 }
 0x256   :  { %1852 = vst.msk [vmem:[#allocation4 + $0x28] sm:$0xf] %vm1838_vm11, %v1848_v26  ;;  %v2183_v8 = vld [vmem:[#allocation4 + $0x20] sm:$0xff]  ;;  %v1810_v53 = vpop.permute.xlu0 %1809 }
 0x257   :  { %1902 = vst.msk [vmem:[#allocation4 + $0x28] sm:$0xf] %vm1887_vm4, %v1898_v29  ;;  %3150 = vmatmul.msk.f32.gmra.mxu1 %vm1743_vm10, %v2183_v8  ;;  %v3164_v29 = vld [vmem:[%s4796_s5 + $0x40] sm:$0xff] }
 0x258   :  { %1814 = vst.msk [vmem:[#allocation4 + $0x30] sm:$0xf] %vm1786_vm5, %v1810_v53  ;;  %v3171_v53 = vld [vmem:[%s4796_s5 + $0x68] sm:$0xff] }
 0x25a   :  { %v1823_v9 = vpop.permute.xlu2 %1822 }
 0x25b   :  { %1827 = vst.msk [vmem:[#allocation4 + $0x38] sm:$0xf] %vm1786_vm5, %v1823_v9 }
 0x25c   :  { %v1950_v44 = vpop.permute.xlu1 %1949 }
 0x25d   :  { %1954 = vst.msk [vmem:[#allocation4 + $0x28] sm:$0xf] %vm1939_vm12, %v1950_v44  ;;  %v3174_v44 = vld [vmem:[%s4796_s5 + $0x78] sm:$0xff] }
 0x25e   :  { %2005 = vst.msk [vmem:[#allocation4 + $0x28] sm:$0xf] %vm1991_vm13, %v2001_v43  ;;  %v1963_v60 = vpop.permute.xlu0 %1962 }
 0x25f   :  { %2054 = vst.msk [vmem:[#allocation4 + $0x28] sm:$0xf] %vm2040_vm14, %v2050_v50  ;;  %v3167_v50 = vld [vmem:[%s4796_s5 + $0x50] sm:$0xff] }
 0x262   :  { %v1976_v56 = vpop.permute.xlu2 %1975 }
 0x264   :  { %v2100_v54 = vpop.permute.xlu1 %2099 }
 0x265   :  { %2104 = vst.msk [vmem:[#allocation4 + $0x28] sm:$0xf] %vm2090_vm15, %v2100_v54  ;;  %v3170_v54 = vld [vmem:[%s4796_s5 + $0x60] sm:$0xff] }
 0x266   :  { %2154 = vst.msk [vmem:[#allocation4 + $0x28] sm:$0xf] %vm2140_vm0, %v2150_v49  ;;  %v2112_v12 = vpop.permute.xlu0 %2111 }
 0x26c   :  { %v1860_v16 = vpop.permute.xlu1 %1859  ;;  %v2125_v17 = vpop.permute.xlu2 %2124 }
 0x26d   :  { %1864 = vst.msk [vmem:[#allocation4 + $0x30] sm:$0xf] %vm1838_vm11, %v1860_v16  ;;  %v2184_v11 = vld [vmem:[#allocation4 + $0x28] sm:$0xff] }
 0x26e   :  { %1915 = vst.msk [vmem:[#allocation4 + $0x30] sm:$0xf] %vm1887_vm4, %v1911_v20  ;;  %3151 = vmatmul.msk.f32.gmra.mxu1 %vm1743_vm10, %v2184_v11  ;;  %v1872_v2 = vpop.permute.xlu0 %1871 }
 0x26f   :  { %1967 = vst.msk [vmem:[#allocation4 + $0x30] sm:$0xf] %vm1939_vm12, %v1963_v60 }
 0x270   :  { %1876 = vst.msk [vmem:[#allocation4 + $0x38] sm:$0xf] %vm1838_vm11, %v1872_v2 }
 0x274   :  { %v2013_v28 = vpop.permute.xlu1 %2012 }
 0x275   :  { %2017 = vst.msk [vmem:[#allocation4 + $0x30] sm:$0xf] %vm1991_vm13, %v2013_v28 }
 0x276   :  { %2066 = vst.msk [vmem:[#allocation4 + $0x30] sm:$0xf] %vm2040_vm14, %v2062_v6  ;;  %v2025_v4 = vpop.permute.xlu0 %2024 }
 0x277   :  { %2116 = vst.msk [vmem:[#allocation4 + $0x30] sm:$0xf] %vm2090_vm15, %v2112_v12  ;;  %v3173_v12 = vld [vmem:[%s4796_s5 + $0x70] sm:$0xff] }
 0x27c   :  { %v2162_v0 = vpop.permute.xlu1 %2161 }
 0x27d   :  { %2166 = vst.msk [vmem:[#allocation4 + $0x30] sm:$0xf] %vm2140_vm0, %v2162_v0 }
 0x27e   :  { %v2174_v38 = vpop.permute.xlu0 %2173 }
 0x282   :  { %v2241_v13 = vpop.f32.mrf.mxu1 }
 0x283   :  { %v2242_v41 = vadd.f32 %v4621_v31, %v2241_v13 }
 0x284   :  { %v1924_v59 = vpop.permute.xlu1 %1923  ;;  %v2185_v36 = vld [vmem:[#allocation4 + $0x30] sm:$0xff] }
 0x285   :  { %vm2265_vm6 = vcmp.ge.f32.partialorder %v2242_v41, 0.0  ;;  %v2273_v25 = vmul.f32 0.2, %v2242_v41  ;;  %1928 = vst.msk [vmem:[#allocation4 + $0x38] sm:$0xf] %vm1887_vm4, %v1924_v59  ;;  %3152 = vmatmul.msk.f32.gmra.mxu1 %vm1743_vm10, %v2185_v36  ;;  %v3180_v59 = vld [vmem:[%s4796_s5 + $0x98] sm:$0xff] }
 0x286   :  { %1980 = vst.msk [vmem:[#allocation4 + $0x38] sm:$0xf] %vm1939_vm12, %v1976_v56  ;;  %vm2824_vm12 = vcmask 261120  }
 0x287   :  { %v2281_v63 = vsel %vm2265_vm6, %v2242_v41, %v2273_v25  ;;  %2029 = vst.msk [vmem:[#allocation4 + $0x38] sm:$0xf] %vm1991_vm13, %v2025_v4  ;;  %v3177_v4 = vld [vmem:[%s4796_s5 + $0x88] sm:$0xff] }
 0x288   :  { %2290 = vst.msk [vmem:[#allocation5] sm:$0xff] %vm2289_vm1, %v2281_v63 }
 0x28c   :  { %v2075_v23 = vpop.permute.xlu1 %2074 }
 0x28d   :  { %2079 = vst.msk [vmem:[#allocation4 + $0x38] sm:$0xf] %vm2040_vm14, %v2075_v23 }
 0x28e   :  { %2129 = vst.msk [vmem:[#allocation4 + $0x38] sm:$0xf] %vm2090_vm15, %v2125_v17  ;;  %v3176_v17 = vld [vmem:[%s4796_s5 + $0x80] sm:$0xff] }
 0x28f   :  { %2178 = vst.msk [vmem:[#allocation4 + $0x38] sm:$0xf] %vm2140_vm0, %v2174_v38  ;;  %v2302_v7 = vld [vmem:[#allocation5 + $0x1] sm:$0x1]  ;;  %v2298_v19 = vld [vmem:[#allocation5] sm:$0x1] }
 0x290   :  { %v2360_v21 = vld [vmem:[#allocation5 + $0x2] sm:$0x1]  ;;  %v2392_v1 = vld [vmem:[#allocation5 + $0x3] sm:$0x1]  ;;  %v3179_v38 = vld [vmem:[%s4796_s5 + $0x90] sm:$0xff]  ;;  %vm2867_vm0 = vcmask 1024  }
 0x294   :  { %v2244_v39 = vpop.f32.mrf.mxu1 }
 0x295   :  { %v2245_v18 = vadd.f32 %v4621_v31, %v2244_v39 }
 0x296   :  { %v2186_v40 = vld [vmem:[#allocation4 + $0x38] sm:$0xff] }
 0x297   :  { %vm2266_vm2 = vcmp.ge.f32.partialorder %v2245_v18, 0.0  ;;  %v2274_v61 = vmul.f32 0.2, %v2245_v18  ;;  %3153 = vmatmul.msk.f32.gmra.mxu1 %vm1743_vm10, %v2186_v40 }
 0x299   :  { %v2282_v30 = vsel %vm2266_vm2, %v2245_v18, %v2274_v61 }
 0x29a   :  { %2291 = vst.msk [vmem:[#allocation5 + $0x8] sm:$0xff] %vm2289_vm1, %v2282_v30 }
 0x2a1   :  { %v2424_v41 = vld [vmem:[#allocation5 + $0x8] sm:$0x1]  ;;  %v2456_v63 = vld [vmem:[#allocation5 + $0x9] sm:$0x1]  ;;  %v2488_v61 = vld [vmem:[#allocation5 + $0xa] sm:$0x1] }
 0x2a2   :  { %v2520_v40 = vld [vmem:[#allocation5 + $0xb] sm:$0x1] }
 0x2ab   :  { %v2247_v55 = vpop.f32.mrf.mxu1 }
 0x2ac   :  { %v2248_v47 = vadd.f32 %v4621_v31, %v2247_v55  ;;  %v3183_v55 = vld [vmem:[%s4796_s5 + $0xa8] sm:$0xff] }
 0x2ae   :  { %vm2267_vm3 = vcmp.ge.f32.partialorder %v2248_v47, 0.0  ;;  %v2275_v22 = vmul.f32 0.2, %v2248_v47 }
 0x2b0   :  { %v2283_v35 = vsel %vm2267_vm3, %v2248_v47, %v2275_v22  ;;  %v3186_v47 = vld [vmem:[%s4796_s5 + $0xb8] sm:$0xff] }
 0x2b1   :  { %2292 = vst.msk [vmem:[#allocation5 + $0x10] sm:$0xff] %vm2289_vm1, %v2283_v35 }
 0x2c2   :  { %v2250_v58 = vpop.f32.mrf.mxu1 }
 0x2c3   :  { %v2251_v14 = vadd.f32 %v4621_v31, %v2250_v58 }
 0x2c5   :  { %vm2268_vm5 = vcmp.ge.f32.partialorder %v2251_v14, 0.0  ;;  %v2276_v57 = vmul.f32 0.2, %v2251_v14 }
 0x2c7   :  { %v2284_v27 = vsel %vm2268_vm5, %v2251_v14, %v2276_v57  ;;  %v3182_v14 = vld [vmem:[%s4796_s5 + $0xa0] sm:$0xff]  ;;  %v3185_v57 = vld [vmem:[%s4796_s5 + $0xb0] sm:$0xff] }
 0x2c8   :  { %2293 = vst.msk [vmem:[#allocation5 + $0x18] sm:$0xff] %vm2289_vm1, %v2284_v27 }
 0x2d4   :  { %v2253_v15 = vpop.f32.mrf.mxu1 }
 0x2d5   :  { %v2254_v42 = vadd.f32 %v4621_v31, %v2253_v15 }
 0x2d7   :  { %vm2269_vm10 = vcmp.ge.f32.partialorder %v2254_v42, 0.0  ;;  %v2277_v24 = vmul.f32 0.2, %v2254_v42 }
 0x2d9   :  { %v2285_v48 = vsel %vm2269_vm10, %v2254_v42, %v2277_v24  ;;  %v2552_v42 = vld [vmem:[#allocation5 + $0x10] sm:$0x1]  ;;  %v2584_v24 = vld [vmem:[#allocation5 + $0x11] sm:$0x1] }
 0x2da   :  { %2294 = vst.msk [vmem:[#allocation5 + $0x20] sm:$0xff] %vm2289_vm1, %v2285_v48  ;;  %v3189_v48 = vld [vmem:[%s4796_s5 + $0xc8] sm:$0xff] }
 0x2e1   :  { %v2303_v26 = vld [vmem:[#allocation5 + $0x21] sm:$0x1]  ;;  %v2299_v46 = vld [vmem:[#allocation5 + $0x20] sm:$0x1]  ;;  %v2361_v20 = vld [vmem:[#allocation5 + $0x22] sm:$0x1] }
 0x2e2   :  { %v2309_v52 = vrot.slane %v2303_v26, 7  ;;  %v2336_v43 = vrot.slane %v2299_v46, 7  ;;  %v2393_v32 = vld [vmem:[#allocation5 + $0x23] sm:$0x1]  ;;  %v2367_v8 = vrot.slane %v2361_v20, 7  ;;  %v3192_v26 = vld [vmem:[%s4796_s5 + $0xd8] sm:$0xff] }
 0x2e3   :  { %v2399_v6 = vrot.slane %v2393_v32, 7  ;;  %v2616_v32 = vld [vmem:[#allocation5 + $0x12] sm:$0x1] }
 0x2e4   :  { %v2311_v49 = vsel %vm2310_vm7, %v2309_v52, %v2302_v7  ;;  %v2337_v33 = vsel %vm2310_vm7, %v2336_v43, %v2298_v19  ;;  %v2368_v9 = vsel %vm2310_vm7, %v2367_v8, %v2360_v21  ;;  %v3188_v52 = vld [vmem:[%s4796_s5 + $0xc0] sm:$0xff]  ;;  %v2648_v8 = vld [vmem:[#allocation5 + $0x13] sm:$0x1]  ;;  %v3198_v21 = vld [vmem:[%s4796_s5 + $0xf8] sm:$0xff] }
 0x2e5   :  { %3156 = vmatmul.msk.f32.vlgmr.msrb.gmra.mxu2 %vm2289_vm1, %v2311_v49  ;;  %3157 = vmatmul.msk.f32.vlgmr.msrb.gmra.mxu3 %vm2289_vm1, %v2337_v33  ;;  %v2400_v60 = vsel %vm2310_vm7, %v2399_v6, %v2392_v1  ;;  %v3195_v6 = vld [vmem:[%s4796_s5 + $0xe8] sm:$0xff] }
 0x2e6   :  { %2449 = vmatpush.msrb.mxu2 %v3165_v3  ;;  %2481 = vmatpush.msrb.mxu3 %v3168_v45  ;;  %v3191_v3 = vld [vmem:[%s4796_s5 + $0xd0] sm:$0xff] }
 0x2e8   :  { %2450 = vmatpush.msrb.mxu2 %v3164_v29  ;;  %2482 = vmatpush.msrb.mxu3 %v3167_v50 }
 0x2eb   :  { %v2256_v16 = vpop.f32.mrf.mxu1 }
 0x2ec   :  { %v2257_v11 = vadd.f32 %v4621_v31, %v2256_v16  ;;  %v2680_v16 = vld [vmem:[#allocation5 + $0x18] sm:$0x1] }
 0x2ed   :  { %3160 = vmatmul.msk.f32.vlgmr.msra.gmra.mxu2 %vm2289_vm1, %v2368_v9  ;;  %3163 = vmatmul.msk.f32.vlgmr.msra.gmra.mxu3 %vm2289_vm1, %v2400_v60 }
 0x2ee   :  { %2513 = vmatpush.msra.mxu2 %v3171_v53  ;;  %2545 = vmatpush.msra.mxu3 %v3174_v44  ;;  %vm2270_vm8 = vcmp.ge.f32.partialorder %v2257_v11, 0.0  ;;  %v2278_v2 = vmul.f32 0.2, %v2257_v11  ;;  %v3194_v53 = vld [vmem:[%s4796_s5 + $0xe0] sm:$0xff]  ;;  %v3197_v44 = vld [vmem:[%s4796_s5 + $0xf0] sm:$0xff] }
 0x2f0   :  { %2514 = vmatpush.msra.mxu2 %v3170_v54  ;;  %2546 = vmatpush.msra.mxu3 %v3173_v12  ;;  %v2286_v28 = vsel %vm2270_vm8, %v2257_v11, %v2278_v2  ;;  %v2712_v11 = vld [vmem:[#allocation5 + $0x19] sm:$0x1] }
 0x2f1   :  { %2295 = vst.msk [vmem:[#allocation5 + $0x28] sm:$0xff] %vm2289_vm1, %v2286_v28 }
 0x2f8   :  { %v2425_v0 = vld [vmem:[#allocation5 + $0x28] sm:$0x1]  ;;  %v2457_v13 = vld [vmem:[#allocation5 + $0x29] sm:$0x1]  ;;  %v2489_v5 = vld [vmem:[#allocation5 + $0x2a] sm:$0x1] }
 0x2f9   :  { %v2431_v25 = vrot.slane %v2425_v0, 7  ;;  %v2463_v56 = vrot.slane %v2457_v13, 7  ;;  %v2521_v34 = vld [vmem:[#allocation5 + $0x2b] sm:$0x1]  ;;  %v2495_v39 = vrot.slane %v2489_v5, 7 }
 0x2fa   :  { %v2527_v18 = vrot.slane %v2521_v34, 7  ;;  %v2817_v34 = vld [vmem:[%s4798_s7 + $0x8] sm:$0xff] }
 0x2fb   :  { %v2432_v36 = vsel %vm2310_vm7, %v2431_v25, %v2424_v41  ;;  %v2464_v23 = vsel %vm2310_vm7, %v2463_v56, %v2456_v63  ;;  %v2496_v35 = vsel %vm2310_vm7, %v2495_v39, %v2488_v61  ;;  %v2744_v56 = vld [vmem:[#allocation5 + $0x1a] sm:$0x1]  ;;  %v2776_v63 = vld [vmem:[#allocation5 + $0x1b] sm:$0x1] }
 0x2fc   :  { %3166 = vmatmul.msk.f32.vlgmr.msrb.gmra.mxu2 %vm2289_vm1, %v2432_v36  ;;  %3169 = vmatmul.msk.f32.vlgmr.msrb.gmra.mxu3 %vm2289_vm1, %v2464_v23  ;;  %v2528_v58 = vsel %vm2310_vm7, %v2527_v18, %v2520_v40  ;;  %v2819_v36 = vld [vmem:[%s4798_s7 + $0x18] sm:$0xff]  ;;  %v2818_v23 = vld [vmem:[%s4798_s7 + $0x10] sm:$0xff]  ;;  %v2816_v40 = vld [vmem:[%s4798_s7] sm:$0xff] }
 0x2fd   :  { %2577 = vmatpush.msrb.mxu2 %v3177_v4  ;;  %2609 = vmatpush.msrb.mxu3 %v3180_v59 }
 0x2fe   :  { %2840 = vmatpush.msrb.mxu1 %v2819_v36 }
 0x2ff   :  { %2578 = vmatpush.msrb.mxu2 %v3176_v17  ;;  %2610 = vmatpush.msrb.mxu3 %v3179_v38 }
 0x300   :  { %2841 = vmatpush.msrb.mxu1 %v2818_v23 }
 0x302   :  { %v2259_v30 = vpop.f32.mrf.mxu1  ;;  %2842 = vmatpush.msrb.mxu1 %v2817_v34 }
 0x303   :  { %v2260_v22 = vadd.f32 %v4621_v31, %v2259_v30 }
 0x304   :  { %3172 = vmatmul.msk.f32.vlgmr.msra.gmra.mxu2 %vm2289_vm1, %v2496_v35  ;;  %3175 = vmatmul.msk.f32.vlgmr.msra.gmra.mxu3 %vm2289_vm1, %v2528_v58 }
 0x305   :  { %vm2271_vm9 = vcmp.ge.f32.partialorder %v2260_v22, 0.0  ;;  %v2279_v37 = vmul.f32 0.2, %v2260_v22  ;;  %2641 = vmatpush.msra.mxu2 %v3183_v55  ;;  %2673 = vmatpush.msra.mxu3 %v3186_v47 }
 0x306   :  { %2843 = vmatpush.msrb.mxu1 %v2816_v40 }
 0x307   :  { %v2287_v51 = vsel %vm2271_vm9, %v2260_v22, %v2279_v37  ;;  %2642 = vmatpush.msra.mxu2 %v3182_v14  ;;  %2674 = vmatpush.msra.mxu3 %v3185_v57 }
 0x308   :  { %2296 = vst.msk [vmem:[#allocation5 + $0x30] sm:$0xff] %vm2289_vm1, %v2287_v51 }
 0x30f   :  { %v2553_v27 = vld [vmem:[#allocation5 + $0x30] sm:$0x1]  ;;  %v2585_v15 = vld [vmem:[#allocation5 + $0x31] sm:$0x1]  ;;  %v2617_v43 = vld [vmem:[#allocation5 + $0x32] sm:$0x1] }
 0x310   :  { %v2559_v10 = vrot.slane %v2553_v27, 7  ;;  %v2591_v62 = vrot.slane %v2585_v15, 7  ;;  %v2649_v19 = vld [vmem:[#allocation5 + $0x33] sm:$0x1]  ;;  %v2623_v33 = vrot.slane %v2617_v43, 7  ;;  %v14_v27 = vstv %s4799_s8 }
 0x311   :  { %v2655_v29 = vrot.slane %v2649_v19, 7  ;;  %15 = vst [vmem:[#allocation6] sm:$0x1] %v14_v27 }
 0x312   :  { %v2560_v46 = vsel %vm2310_vm7, %v2559_v10, %v2552_v42  ;;  %v2592_v7 = vsel %vm2310_vm7, %v2591_v62, %v2584_v24 }
 0x313   :  { %3178 = vmatmul.msk.f32.vlgmr.msrb.gmra.mxu2 %vm2289_vm1, %v2560_v46  ;;  %3181 = vmatmul.msk.f32.vlgmr.msrb.gmra.mxu3 %vm2289_vm1, %v2592_v7  ;;  %v2656_v1 = vsel %vm2310_vm7, %v2655_v29, %v2648_v8 }
 0x314   :  { %v2262_v45 = vpop.f32.mrf.mxu1  ;;  %2705 = vmatpush.msrb.mxu2 %v3189_v48  ;;  %2737 = vmatpush.msrb.mxu3 %v3192_v26 }
 0x315   :  { %v2263_v49 = vadd.f32 %v4621_v31, %v2262_v45  ;;  %v2624_v31 = vsel %vm2310_vm7, %v2623_v33, %v2616_v32  ;;  %v3215_v45 = vld [vmem:[%s4797_s6] ss:$0 sm:$0xff] }
 0x316   :  { %2706 = vmatpush.msrb.mxu2 %v3188_v52  ;;  %2738 = vmatpush.msrb.mxu3 %v3191_v3 }
 0x317   :  { %vm2272_vm11 = vcmp.ge.f32.partialorder %v2263_v49, 0.0  ;;  %v2280_v20 = vmul.f32 0.2, %v2263_v49 }
 0x319   :  { %v2288_v50 = vsel %vm2272_vm11, %v2263_v49, %v2280_v20 }
 0x31a   :  { %2297 = vst.msk [vmem:[#allocation5 + $0x38] sm:$0xff] %vm2289_vm1, %v2288_v50  ;;  %v3216_v50 = vld [vmem:[#allocation6] ss:$0 sm:$0xff] }
 0x31b   :  { %3184 = vmatmul.msk.f32.vlgmr.msra.gmra.mxu2 %vm2289_vm1, %v2624_v31  ;;  %3187 = vmatmul.msk.f32.vlgmr.msra.gmra.mxu3 %vm2289_vm1, %v2656_v1 }
 0x31c   :  { %2769 = vmatpush.msra.mxu2 %v3195_v6  ;;  %2801 = vmatpush.msra.mxu3 %v3198_v21 }
 0x31e   :  { %2770 = vmatpush.msra.mxu2 %v3194_v53  ;;  %2802 = vmatpush.msra.mxu3 %v3197_v44 }
 0x321   :  { %v2681_v9 = vld [vmem:[#allocation5 + $0x38] sm:$0x1]  ;;  %v2713_v60 = vld [vmem:[#allocation5 + $0x39] sm:$0x1]  ;;  %v2745_v0 = vld [vmem:[#allocation5 + $0x3a] sm:$0x1] }
 0x322   :  { %v2687_v54 = vrot.slane %v2681_v9, 7  ;;  %v2719_v12 = vrot.slane %v2713_v60, 7  ;;  %v2777_v13 = vld [vmem:[#allocation5 + $0x3b] sm:$0x1]  ;;  %v2751_v41 = vrot.slane %v2745_v0, 7 }
 0x323   :  { %v2783_v25 = vrot.slane %v2777_v13, 7 }
 0x324   :  { %v2688_v2 = vsel %vm2310_vm7, %v2687_v54, %v2680_v16  ;;  %v2720_v28 = vsel %vm2310_vm7, %v2719_v12, %v2712_v11  ;;  %v2752_v4 = vsel %vm2310_vm7, %v2751_v41, %v2744_v56 }
 0x325   :  { %3190 = vmatmul.msk.f32.vlgmr.msrb.gmra.mxu2 %vm2289_vm1, %v2688_v2  ;;  %3193 = vmatmul.msk.f32.vlgmr.msrb.gmra.mxu3 %vm2289_vm1, %v2720_v28  ;;  %v2784_v59 = vsel %vm2310_vm7, %v2783_v25, %v2776_v63 }
 0x32d   :  { %3196 = vmatmul.msk.f32.vlgmr.msra.gmra.mxu2 %vm2289_vm1, %v2752_v4  ;;  %3199 = vmatmul.msk.f32.vlgmr.msra.gmra.mxu3 %vm2289_vm1, %v2784_v59 }
 0x368   :  { %v2331_v17 = vpop.f32.mrf.mxu2  ;;  %v2357_v5 = vpop.f32.mrf.mxu3 }
 0x369   :  { %v2358_v30 = vadd.f32 %v2357_v5, %v2331_v17 }
 0x370   :  { %v2388_v38 = vpop.f32.mrf.mxu2  ;;  %v2420_v39 = vpop.f32.mrf.mxu3 }
 0x371   :  { %v2391_v55 = vadd.f32 %v2388_v38, %v2358_v30 }
 0x373   :  { %v2423_v35 = vadd.f32 %v2420_v39, %v2391_v55 }
 0x37f   :  { %v2452_v18 = vpop.f32.mrf.mxu2  ;;  %v2484_v61 = vpop.f32.mrf.mxu3 }
 0x380   :  { %v2455_v58 = vadd.f32 %v2452_v18, %v2423_v35 }
 0x382   :  { %v2487_v37 = vadd.f32 %v2484_v61, %v2455_v58 }
 0x387   :  { %v2516_v47 = vpop.f32.mrf.mxu2  ;;  %v2548_v22 = vpop.f32.mrf.mxu3 }
 0x388   :  { %v2519_v51 = vadd.f32 %v2516_v47, %v2487_v37 }
 0x38a   :  { %v2551_v15 = vadd.f32 %v2548_v22, %v2519_v51 }
 0x396   :  { %v2580_v14 = vpop.f32.mrf.mxu2  ;;  %v2612_v57 = vpop.f32.mrf.mxu3 }
 0x397   :  { %v2583_v42 = vadd.f32 %v2580_v14, %v2551_v15 }
 0x399   :  { %v2615_v24 = vadd.f32 %v2612_v57, %v2583_v42 }
 0x39e   :  { %v2644_v10 = vpop.f32.mrf.mxu2  ;;  %v2676_v62 = vpop.f32.mrf.mxu3 }
 0x39f   :  { %v2647_v48 = vadd.f32 %v2644_v10, %v2615_v24 }
 0x3a1   :  { %v2679_v7 = vadd.f32 %v2676_v62, %v2647_v48 }
 0x3a8   :  { %v2708_v26 = vpop.f32.mrf.mxu2  ;;  %v2740_v46 = vpop.f32.mrf.mxu3 }
 0x3a9   :  { %v2711_v52 = vadd.f32 %v2708_v26, %v2679_v7 }
 0x3ab   :  { %v2743_v43 = vadd.f32 %v2740_v46, %v2711_v52 }
 0x3b0   :  { %v2772_v19 = vpop.f32.mrf.mxu2  ;;  %v2804_v49 = vpop.f32.mrf.mxu3 }
 0x3b1   :  { %v2775_v3 = vadd.f32 %v2772_v19, %v2743_v43 }
 0x3b3   :  { %v2807_v33 = vadd.f32 %v2804_v49, %v2775_v3 }
 0x3b5   :  { %v2812_v29 = vadd.f32 %v3215_v45, %v2807_v33 }
 0x3b7   :  { %vm2813_vm4 = vcmp.ge.f32.partialorder %v2812_v29, 0.0  ;;  %v2814_v20 = vmul.f32 0.2, %v2812_v29 }
 0x3b9   :  { %v2815_v32 = vsel %vm2813_vm4, %v2812_v29, %v2814_v20 }
 0x3ba   :  { %3200 = vmatmul.msk.f32.vlgmr.msrb.gmra.mxu1 %vm2824_vm12, %v2815_v32 }
 0x437   :  { %v2845_v8 = vpop.f32.mrf.mxu1 }
 0x438   :  { %v2846_v6 = vadd.f32 %v3216_v50, %v2845_v8 }
 0x43a   :  { %v3201_v21 = vmul.f32 -1.442695, %v2846_v6 }
 0x43c   :  { %3217 = vpow2.f32 %v3201_v21 }
 0x442   :  { %v3218_v31 = vpop.eup %3217 }
 0x443   :  { %v2851_v1 = vadd.f32 1.0, %v3218_v31 }
 0x445   :  { %3219 = vrcp.f32 %v2851_v1  ;;  %v2863_v60 = vand.u32 2147483648, %v2851_v1  ;;  %v2861_v12 = vand.u32 2147483647, %v2851_v1  ;;  %vm2857_vm14 = vweird.f32 %v2851_v1 }
 0x447   :  { %v2864_v11 = vor.u32 1.1754944e-38, %v2863_v60  ;;  %vm2862_vm6 = vcmp.eq.f32.partialorder %v2861_v12, 8.507059e+37 }
 0x44b   :  { %v3220_v53 = vpop.eup %3219 }
 0x44c   :  { %v2853_v44 = vmul.f32 %v3220_v53, %v2851_v1  ;;  %vm2858_vm13 = vweird.f32 %v3220_v53 }
 0x44d   :  { %vm2859_vm15 = vmor %vm2857_vm14, %vm2858_vm13 }
 0x44e   :  { %v2854_v9 = vsub.f32 1.0, %v2853_v44 }
 0x450   :  { %v2855_v54 = vmul.f32 %v3220_v53, %v2854_v9 }
 0x452   :  { %v2856_v16 = vadd.f32 %v3220_v53, %v2855_v54 }
 0x454   :  { %v2860_v2 = vsel %vm2859_vm15, %v3220_v53, %v2856_v16 }
 0x455   :  { %v2865_v28 = vsel %vm2862_vm6, %v2864_v11, %v2860_v2 }
 0x456   :  { %2868 = vst.msk [vmem:[%s4800_s9] sm:$0x3] %vm2867_vm0, %v2865_v28 }

</bundles_post_ra>
